<compile_context>
chip_gen: v7x
topology: tpu7x:2x2x1
jax: 0.10.0
libtpu: 0.0.40
codegen_flags: <defaults>
</compile_context>

<pallas_src>
import functools

import jax
import jax.numpy as jnp
from jax import lax
from jax.experimental import pallas as pl
from jax.experimental.pallas import tpu as pltpu


# ----------------------------------------------------------------------------
# Helpers
# ----------------------------------------------------------------------------

def _largest_divisor_leq(n, cap):
    cap = max(1, min(n, cap))
    for d in range(cap, 0, -1):
        if n % d == 0:
            return d
    return 1


# ----------------------------------------------------------------------------
# Kernel 1: fused 1x1-conv + ReLU stem (all `pop` stages in one streaming pass)
# ----------------------------------------------------------------------------

def _stem_kernel(x_ref, *refs):
    # refs = (w1, b1, w2, b2, ..., out)
    o_ref = refs[-1]
    h = x_ref[...]                                            # (tile_m, Cin)
    for idx in range(0, len(refs) - 1, 2):
        w = refs[idx][...]                                    # (Cin_l, Cout_l)
        b = refs[idx + 1][...]                                # (1, Cout_l)
        h = jnp.maximum(
            jnp.dot(h, w, preferred_element_type=jnp.float32) + b, 0.0)
    o_ref[...] = h                                            # (tile_m, Cout)


def stem_forward(params, x_nchw, pop=3, *, target_rows=2048):
    """Fused stem: runs the first `pop` 1x1-conv+ReLU blocks in one pallas_call.

    Returns (latent_r NCHW, latent3 (N, HW, Cout))."""
    N, Cin, H, W = x_nchw.shape
    HW = H * W
    M = N * HW

    wbs = []
    for layer in range(1, pop + 1):
        wbs.append(params[f"w{layer}"])
        wbs.append(params[f"b{layer}"])
    Cout = wbs[-2].shape[1]

    # Whole images per tile; large row tiles per the perf review (target ~2048 rows).
    imgs = _largest_divisor_leq(N, max(1, target_rows // HW))
    tile_m = imgs * HW
    assert tile_m % 8 == 0 or tile_m == M, "spatial tile must be sublane-aligned"

    # Single NCHW -> channels-last transpose at the model boundary.
    x2 = jnp.transpose(x_nchw, (0, 2, 3, 1)).reshape(M, Cin)

    in_specs = [pl.BlockSpec((tile_m, Cin), lambda i: (i, 0))]
    for arr in wbs:
        in_specs.append(pl.BlockSpec(arr.shape, lambda i: (0, 0)))

    lat2 = pl.pallas_call(
        _stem_kernel,
        out_shape=jax.ShapeDtypeStruct((M, Cout), jnp.float32),
        grid=(M // tile_m,),
        in_specs=in_specs,
        out_specs=pl.BlockSpec((tile_m, Cout), lambda i: (i, 0)),
        compiler_params=pltpu.CompilerParams(dimension_semantics=("parallel",)),
    )(x2, *wbs)

    latent3 = lat2.reshape(N, HW, Cout)
    latent_r = jnp.transpose(lat2.reshape(N, H, W, Cout), (0, 3, 1, 2))
    return latent_r, latent3


# ----------------------------------------------------------------------------
# Kernel 2: fused spatial mean + unbiased variance (one pass over the latent)
# ----------------------------------------------------------------------------
# TODO(synk): fuse this epilogue into the stem kernel itself to save one extra HBM read
# of the latent (requires an in-kernel (tile_m, C) -> (imgs, HW, C) reshape).

def _pool_var_kernel(z_ref, pooled_ref, var_ref, *, hw):
    z = z_ref[...]                                            # (imgs, HW, C)
    mu = jnp.sum(z, axis=1, keepdims=True) * (1.0 / hw)       # (imgs, 1, C)
    d = z - mu
    var = jnp.sum(d * d, axis=1, keepdims=True) * (1.0 / (hw - 1))  # unbiased (torch default)
    pooled_ref[...] = mu
    var_ref[...] = var


def pool_and_var(x3, *, target_rows=2048):
    """x3: (N, HW, C) -> (pooled (N, C), unbiased variance over HW (N, C))."""
    N, HW, C = x3.shape
    imgs = _largest_divisor_leq(N, max(1, target_rows // HW))
    kernel = functools.partial(_pool_var_kernel, hw=HW)
    pooled3, var3 = pl.pallas_call(
        kernel,
        out_shape=(jax.ShapeDtypeStruct((N, 1, C), jnp.float32),
                   jax.ShapeDtypeStruct((N, 1, C), jnp.float32)),
        grid=(N // imgs,),
        in_specs=[pl.BlockSpec((imgs, HW, C), lambda i: (i, 0, 0))],
        out_specs=(pl.BlockSpec((imgs, 1, C), lambda i: (i, 0, 0)),
                   pl.BlockSpec((imgs, 1, C), lambda i: (i, 0, 0))),
        compiler_params=pltpu.CompilerParams(dimension_semantics=("parallel",)),
    )(x3)
    return pooled3[:, 0, :], var3[:, 0, :]


# ----------------------------------------------------------------------------
# Kernel 3: fused IFD Adam loop (single kernel, analytic gradient, 200 iterations)
# ----------------------------------------------------------------------------
# loss(lam) = CE((pooled + softplus(lam)*eps) @ wh + bh, labels)
#             + beta * mean_{N,C}[ 0.5*(p_var/(q+d) + log((q+d)/(p_var+d)) - 1) ],
# with q = softplus(lam)^2.  Gradient and Adam (torch defaults, bias-corrected)
# are computed entirely inside the kernel; lam/m/v stay resident across iterations.
#
# TODO(synk): for very large N*C*IFD_iter, generate eps in-kernel with
# pltpu.prng_seed/prng_random_bits instead of pre-staging eps_all in VMEM.

def _ifd_kernel(pooled_ref, pvar_ref, onehot_ref, wh_ref, wht_ref, bh_ref, eps_ref,
                lamb_ref, *, iters, lr, beta):
    pooled = pooled_ref[...]                                  # (N, C)
    p_var = pvar_ref[...]                                     # (N, C)
    onehot = onehot_ref[...]                                  # (N, K)
    wh = wh_ref[...]                                          # (C, K)
    wht = wht_ref[...]                                        # (K, C)
    bh = bh_ref[...]                                          # (1, K)

    n = pooled.shape[0]
    nc = pooled.shape[0] * pooled.shape[1]
    delta = 1e-10

    def softplus(x):
        return jnp.maximum(x, 0.0) + jnp.log(1.0 + jnp.exp(-jnp.abs(x)))

    def sigmoid(x):
        return 1.0 / (1.0 + jnp.exp(-x))

    def body(i, carry):
        lam, m, v, b1p, b2p = carry
        eps = eps_ref[i]                                      # (N, C) slice from VMEM
        lamb = softplus(lam)

        # forward (pool hoisted: only (N, C) tensors touched)
        z = pooled + lamb * eps
        logits = jnp.dot(z, wh, preferred_element_type=jnp.float32) + bh   # (N, K)
        mx = jnp.max(logits, axis=-1, keepdims=True)
        e = jnp.exp(logits - mx)
        probs = e / jnp.sum(e, axis=-1, keepdims=True)

        # analytic gradient wrt lam
        dlogits = (probs - onehot) * (1.0 / n)                              # CE mean over batch
        dpooled = jnp.dot(dlogits, wht, preferred_element_type=jnp.float32)  # (N, C)
        dce_dlamb = dpooled * eps
        q = lamb * lamb + delta
        dkl_dq = 0.5 * (1.0 / q - p_var / (q * q)) * (1.0 / nc)
        g = (dce_dlamb + beta * dkl_dq * 2.0 * lamb) * sigmoid(lam)

        # Adam (torch defaults, bias-corrected); b1p/b2p carry beta^t as (1,1) arrays.
        b1p = b1p * 0.9
        b2p = b2p * 0.999
        m = 0.9 * m + 0.1 * g
        v = 0.999 * v + 0.001 * (g * g)
        mhat = m / (1.0 - b1p)
        vhat = v / (1.0 - b2p)
        lam = lam - lr * mhat / (jnp.sqrt(vhat) + 1e-8)
        return lam, m, v, b1p, b2p

    zeros = jnp.zeros(pooled.shape, jnp.float32)
    ones11 = jnp.ones((1, 1), jnp.float32)
    lam, _, _, _, _ = lax.fori_loop(0, iters, body,
                                    (zeros, zeros, zeros, ones11, ones11))
    lamb_ref[...] = softplus(lam)


def ifd_optimize(pooled, p_var, onehot, wh, wh_t, bh, eps_all, *, iters, lr, beta):
    N, C = pooled.shape
    kernel = functools.partial(_ifd_kernel, iters=iters, lr=lr, beta=beta)
    return pl.pallas_call(
        kernel,
        out_shape=jax.ShapeDtypeStruct((N, C), jnp.float32),
        in_specs=[pl.BlockSpec(memory_space=pltpu.MemorySpace.VMEM)] * 7,
        out_specs=pl.BlockSpec(memory_space=pltpu.MemorySpace.VMEM),
    )(pooled, p_var, onehot, wh, wh_t, bh, eps_all)


# ----------------------------------------------------------------------------
# Kernel 4: fused masked heads + in-kernel argmax
# ----------------------------------------------------------------------------
# robust_index = (softplus(lambda)^2 > max_{N,C} spatial_var)  (GLOBAL max — reference
# semantics from sample_robust_and_non_robust_latent).  Because the mask is per-channel,
# pool(index * (latent + ns*eps)) == index * (pooled_latent + ns*pooled_eps), so all four
# head evaluations reduce to (N, C) elementwise + a (N, C)@(C, K) matmul.

def _head_predict_kernel(noise_ref, pooled_ref, pvar_ref, lamb_ref,
                         eps1_ref, eps2_ref, wh_ref, bh_ref,
                         preds_ref, rindex_ref):
    ns = noise_ref[0, 0]                                      # scalar from SMEM
    pooled = pooled_ref[...]                                  # (N, C)
    lamb = lamb_ref[...]                                      # (N, C)
    wh = wh_ref[...]                                          # (C, K)
    bh = bh_ref[...]                                          # (1, K)
    k = wh.shape[1]

    rmax = jnp.max(pvar_ref[...], axis=1, keepdims=True)      # (N, 1)
    rmax = jnp.max(rmax, axis=0, keepdims=True)               # (1, 1) global max
    robust = (lamb * lamb > rmax).astype(jnp.float32)         # (N, C)
    rindex_ref[...] = robust

    def predict(z):
        logits = jnp.dot(z, wh, preferred_element_type=jnp.float32) + bh   # (N, K)
        mx = jnp.max(logits, axis=-1, keepdims=True)
        lane = lax.broadcasted_iota(jnp.int32, logits.shape, 1)
        # argmax (first max index) without leaving the kernel
        return jnp.min(jnp.where(logits >= mx, lane, k), axis=-1)          # (N,) int32

    preds_ref[0, :] = predict(robust * pooled)
    preds_ref[1, :] = predict((1.0 - robust) * pooled)
    preds_ref[2, :] = predict(robust * (pooled + ns * eps1_ref[...]))
    preds_ref[3, :] = predict((1.0 - robust) * (pooled + ns * eps2_ref[...]))


def head_predict(pooled, p_var, lamb, pooled_eps_r, pooled_eps_nr, noise, wh, bh):
    N, C = pooled.shape
    noise_arr = jnp.full((1, 1), noise, jnp.float32)
    return pl.pallas_call(
        _head_predict_kernel,
        out_shape=(jax.ShapeDtypeStruct((4, N), jnp.int32),
                   jax.ShapeDtypeStruct((N, C), jnp.float32)),
        in_specs=[pl.BlockSpec(memory_space=pltpu.MemorySpace.SMEM)]
        + [pl.BlockSpec(memory_space=pltpu.MemorySpace.VMEM)] * 7,
        out_specs=(pl.BlockSpec(memory_space=pltpu.MemorySpace.VMEM),
                   pl.BlockSpec(memory_space=pltpu.MemorySpace.VMEM)),
    )(noise_arr, pooled, p_var, lamb, pooled_eps_r, pooled_eps_nr, wh, bh)


# ----------------------------------------------------------------------------
# Synthetic model parameters (stand-in for `self.model` with pop / intermediate_propagate)
# ----------------------------------------------------------------------------

def init_params(key, cin=3, c1=8, c2=16, c3=16, num_classes=10):
    ks = jax.random.split(key, 4)

    def w(k, shp, scale):
        return (scale * jax.random.normal(k, shp)).astype(jnp.float32)

    return {
        "w1": w(ks[0], (cin, c1), 0.3), "b1": jnp.zeros((1, c1), jnp.float32),
        "w2": w(ks[1], (c1, c2), 0.2),  "b2": jnp.zeros((1, c2), jnp.float32),
        "w3": w(ks[2], (c2, c3), 0.2),  "b3": jnp.zeros((1, c3), jnp.float32),
        "wh": w(ks[3], (c3, num_classes), 0.3),
        "bh": jnp.zeros((1, num_classes), jnp.float32),
    }


# ----------------------------------------------------------------------------
# InformativeFeaturePackage
# ----------------------------------------------------------------------------

class InformativeFeaturePackage:
    def __init__(self, params, eps=0.03, attack_iter=10, IFD_iter=200, IFD_lr=0.1):
        self.params = params
        self.eps = eps
        self.attack_iter = attack_iter
        self.alpha = self.eps / attack_iter * 2.3
        self.eta = 0.01
        self.IFD_iter = IFD_iter
        self.IFD_lr = IFD_lr
        self.cw_c = 0.1
        self.pgd_c = 10
        self.beta = 0.3
        self.grad = 1

    # --- shared core: stem -> pooled/var -> fused IFD Adam kernel ------------
    def _features_core(self, x, labels, pop_number, key):
        params = self.params
        latent_r, latent3 = stem_forward(params, x, pop=pop_number)
        C = latent3.shape[-1]
        assert C == params["wh"].shape[0], \
            "head expects the latent from the final stem block (pop_number mismatch)"

        pooled, p_var = pool_and_var(latent3)                 # (N, C), (N, C)

        N = pooled.shape[0]
        K = params["wh"].shape[1]
        onehot = jax.nn.one_hot(labels, K, dtype=jnp.float32)
        # eps for all IFD iterations staged once in VMEM (tiny: IFD_iter * N * C).
        eps_all = jax.random.normal(key, (self.IFD_iter, N, C), jnp.float32)

        lamb = ifd_optimize(pooled, p_var, onehot,
                            params["wh"], params["wh"].T, params["bh"], eps_all,
                            iters=self.IFD_iter, lr=self.IFD_lr, beta=self.beta)
        return latent_r, pooled, p_var, lamb

    # --- find_features (forward_version=True path) ---------------------------
    def find_features(self, x, labels, pop_number, key):
        latent_r, pooled, p_var, lamb = self._features_core(x, labels, pop_number, key)
        N, C = pooled.shape
        wh, bh = self.params["wh"], self.params["bh"]

        zeros_nc = jnp.zeros((N, C), jnp.float32)             # no noise in this path
        preds, robust_index = head_predict(pooled, p_var, lamb,
                                           zeros_nc, zeros_nc, 0.0, wh, bh)
        non_robust_index = 1.0 - robust_index
        robust_latent_z = latent_r * robust_index[:, :, None, None]
        non_robust_latent_z = latent_r * non_robust_index[:, :, None, None]
        return (latent_r, robust_latent_z, non_robust_latent_z,
                preds[0], preds[1], robust_index, non_robust_index)

    # --- forward --------------------------------------------------------------
    def forward(self, x, labels, pop_number=3, noise=0.0, key=None):
        if key is None:
            key = jax.random.PRNGKey(0)
        k_ifd, k_n1, k_n2 = jax.random.split(key, 3)

        latent_r, pooled, p_var, lamb = self._features_core(x, labels, pop_number, k_ifd)
        N, C = pooled.shape
        HW = latent_r.shape[2] * latent_r.shape[3]
        wh, bh = self.params["wh"], self.params["bh"]

        static_zero_noise = isinstance(noise, (int, float)) and noise == 0
        if static_zero_noise:
            # Never stream zero eps tensors through HBM for the no-noise case.
            pe1 = jnp.zeros((N, C), jnp.float32)
            pe2 = jnp.zeros((N, C), jnp.float32)
        else:
            # Per-pixel noise then (linear) pooling — same semantics as the reference.
            eps1 = jax.random.normal(k_n1, (N, HW, C), jnp.float32)
            eps2 = jax.random.normal(k_n2, (N, HW, C), jnp.float32)
            pe1, _ = pool_and_var(eps1)
            pe2, _ = pool_and_var(eps2)

        preds, _ = head_predict(pooled, p_var, lamb, pe1, pe2, noise, wh, bh)
        # rows: robust / non-robust / robust+noise / non-robust+noise predictions
        return preds[0], preds[1], preds[2], preds[3]

    # TODO(synk): NRF / NRF2 / RF / RF2 CW-style attack loops (host-side early exit via
    # .item()) are not translated; only find_features / forward are implemented.


# ----------------------------------------------------------------------------
# Demo
# ----------------------------------------------------------------------------

if __name__ == "__main__":
    key = jax.random.PRNGKey(0)
    k_param, k_img, k_lab, k_fwd1, k_fwd2, k_ff = jax.random.split(key, 6)

    N, Cin, H, W = 2, 3, 16, 16
    num_classes = 10
    C3 = 16

    params = init_params(k_param, cin=Cin, c1=8, c2=16, c3=C3, num_classes=num_classes)
    images = jax.random.uniform(k_img, (N, Cin, H, W), jnp.float32)   # NCHW like PyTorch
    labels = jax.random.randint(k_lab, (N,), 0, num_classes, jnp.int32)

    ifp = InformativeFeaturePackage(params, IFD_iter=200, IFD_lr=0.1)

    @jax.jit
    def run_no_noise(images, labels, key):
        return ifp.forward(images, labels, pop_number=3, noise=0.0, key=key)

    @jax.jit
    def run_with_noise(images, labels, key):
        return ifp.forward(images, labels, pop_number=3, noise=0.1, key=key)

    @jax.jit
    def run_find_features(images, labels, key):
        return ifp.find_features(images, labels, 3, key)

    outs0 = jax.block_until_ready(run_no_noise(images, labels, k_fwd1))
    outs1 = jax.block_until_ready(run_with_noise(images, labels, k_fwd2))
    assert all(o.shape == (N,) for o in outs0)
    assert all(o.shape == (N,) for o in outs1)

    ff = jax.block_until_ready(run_find_features(images, labels, k_ff))
    latent_r, r_z, nr_z, r_pred, nr_pred, r_idx, nr_idx = ff
    assert latent_r.shape == (N, C3, H, W)
    assert r_z.shape == latent_r.shape and nr_z.shape == latent_r.shape
    assert r_pred.shape == (N,) and nr_pred.shape == (N,)
    assert r_idx.shape == (N, C3) and nr_idx.shape == (N, C3)

    print("KERNEL_OK")
</pallas_src>

<mosaic_0001>
module attributes {stable_mosaic.version = 11 : i64} {
  func.func @_stem_kernel(%arg0: i32, %arg1: memref<512x3xf32, #tpu.memory_space<vmem>>, %arg2: memref<3x8xf32, #tpu.memory_space<vmem>>, %arg3: memref<1x8xf32, #tpu.memory_space<vmem>>, %arg4: memref<8x16xf32, #tpu.memory_space<vmem>>, %arg5: memref<1x16xf32, #tpu.memory_space<vmem>>, %arg6: memref<16x16xf32, #tpu.memory_space<vmem>>, %arg7: memref<1x16xf32, #tpu.memory_space<vmem>>, %arg8: memref<512x16xf32, #tpu.memory_space<vmem>>) attributes {dimension_semantics = [#tpu.dimension_semantics<parallel>], iteration_bounds = array<i64: 1>, scalar_prefetch = 0 : i64, scratch_operands = 0 : i64, tpu.core_type = #tpu.core_type<tc>, window_params = [{transform_indices = @transform_0, window_bounds = array<i64: 512, 3>}, {pipeline_mode = #tpu.pipeline_mode<synchronous>, transform_indices = @transform_1, window_bounds = array<i64: 3, 8>}, {pipeline_mode = #tpu.pipeline_mode<synchronous>, transform_indices = @transform_2, window_bounds = array<i64: 1, 8>}, {pipeline_mode = #tpu.pipeline_mode<synchronous>, transform_indices = @transform_3, window_bounds = array<i64: 8, 16>}, {pipeline_mode = #tpu.pipeline_mode<synchronous>, transform_indices = @transform_4, window_bounds = array<i64: 1, 16>}, {pipeline_mode = #tpu.pipeline_mode<synchronous>, transform_indices = @transform_5, window_bounds = array<i64: 16, 16>}, {pipeline_mode = #tpu.pipeline_mode<synchronous>, transform_indices = @transform_6, window_bounds = array<i64: 1, 16>}, {transform_indices = @transform_7, window_bounds = array<i64: 512, 16>}]} {
    %c0 = arith.constant 0 : index
    %c0_0 = arith.constant 0 : index
    %0 = vector.load %arg1[%c0, %c0_0] : memref<512x3xf32, #tpu.memory_space<vmem>>, vector<512x3xf32>
    %c0_1 = arith.constant 0 : index
    %c0_2 = arith.constant 0 : index
    %1 = vector.load %arg2[%c0_1, %c0_2] : memref<3x8xf32, #tpu.memory_space<vmem>>, vector<3x8xf32>
    %c0_3 = arith.constant 0 : index
    %c0_4 = arith.constant 0 : index
    %2 = vector.load %arg3[%c0_3, %c0_4] : memref<1x8xf32, #tpu.memory_space<vmem>>, vector<1x8xf32>
    %cst = arith.constant dense<0.000000e+00> : vector<512x8xf32>
    %3 = tpu.matmul %0, %1, %cst {dimension_numbers = #tpu.dot_dimension_numbers<[1], [0], [0], [1], [0, 0, 1, 1], [], []>} : vector<512x3xf32>, vector<3x8xf32>, vector<512x8xf32> -> vector<512x8xf32>
    %4 = vector.broadcast %2 : vector<1x8xf32> to vector<512x8xf32>
    %5 = arith.addf %3, %4 : vector<512x8xf32>
    %cst_5 = arith.constant 0.000000e+00 : f32
    %6 = vector.broadcast %cst_5 : f32 to vector<512x8xf32>
    %7 = arith.maximumf %5, %6 : vector<512x8xf32>
    %c0_6 = arith.constant 0 : index
    %c0_7 = arith.constant 0 : index
    %8 = vector.load %arg4[%c0_6, %c0_7] : memref<8x16xf32, #tpu.memory_space<vmem>>, vector<8x16xf32>
    %c0_8 = arith.constant 0 : index
    %c0_9 = arith.constant 0 : index
    %9 = vector.load %arg5[%c0_8, %c0_9] : memref<1x16xf32, #tpu.memory_space<vmem>>, vector<1x16xf32>
    %cst_10 = arith.constant dense<0.000000e+00> : vector<512x16xf32>
    %10 = tpu.matmul %7, %8, %cst_10 {dimension_numbers = #tpu.dot_dimension_numbers<[1], [0], [0], [1], [0, 0, 1, 1], [], []>} : vector<512x8xf32>, vector<8x16xf32>, vector<512x16xf32> -> vector<512x16xf32>
    %11 = vector.broadcast %9 : vector<1x16xf32> to vector<512x16xf32>
    %12 = arith.addf %10, %11 : vector<512x16xf32>
    %cst_11 = arith.constant 0.000000e+00 : f32
    %13 = vector.broadcast %cst_11 : f32 to vector<512x16xf32>
    %14 = arith.maximumf %12, %13 : vector<512x16xf32>
    %c0_12 = arith.constant 0 : index
    %c0_13 = arith.constant 0 : index
    %15 = vector.load %arg6[%c0_12, %c0_13] : memref<16x16xf32, #tpu.memory_space<vmem>>, vector<16x16xf32>
    %c0_14 = arith.constant 0 : index
    %c0_15 = arith.constant 0 : index
    %16 = vector.load %arg7[%c0_14, %c0_15] : memref<1x16xf32, #tpu.memory_space<vmem>>, vector<1x16xf32>
    %cst_16 = arith.constant dense<0.000000e+00> : vector<512x16xf32>
    %17 = tpu.matmul %14, %15, %cst_16 {dimension_numbers = #tpu.dot_dimension_numbers<[1], [0], [0], [1], [0, 0, 1, 1], [], []>} : vector<512x16xf32>, vector<16x16xf32>, vector<512x16xf32> -> vector<512x16xf32>
    %18 = vector.broadcast %16 : vector<1x16xf32> to vector<512x16xf32>
    %19 = arith.addf %17, %18 : vector<512x16xf32>
    %cst_17 = arith.constant 0.000000e+00 : f32
    %20 = vector.broadcast %cst_17 : f32 to vector<512x16xf32>
    %21 = arith.maximumf %19, %20 : vector<512x16xf32>
    %c0_18 = arith.constant 0 : index
    %c0_19 = arith.constant 0 : index
    %22 = vector.load %arg8[%c0_18, %c0_19] : memref<512x16xf32, #tpu.memory_space<vmem>>, vector<512x16xf32>
    tpu.vector_store %arg8[%c0_18, %c0_19], %21 {strides = array<i32>} : memref<512x16xf32, #tpu.memory_space<vmem>>, vector<512x16xf32>,
    return
  }
  func.func @transform_0(%arg0: i32) -> (i32, i32) {
    %c0_i32 = arith.constant 0 : i32
    %c0_i32_0 = arith.constant 0 : i32
    return %arg0, %c0_i32 : i32, i32
  }
  func.func @transform_1(%arg0: i32) -> (i32, i32) {
    %c0_i32 = arith.constant 0 : i32
    %c0_i32_0 = arith.constant 0 : i32
    %c0_i32_1 = arith.constant 0 : i32
    return %c0_i32, %c0_i32_0 : i32, i32
  }
  func.func @transform_2(%arg0: i32) -> (i32, i32) {
    %c0_i32 = arith.constant 0 : i32
    %c0_i32_0 = arith.constant 0 : i32
    %c0_i32_1 = arith.constant 0 : i32
    return %c0_i32, %c0_i32_0 : i32, i32
  }
  func.func @transform_3(%arg0: i32) -> (i32, i32) {
    %c0_i32 = arith.constant 0 : i32
    %c0_i32_0 = arith.constant 0 : i32
    %c0_i32_1 = arith.constant 0 : i32
    return %c0_i32, %c0_i32_0 : i32, i32
  }
  func.func @transform_4(%arg0: i32) -> (i32, i32) {
    %c0_i32 = arith.constant 0 : i32
    %c0_i32_0 = arith.constant 0 : i32
    %c0_i32_1 = arith.constant 0 : i32
    return %c0_i32, %c0_i32_0 : i32, i32
  }
  func.func @transform_5(%arg0: i32) -> (i32, i32) {
    %c0_i32 = arith.constant 0 : i32
    %c0_i32_0 = arith.constant 0 : i32
    %c0_i32_1 = arith.constant 0 : i32
    return %c0_i32, %c0_i32_0 : i32, i32
  }
  func.func @transform_6(%arg0: i32) -> (i32, i32) {
    %c0_i32 = arith.constant 0 : i32
    %c0_i32_0 = arith.constant 0 : i32
    %c0_i32_1 = arith.constant 0 : i32
    return %c0_i32, %c0_i32_0 : i32, i32
  }
  func.func @transform_7(%arg0: i32) -> (i32, i32) {
    %c0_i32 = arith.constant 0 : i32
    %c0_i32_0 = arith.constant 0 : i32
    return %arg0, %c0_i32 : i32, i32
  }
}

module attributes {stable_mosaic.version = 11 : i64} {
  func.func @_pool_var_kernel(%arg0: i32, %arg1: memref<2x256x16xf32, #tpu.memory_space<vmem>>, %arg2: memref<2x1x16xf32, #tpu.memory_space<vmem>>, %arg3: memref<2x1x16xf32, #tpu.memory_space<vmem>>) attributes {dimension_semantics = [#tpu.dimension_semantics<parallel>], iteration_bounds = array<i64: 1>, scalar_prefetch = 0 : i64, scratch_operands = 0 : i64, tpu.core_type = #tpu.core_type<tc>, window_params = [{transform_indices = @transform_0, window_bounds = array<i64: 2, 256, 16>}, {transform_indices = @transform_1, window_bounds = array<i64: 2, 1, 16>}, {transform_indices = @transform_2, window_bounds = array<i64: 2, 1, 16>}]} {
    %c0 = arith.constant 0 : index
    %c0_0 = arith.constant 0 : index
    %c0_1 = arith.constant 0 : index
    %0 = vector.load %arg1[%c0, %c0_0, %c0_1] : memref<2x256x16xf32, #tpu.memory_space<vmem>>, vector<2x256x16xf32>
    %cst = arith.constant dense<0.000000e+00> : vector<2x16xf32>
    %1 = vector.multi_reduction <add>, %0, %cst [1] : vector<2x256x16xf32> to vector<2x16xf32>
    %2 = vector.shape_cast %1 : vector<2x16xf32> to vector<2x1x16xf32>
    %cst_2 = arith.constant 3.906250e-03 : f32
    %3 = vector.broadcast %cst_2 : f32 to vector<2x1x16xf32>
    %4 = arith.mulf %2, %3 : vector<2x1x16xf32>
    %5 = vector.broadcast %4 : vector<2x1x16xf32> to vector<2x256x16xf32>
    %6 = arith.subf %0, %5 : vector<2x256x16xf32>
    %7 = arith.mulf %6, %6 : vector<2x256x16xf32>
    %cst_3 = arith.constant dense<0.000000e+00> : vector<2x16xf32>
    %8 = vector.multi_reduction <add>, %7, %cst_3 [1] : vector<2x256x16xf32> to vector<2x16xf32>
    %9 = vector.shape_cast %8 : vector<2x16xf32> to vector<2x1x16xf32>
    %cst_4 = arith.constant 0.00392156886 : f32
    %10 = vector.broadcast %cst_4 : f32 to vector<2x1x16xf32>
    %11 = arith.mulf %9, %10 : vector<2x1x16xf32>
    %c0_5 = arith.constant 0 : index
    %c0_6 = arith.constant 0 : index
    %c0_7 = arith.constant 0 : index
    %12 = vector.load %arg2[%c0_5, %c0_6, %c0_7] : memref<2x1x16xf32, #tpu.memory_space<vmem>>, vector<2x1x16xf32>
    tpu.vector_store %arg2[%c0_5, %c0_6, %c0_7], %4 {strides = array<i32>} : memref<2x1x16xf32, #tpu.memory_space<vmem>>, vector<2x1x16xf32>,
    %c0_8 = arith.constant 0 : index
    %c0_9 = arith.constant 0 : index
    %c0_10 = arith.constant 0 : index
    %13 = vector.load %arg3[%c0_8, %c0_9, %c0_10] : memref<2x1x16xf32, #tpu.memory_space<vmem>>, vector<2x1x16xf32>
    tpu.vector_store %arg3[%c0_8, %c0_9, %c0_10], %11 {strides = array<i32>} : memref<2x1x16xf32, #tpu.memory_space<vmem>>, vector<2x1x16xf32>,
    return
  }
  func.func @transform_0(%arg0: i32) -> (i32, i32, i32) {
    %c0_i32 = arith.constant 0 : i32
    %c0_i32_0 = arith.constant 0 : i32
    %c0_i32_1 = arith.constant 0 : i32
    return %arg0, %c0_i32, %c0_i32_0 : i32, i32, i32
  }
  func.func @transform_1(%arg0: i32) -> (i32, i32, i32) {
    %c0_i32 = arith.constant 0 : i32
    %c0_i32_0 = arith.constant 0 : i32
    %c0_i32_1 = arith.constant 0 : i32
    return %arg0, %c0_i32, %c0_i32_0 : i32, i32, i32
  }
  func.func @transform_2(%arg0: i32) -> (i32, i32, i32) {
    %c0_i32 = arith.constant 0 : i32
    %c0_i32_0 = arith.constant 0 : i32
    %c0_i32_1 = arith.constant 0 : i32
    return %arg0, %c0_i32, %c0_i32_0 : i32, i32, i32
  }
}

module attributes {stable_mosaic.version = 11 : i64} {
  func.func @_ifd_kernel(%arg0: memref<2x16xf32, #tpu.memory_space<vmem>>, %arg1: memref<2x16xf32, #tpu.memory_space<vmem>>, %arg2: memref<2x10xf32, #tpu.memory_space<vmem>>, %arg3: memref<16x10xf32, #tpu.memory_space<vmem>>, %arg4: memref<10x16xf32, #tpu.memory_space<vmem>>, %arg5: memref<1x10xf32, #tpu.memory_space<vmem>>, %arg6: memref<200x2x16xf32, #tpu.memory_space<vmem>>, %arg7: memref<2x16xf32, #tpu.memory_space<vmem>>) attributes {dimension_semantics = [], scalar_prefetch = 0 : i64, scratch_operands = 0 : i64, tpu.core_type = #tpu.core_type<tc>} {
    %c0 = arith.constant 0 : index
    %c0_0 = arith.constant 0 : index
    %0 = vector.load %arg0[%c0, %c0_0] : memref<2x16xf32, #tpu.memory_space<vmem>>, vector<2x16xf32>
    %c0_1 = arith.constant 0 : index
    %c0_2 = arith.constant 0 : index
    %1 = vector.load %arg1[%c0_1, %c0_2] : memref<2x16xf32, #tpu.memory_space<vmem>>, vector<2x16xf32>
    %c0_3 = arith.constant 0 : index
    %c0_4 = arith.constant 0 : index
    %2 = vector.load %arg2[%c0_3, %c0_4] : memref<2x10xf32, #tpu.memory_space<vmem>>, vector<2x10xf32>
    %c0_5 = arith.constant 0 : index
    %c0_6 = arith.constant 0 : index
    %3 = vector.load %arg3[%c0_5, %c0_6] : memref<16x10xf32, #tpu.memory_space<vmem>>, vector<16x10xf32>
    %c0_7 = arith.constant 0 : index
    %c0_8 = arith.constant 0 : index
    %4 = vector.load %arg4[%c0_7, %c0_8] : memref<10x16xf32, #tpu.memory_space<vmem>>, vector<10x16xf32>
    %c0_9 = arith.constant 0 : index
    %c0_10 = arith.constant 0 : index
    %5 = vector.load %arg5[%c0_9, %c0_10] : memref<1x10xf32, #tpu.memory_space<vmem>>, vector<1x10xf32>
    %cst = arith.constant 0.000000e+00 : f32
    %6 = vector.broadcast %cst : f32 to vector<2x16xf32>
    %cst_11 = arith.constant 1.000000e+00 : f32
    %7 = vector.broadcast %cst_11 : f32 to vector<1x1xf32>
    %c0_i32 = arith.constant 0 : i32
    %c200_i32 = arith.constant 200 : i32
    %8 = arith.addi %c0_i32, %c200_i32 : i32
    %c1_i32 = arith.constant 1 : i32
    %9:5 = scf.for %arg8 = %c0_i32 to %8 step %c1_i32 iter_args(%arg9 = %6, %arg10 = %6, %arg11 = %6, %arg12 = %7, %arg13 = %7) -> (vector<2x16xf32>, vector<2x16xf32>, vector<2x16xf32>, vector<1x1xf32>, vector<1x1xf32>)  : i32 {
      %21 = arith.index_cast %arg8 : i32 to index
      %c0_18 = arith.constant 0 : index
      %c0_19 = arith.constant 0 : index
      %22 = vector.load %arg6[%21, %c0_18, %c0_19] : memref<200x2x16xf32, #tpu.memory_space<vmem>>, vector<1x2x16xf32>
      %23 = vector.shape_cast %22 : vector<1x2x16xf32> to vector<2x16xf32>
      %cst_20 = arith.constant 0.000000e+00 : f32
      %24 = vector.broadcast %cst_20 : f32 to vector<2x16xf32>
      %25 = arith.maximumf %arg9, %24 : vector<2x16xf32>
      %26 = math.absf %arg9 : vector<2x16xf32>
      %cst_21 = arith.constant 0.000000e+00 : f32
      %27 = vector.broadcast %cst_21 : f32 to vector<2x16xf32>
      %28 = arith.subf %27, %26 : vector<2x16xf32>
      %29 = math.exp %28 : vector<2x16xf32>
      %cst_22 = arith.constant 1.000000e+00 : f32
      %30 = vector.broadcast %cst_22 : f32 to vector<2x16xf32>
      %31 = arith.addf %30, %29 : vector<2x16xf32>
      %32 = math.log %31 : vector<2x16xf32>
      %33 = arith.addf %25, %32 : vector<2x16xf32>
      %34 = arith.mulf %33, %23 : vector<2x16xf32>
      %35 = arith.addf %0, %34 : vector<2x16xf32>
      %cst_23 = arith.constant dense<0.000000e+00> : vector<2x10xf32>
      %36 = tpu.matmul %35, %3, %cst_23 {dimension_numbers = #tpu.dot_dimension_numbers<[1], [0], [0], [1], [0, 0, 1, 1], [], []>} : vector<2x16xf32>, vector<16x10xf32>, vector<2x10xf32> -> vector<2x10xf32>
      %37 = vector.broadcast %5 : vector<1x10xf32> to vector<2x10xf32>
      %38 = arith.addf %36, %37 : vector<2x10xf32>
      %cst_24 = arith.constant dense<0xFF800000> : vector<2xf32>
      %39 = vector.multi_reduction <maximumf>, %38, %cst_24 [1] : vector<2x10xf32> to vector<2xf32>
      %40 = vector.shape_cast %39 : vector<2xf32> to vector<2x1xf32>
      %41 = vector.broadcast %40 : vector<2x1xf32> to vector<2x10xf32>
      %42 = arith.subf %38, %41 : vector<2x10xf32>
      %43 = math.exp %42 : vector<2x10xf32>
      %cst_25 = arith.constant dense<0.000000e+00> : vector<2xf32>
      %44 = vector.multi_reduction <add>, %43, %cst_25 [1] : vector<2x10xf32> to vector<2xf32>
      %45 = vector.shape_cast %44 : vector<2xf32> to vector<2x1xf32>
      %46 = vector.broadcast %45 : vector<2x1xf32> to vector<2x10xf32>
      %47 = arith.divf %43, %46 : vector<2x10xf32>
      %48 = arith.subf %47, %2 : vector<2x10xf32>
      %cst_26 = arith.constant 5.000000e-01 : f32
      %49 = vector.broadcast %cst_26 : f32 to vector<2x10xf32>
      %50 = arith.mulf %48, %49 : vector<2x10xf32>
      %cst_27 = arith.constant dense<0.000000e+00> : vector<2x16xf32>
      %51 = tpu.matmul %50, %4, %cst_27 {dimension_numbers = #tpu.dot_dimension_numbers<[1], [0], [0], [1], [0, 0, 1, 1], [], []>} : vector<2x10xf32>, vector<10x16xf32>, vector<2x16xf32> -> vector<2x16xf32>
      %52 = arith.mulf %51, %23 : vector<2x16xf32>
      %53 = arith.mulf %33, %33 : vector<2x16xf32>
      %cst_28 = arith.constant 1.000000e-10 : f32
      %54 = vector.broadcast %cst_28 : f32 to vector<2x16xf32>
      %55 = arith.addf %53, %54 : vector<2x16xf32>
      %cst_29 = arith.constant 1.000000e+00 : f32
      %56 = vector.broadcast %cst_29 : f32 to vector<2x16xf32>
      %57 = arith.divf %56, %55 : vector<2x16xf32>
      %58 = arith.mulf %55, %55 : vector<2x16xf32>
      %59 = arith.divf %1, %58 : vector<2x16xf32>
      %60 = arith.subf %57, %59 : vector<2x16xf32>
      %cst_30 = arith.constant 5.000000e-01 : f32
      %61 = vector.broadcast %cst_30 : f32 to vector<2x16xf32>
      %62 = arith.mulf %61, %60 : vector<2x16xf32>
      %cst_31 = arith.constant 3.125000e-02 : f32
      %63 = vector.broadcast %cst_31 : f32 to vector<2x16xf32>
      %64 = arith.mulf %62, %63 : vector<2x16xf32>
      %cst_32 = arith.constant 3.000000e-01 : f32
      %65 = vector.broadcast %cst_32 : f32 to vector<2x16xf32>
      %66 = arith.mulf %65, %64 : vector<2x16xf32>
      %cst_33 = arith.constant 2.000000e+00 : f32
      %67 = vector.broadcast %cst_33 : f32 to vector<2x16xf32>
      %68 = arith.mulf %66, %67 : vector<2x16xf32>
      %69 = arith.mulf %68, %33 : vector<2x16xf32>
      %70 = arith.addf %52, %69 : vector<2x16xf32>
      %cst_34 = arith.constant 0.000000e+00 : f32
      %71 = vector.broadcast %cst_34 : f32 to vector<2x16xf32>
      %72 = arith.subf %71, %arg9 : vector<2x16xf32>
      %73 = math.exp %72 : vector<2x16xf32>
      %cst_35 = arith.constant 1.000000e+00 : f32
      %74 = vector.broadcast %cst_35 : f32 to vector<2x16xf32>
      %75 = arith.addf %74, %73 : vector<2x16xf32>
      %cst_36 = arith.constant 1.000000e+00 : f32
      %76 = vector.broadcast %cst_36 : f32 to vector<2x16xf32>
      %77 = arith.divf %76, %75 : vector<2x16xf32>
      %78 = arith.mulf %70, %77 : vector<2x16xf32>
      %cst_37 = arith.constant 0.899999976 : f32
      %79 = vector.broadcast %cst_37 : f32 to vector<1x1xf32>
      %80 = arith.mulf %arg12, %79 : vector<1x1xf32>
      %cst_38 = arith.constant 9.990000e-01 : f32
      %81 = vector.broadcast %cst_38 : f32 to vector<1x1xf32>
      %82 = arith.mulf %arg13, %81 : vector<1x1xf32>
      %cst_39 = arith.constant 0.899999976 : f32
      %83 = vector.broadcast %cst_39 : f32 to vector<2x16xf32>
      %84 = arith.mulf %83, %arg10 : vector<2x16xf32>
      %cst_40 = arith.constant 1.000000e-01 : f32
      %85 = vector.broadcast %cst_40 : f32 to vector<2x16xf32>
      %86 = arith.mulf %85, %78 : vector<2x16xf32>
      %87 = arith.addf %84, %86 : vector<2x16xf32>
      %cst_41 = arith.constant 9.990000e-01 : f32
      %88 = vector.broadcast %cst_41 : f32 to vector<2x16xf32>
      %89 = arith.mulf %88, %arg11 : vector<2x16xf32>
      %90 = arith.mulf %78, %78 : vector<2x16xf32>
      %cst_42 = arith.constant 1.000000e-03 : f32
      %91 = vector.broadcast %cst_42 : f32 to vector<2x16xf32>
      %92 = arith.mulf %91, %90 : vector<2x16xf32>
      %93 = arith.addf %89, %92 : vector<2x16xf32>
      %cst_43 = arith.constant 1.000000e+00 : f32
      %94 = vector.broadcast %cst_43 : f32 to vector<1x1xf32>
      %95 = arith.subf %94, %80 : vector<1x1xf32>
      %96 = vector.broadcast %95 : vector<1x1xf32> to vector<2x16xf32>
      %97 = arith.divf %87, %96 : vector<2x16xf32>
      %cst_44 = arith.constant 1.000000e+00 : f32
      %98 = vector.broadcast %cst_44 : f32 to vector<1x1xf32>
      %99 = arith.subf %98, %82 : vector<1x1xf32>
      %100 = vector.broadcast %99 : vector<1x1xf32> to vector<2x16xf32>
      %101 = arith.divf %93, %100 : vector<2x16xf32>
      %cst_45 = arith.constant 1.000000e-01 : f32
      %102 = vector.broadcast %cst_45 : f32 to vector<2x16xf32>
      %103 = arith.mulf %102, %97 : vector<2x16xf32>
      %104 = math.sqrt %101 : vector<2x16xf32>
      %cst_46 = arith.constant 9.99999993E-9 : f32
      %105 = vector.broadcast %cst_46 : f32 to vector<2x16xf32>
      %106 = arith.addf %104, %105 : vector<2x16xf32>
      %107 = arith.divf %103, %106 : vector<2x16xf32>
      %108 = arith.subf %arg9, %107 : vector<2x16xf32>
      scf.yield %108, %87, %93, %80, %82 : vector<2x16xf32>, vector<2x16xf32>, vector<2x16xf32>, vector<1x1xf32>, vector<1x1xf32>
    }
    %c200_i32_12 = arith.constant 200 : i32
    %cst_13 = arith.constant 0.000000e+00 : f32
    %10 = vector.broadcast %cst_13 : f32 to vector<2x16xf32>
    %11 = arith.maximumf %9#0, %10 : vector<2x16xf32>
    %12 = math.absf %9#0 : vector<2x16xf32>
    %cst_14 = arith.constant 0.000000e+00 : f32
    %13 = vector.broadcast %cst_14 : f32 to vector<2x16xf32>
    %14 = arith.subf %13, %12 : vector<2x16xf32>
    %15 = math.exp %14 : vector<2x16xf32>
    %cst_15 = arith.constant 1.000000e+00 : f32
    %16 = vector.broadcast %cst_15 : f32 to vector<2x16xf32>
    %17 = arith.addf %16, %15 : vector<2x16xf32>
    %18 = math.log %17 : vector<2x16xf32>
    %19 = arith.addf %11, %18 : vector<2x16xf32>
    %c0_16 = arith.constant 0 : index
    %c0_17 = arith.constant 0 : index
    %20 = vector.load %arg7[%c0_16, %c0_17] : memref<2x16xf32, #tpu.memory_space<vmem>>, vector<2x16xf32>
    tpu.vector_store %arg7[%c0_16, %c0_17], %19 {strides = array<i32>} : memref<2x16xf32, #tpu.memory_space<vmem>>, vector<2x16xf32>,
    return
  }
}

module attributes {stable_mosaic.version = 11 : i64} {
  func.func @_head_predict_kernel(%arg0: memref<1x1xf32, #tpu.memory_space<smem>>, %arg1: memref<2x16xf32, #tpu.memory_space<vmem>>, %arg2: memref<2x16xf32, #tpu.memory_space<vmem>>, %arg3: memref<2x16xf32, #tpu.memory_space<vmem>>, %arg4: memref<2x16xf32, #tpu.memory_space<vmem>>, %arg5: memref<2x16xf32, #tpu.memory_space<vmem>>, %arg6: memref<16x10xf32, #tpu.memory_space<vmem>>, %arg7: memref<1x10xf32, #tpu.memory_space<vmem>>, %arg8: memref<4x2xi32, #tpu.memory_space<vmem>>, %arg9: memref<2x16xf32, #tpu.memory_space<vmem>>) attributes {dimension_semantics = [], scalar_prefetch = 0 : i64, scratch_operands = 0 : i64, tpu.core_type = #tpu.core_type<tc>} {
    %c0 = arith.constant 0 : index
    %c0_0 = arith.constant 0 : index
    %0 = memref.load %arg0[%c0, %c0_0] : memref<1x1xf32, #tpu.memory_space<smem>>
    %c0_1 = arith.constant 0 : index
    %c0_2 = arith.constant 0 : index
    %1 = vector.load %arg1[%c0_1, %c0_2] : memref<2x16xf32, #tpu.memory_space<vmem>>, vector<2x16xf32>
    %c0_3 = arith.constant 0 : index
    %c0_4 = arith.constant 0 : index
    %2 = vector.load %arg3[%c0_3, %c0_4] : memref<2x16xf32, #tpu.memory_space<vmem>>, vector<2x16xf32>
    %c0_5 = arith.constant 0 : index
    %c0_6 = arith.constant 0 : index
    %3 = vector.load %arg6[%c0_5, %c0_6] : memref<16x10xf32, #tpu.memory_space<vmem>>, vector<16x10xf32>
    %c0_7 = arith.constant 0 : index
    %c0_8 = arith.constant 0 : index
    %4 = vector.load %arg7[%c0_7, %c0_8] : memref<1x10xf32, #tpu.memory_space<vmem>>, vector<1x10xf32>
    %c0_9 = arith.constant 0 : index
    %c0_10 = arith.constant 0 : index
    %5 = vector.load %arg2[%c0_9, %c0_10] : memref<2x16xf32, #tpu.memory_space<vmem>>, vector<2x16xf32>
    %cst = arith.constant dense<0xFF800000> : vector<2xf32>
    %6 = vector.multi_reduction <maximumf>, %5, %cst [1] : vector<2x16xf32> to vector<2xf32>
    %7 = vector.shape_cast %6 : vector<2xf32> to vector<2x1xf32>
    %cst_11 = arith.constant dense<0xFF800000> : vector<1xf32>
    %8 = vector.multi_reduction <maximumf>, %7, %cst_11 [0] : vector<2x1xf32> to vector<1xf32>
    %9 = vector.shape_cast %8 : vector<1xf32> to vector<1x1xf32>
    %10 = arith.mulf %2, %2 : vector<2x16xf32>
    %11 = vector.broadcast %9 : vector<1x1xf32> to vector<2x16xf32>
    %12 = arith.cmpf ogt, %10, %11 : vector<2x16xf32>
    %13 = arith.extui %12 : vector<2x16xi1> to vector<2x16xi32>
    %14 = arith.sitofp %13 : vector<2x16xi32> to vector<2x16xf32>
    %c0_12 = arith.constant 0 : index
    %c0_13 = arith.constant 0 : index
    %15 = vector.load %arg9[%c0_12, %c0_13] : memref<2x16xf32, #tpu.memory_space<vmem>>, vector<2x16xf32>
    tpu.vector_store %arg9[%c0_12, %c0_13], %14 {strides = array<i32>} : memref<2x16xf32, #tpu.memory_space<vmem>>, vector<2x16xf32>,
    %16 = arith.mulf %14, %1 : vector<2x16xf32>
    %cst_14 = arith.constant dense<0.000000e+00> : vector<2x10xf32>
    %17 = tpu.matmul %16, %3, %cst_14 {dimension_numbers = #tpu.dot_dimension_numbers<[1], [0], [0], [1], [0, 0, 1, 1], [], []>} : vector<2x16xf32>, vector<16x10xf32>, vector<2x10xf32> -> vector<2x10xf32>
    %18 = vector.broadcast %4 : vector<1x10xf32> to vector<2x10xf32>
    %19 = arith.addf %17, %18 : vector<2x10xf32>
    %cst_15 = arith.constant dense<0xFF800000> : vector<2xf32>
    %20 = vector.multi_reduction <maximumf>, %19, %cst_15 [1] : vector<2x10xf32> to vector<2xf32>
    %21 = vector.shape_cast %20 : vector<2xf32> to vector<2x1xf32>
    %22 = tpu.iota {dimensions = array<i32: 1>} : vector<2x10xi32>
    %23 = vector.broadcast %21 : vector<2x1xf32> to vector<2x10xf32>
    %24 = arith.cmpf oge, %19, %23 : vector<2x10xf32>
    %c10_i32 = arith.constant 10 : i32
    %25 = vector.broadcast %c10_i32 : i32 to vector<2x10xi32>
    %26 = arith.select %24, %22, %25 : vector<2x10xi1>, vector<2x10xi32>
    %cst_16 = arith.constant dense<2147483647> : vector<2xi32>
    %27 = vector.multi_reduction <minsi>, %26, %cst_16 [1] : vector<2x10xi32> to vector<2xi32>
    %c0_17 = arith.constant 0 : index
    %c0_18 = arith.constant 0 : index
    %28 = vector.load %arg8[%c0_17, %c0_18] : memref<4x2xi32, #tpu.memory_space<vmem>>, vector<1x2xi32>
    %29 = vector.shape_cast %28 : vector<1x2xi32> to vector<2xi32>
    %30 = vector.shape_cast %27 : vector<2xi32> to vector<1x2xi32>
    tpu.vector_store %arg8[%c0_17, %c0_18], %30 {strides = array<i32>} : memref<4x2xi32, #tpu.memory_space<vmem>>, vector<1x2xi32>,
    %cst_19 = arith.constant 1.000000e+00 : f32
    %31 = vector.broadcast %cst_19 : f32 to vector<2x16xf32>
    %32 = arith.subf %31, %14 : vector<2x16xf32>
    %33 = arith.mulf %32, %1 : vector<2x16xf32>
    %cst_20 = arith.constant dense<0.000000e+00> : vector<2x10xf32>
    %34 = tpu.matmul %33, %3, %cst_20 {dimension_numbers = #tpu.dot_dimension_numbers<[1], [0], [0], [1], [0, 0, 1, 1], [], []>} : vector<2x16xf32>, vector<16x10xf32>, vector<2x10xf32> -> vector<2x10xf32>
    %35 = vector.broadcast %4 : vector<1x10xf32> to vector<2x10xf32>
    %36 = arith.addf %34, %35 : vector<2x10xf32>
    %cst_21 = arith.constant dense<0xFF800000> : vector<2xf32>
    %37 = vector.multi_reduction <maximumf>, %36, %cst_21 [1] : vector<2x10xf32> to vector<2xf32>
    %38 = vector.shape_cast %37 : vector<2xf32> to vector<2x1xf32>
    %39 = tpu.iota {dimensions = array<i32: 1>} : vector<2x10xi32>
    %40 = vector.broadcast %38 : vector<2x1xf32> to vector<2x10xf32>
    %41 = arith.cmpf oge, %36, %40 : vector<2x10xf32>
    %c10_i32_22 = arith.constant 10 : i32
    %42 = vector.broadcast %c10_i32_22 : i32 to vector<2x10xi32>
    %43 = arith.select %41, %39, %42 : vector<2x10xi1>, vector<2x10xi32>
    %cst_23 = arith.constant dense<2147483647> : vector<2xi32>
    %44 = vector.multi_reduction <minsi>, %43, %cst_23 [1] : vector<2x10xi32> to vector<2xi32>
    %c1 = arith.constant 1 : index
    %c0_24 = arith.constant 0 : index
    %45 = vector.load %arg8[%c1, %c0_24] : memref<4x2xi32, #tpu.memory_space<vmem>>, vector<1x2xi32>
    %46 = vector.shape_cast %45 : vector<1x2xi32> to vector<2xi32>
    %47 = vector.shape_cast %44 : vector<2xi32> to vector<1x2xi32>
    tpu.vector_store %arg8[%c1, %c0_24], %47 {strides = array<i32>} : memref<4x2xi32, #tpu.memory_space<vmem>>, vector<1x2xi32>,
    %c0_25 = arith.constant 0 : index
    %c0_26 = arith.constant 0 : index
    %48 = vector.load %arg4[%c0_25, %c0_26] : memref<2x16xf32, #tpu.memory_space<vmem>>, vector<2x16xf32>
    %49 = vector.broadcast %0 : f32 to vector<2x16xf32>
    %50 = arith.mulf %49, %48 : vector<2x16xf32>
    %51 = arith.addf %1, %50 : vector<2x16xf32>
    %52 = arith.mulf %14, %51 : vector<2x16xf32>
    %cst_27 = arith.constant dense<0.000000e+00> : vector<2x10xf32>
    %53 = tpu.matmul %52, %3, %cst_27 {dimension_numbers = #tpu.dot_dimension_numbers<[1], [0], [0], [1], [0, 0, 1, 1], [], []>} : vector<2x16xf32>, vector<16x10xf32>, vector<2x10xf32> -> vector<2x10xf32>
    %54 = vector.broadcast %4 : vector<1x10xf32> to vector<2x10xf32>
    %55 = arith.addf %53, %54 : vector<2x10xf32>
    %cst_28 = arith.constant dense<0xFF800000> : vector<2xf32>
    %56 = vector.multi_reduction <maximumf>, %55, %cst_28 [1] : vector<2x10xf32> to vector<2xf32>
    %57 = vector.shape_cast %56 : vector<2xf32> to vector<2x1xf32>
    %58 = tpu.iota {dimensions = array<i32: 1>} : vector<2x10xi32>
    %59 = vector.broadcast %57 : vector<2x1xf32> to vector<2x10xf32>
    %60 = arith.cmpf oge, %55, %59 : vector<2x10xf32>
    %c10_i32_29 = arith.constant 10 : i32
    %61 = vector.broadcast %c10_i32_29 : i32 to vector<2x10xi32>
    %62 = arith.select %60, %58, %61 : vector<2x10xi1>, vector<2x10xi32>
    %cst_30 = arith.constant dense<2147483647> : vector<2xi32>
    %63 = vector.multi_reduction <minsi>, %62, %cst_30 [1] : vector<2x10xi32> to vector<2xi32>
    %c2 = arith.constant 2 : index
    %c0_31 = arith.constant 0 : index
    %64 = vector.load %arg8[%c2, %c0_31] : memref<4x2xi32, #tpu.memory_space<vmem>>, vector<1x2xi32>
    %65 = vector.shape_cast %64 : vector<1x2xi32> to vector<2xi32>
    %66 = vector.shape_cast %63 : vector<2xi32> to vector<1x2xi32>
    tpu.vector_store %arg8[%c2, %c0_31], %66 {strides = array<i32>} : memref<4x2xi32, #tpu.memory_space<vmem>>, vector<1x2xi32>,
    %cst_32 = arith.constant 1.000000e+00 : f32
    %67 = vector.broadcast %cst_32 : f32 to vector<2x16xf32>
    %68 = arith.subf %67, %14 : vector<2x16xf32>
    %c0_33 = arith.constant 0 : index
    %c0_34 = arith.constant 0 : index
    %69 = vector.load %arg5[%c0_33, %c0_34] : memref<2x16xf32, #tpu.memory_space<vmem>>, vector<2x16xf32>
    %70 = vector.broadcast %0 : f32 to vector<2x16xf32>
    %71 = arith.mulf %70, %69 : vector<2x16xf32>
    %72 = arith.addf %1, %71 : vector<2x16xf32>
    %73 = arith.mulf %68, %72 : vector<2x16xf32>
    %cst_35 = arith.constant dense<0.000000e+00> : vector<2x10xf32>
    %74 = tpu.matmul %73, %3, %cst_35 {dimension_numbers = #tpu.dot_dimension_numbers<[1], [0], [0], [1], [0, 0, 1, 1], [], []>} : vector<2x16xf32>, vector<16x10xf32>, vector<2x10xf32> -> vector<2x10xf32>
    %75 = vector.broadcast %4 : vector<1x10xf32> to vector<2x10xf32>
    %76 = arith.addf %74, %75 : vector<2x10xf32>
    %cst_36 = arith.constant dense<0xFF800000> : vector<2xf32>
    %77 = vector.multi_reduction <maximumf>, %76, %cst_36 [1] : vector<2x10xf32> to vector<2xf32>
    %78 = vector.shape_cast %77 : vector<2xf32> to vector<2x1xf32>
    %79 = tpu.iota {dimensions = array<i32: 1>} : vector<2x10xi32>
    %80 = vector.broadcast %78 : vector<2x1xf32> to vector<2x10xf32>
    %81 = arith.cmpf oge, %76, %80 : vector<2x10xf32>
    %c10_i32_37 = arith.constant 10 : i32
    %82 = vector.broadcast %c10_i32_37 : i32 to vector<2x10xi32>
    %83 = arith.select %81, %79, %82 : vector<2x10xi1>, vector<2x10xi32>
    %cst_38 = arith.constant dense<2147483647> : vector<2xi32>
    %84 = vector.multi_reduction <minsi>, %83, %cst_38 [1] : vector<2x10xi32> to vector<2xi32>
    %c3 = arith.constant 3 : index
    %c0_39 = arith.constant 0 : index
    %85 = vector.load %arg8[%c3, %c0_39] : memref<4x2xi32, #tpu.memory_space<vmem>>, vector<1x2xi32>
    %86 = vector.shape_cast %85 : vector<1x2xi32> to vector<2xi32>
    %87 = vector.shape_cast %84 : vector<2xi32> to vector<1x2xi32>
    tpu.vector_store %arg8[%c3, %c0_39], %87 {strides = array<i32>} : memref<4x2xi32, #tpu.memory_space<vmem>>, vector<1x2xi32>,
    return
  }
}

</mosaic_0001>

<bundles_post_ra>
// kernel: run_no_noise.5
= control target key start
LH: loop header
LB: loop body
LE: loop exit
PB: predicated region body
PF: predicated region fallthrough
CT: control target
= control target key end

     0   :  { %vm74_vm0 = vcmask 130048   ;;  %vm483_vm1 = vcmask 122880   ;;  %s1173_s0 = inlined_call_operand.vmem [shape: f32[2,256,16], index: 0, kind: input, shape index: {}]   ;;  %s1174_s1 = inlined_call_operand.vmem [shape: f32[2,1,16], index: 1, kind: output, shape index: {0}]   ;;  %s1175_s2 = inlined_call_operand.vmem [shape: f32[2,1,16], index: 2, kind: output, shape index: {1}]  }
   0x1   :  { %v514_v0 = vld [vmem:[%s1173_s0] sm:$0xff]  ;;  %v519_v1 = vld [vmem:[%s1173_s0 + $0x8] sm:$0xff]  ;;  %v524_v2 = vld [vmem:[%s1173_s0 + $0x10] sm:$0xff] }
   0x2   :  { %v529_v3 = vld [vmem:[%s1173_s0 + $0x18] sm:$0xff]  ;;  %v75_v4 = vsel %vm74_vm0, %v514_v0, 0.0  ;;  %v76_v5 = vsel %vm74_vm0, %v519_v1, 0.0  ;;  %v78_v6 = vsel %vm74_vm0, %v524_v2, 0.0  ;;  %v540_v7 = vld [vmem:[%s1173_s0 + $0x20] sm:$0xff]  ;;  %v547_v10 = vld [vmem:[%s1173_s0 + $0x28] sm:$0xff] }
   0x3   :  { %v77_v8 = vadd.f32 %v76_v5, %v75_v4  ;;  %v80_v9 = vsel %vm74_vm0, %v529_v3, 0.0  ;;  %v82_v12 = vsel %vm74_vm0, %v540_v7, 0.0  ;;  %v554_v13 = vld [vmem:[%s1173_s0 + $0x30] sm:$0xff]  ;;  %v84_v15 = vsel %vm74_vm0, %v547_v10, 0.0  ;;  %v561_v16 = vld [vmem:[%s1173_s0 + $0x38] sm:$0xff]  ;;  %v568_v19 = vld [vmem:[%s1173_s0 + $0x40] sm:$0xff] }
   0x4   :  { %v86_v18 = vsel %vm74_vm0, %v554_v13, 0.0  ;;  %v573_v20 = vld [vmem:[%s1173_s0 + $0x100] sm:$0xff]  ;;  %v578_v22 = vld [vmem:[%s1173_s0 + $0x108] sm:$0xff]  ;;  %v583_v23 = vld [vmem:[%s1173_s0 + $0x110] sm:$0xff]  ;;  %v88_v25 = vsel %vm74_vm0, %v561_v16, 0.0  ;;  %v90_v32 = vsel %vm74_vm0, %v568_v19, 0.0 }
   0x5   :  { %v79_v11 = vadd.f32 %v78_v6, %v77_v8  ;;  %v588_v24 = vld [vmem:[%s1173_s0 + $0x118] sm:$0xff]  ;;  %v144_v26 = vsel %vm74_vm0, %v573_v20, 0.0  ;;  %v597_v27 = vld [vmem:[%s1173_s0 + $0x48] sm:$0xff]  ;;  %v145_v29 = vsel %vm74_vm0, %v578_v22, 0.0  ;;  %v147_v30 = vsel %vm74_vm0, %v583_v23, 0.0  ;;  %v606_v31 = vld [vmem:[%s1173_s0 + $0x120] sm:$0xff] }
   0x6   :  { %v146_v33 = vadd.f32 %v145_v29, %v144_v26  ;;  %v613_v34 = vld [vmem:[%s1173_s0 + $0x50] sm:$0xff]  ;;  %v149_v36 = vsel %vm74_vm0, %v588_v24, 0.0  ;;  %v620_v37 = vld [vmem:[%s1173_s0 + $0x128] sm:$0xff]  ;;  %v92_v38 = vsel %vm74_vm0, %v597_v27, 0.0  ;;  %v627_v40 = vld [vmem:[%s1173_s0 + $0x58] sm:$0xff]  ;;  %v151_v42 = vsel %vm74_vm0, %v606_v31, 0.0 }
   0x7   :  { %v81_v14 = vadd.f32 %v80_v9, %v79_v11  ;;  %v634_v43 = vld [vmem:[%s1173_s0 + $0x130] sm:$0xff]  ;;  %v94_v44 = vsel %vm74_vm0, %v613_v34, 0.0  ;;  %v641_v46 = vld [vmem:[%s1173_s0 + $0x60] sm:$0xff]  ;;  %v153_v48 = vsel %vm74_vm0, %v620_v37, 0.0  ;;  %v648_v49 = vld [vmem:[%s1173_s0 + $0x138] sm:$0xff]  ;;  %v96_v50 = vsel %vm74_vm0, %v627_v40, 0.0 }
   0x8   :  { %v148_v39 = vadd.f32 %v147_v30, %v146_v33  ;;  %v655_v52 = vld [vmem:[%s1173_s0 + $0x68] sm:$0xff]  ;;  %v155_v54 = vsel %vm74_vm0, %v634_v43, 0.0  ;;  %v662_v55 = vld [vmem:[%s1173_s0 + $0x140] sm:$0xff]  ;;  %v98_v56 = vsel %vm74_vm0, %v641_v46, 0.0  ;;  %v669_v58 = vld [vmem:[%s1173_s0 + $0x70] sm:$0xff]  ;;  %v157_v60 = vsel %vm74_vm0, %v648_v49, 0.0 }
   0x9   :  { %v83_v17 = vadd.f32 %v82_v12, %v81_v14  ;;  %v676_v61 = vld [vmem:[%s1173_s0 + $0x148] sm:$0xff]  ;;  %v100_v62 = vsel %vm74_vm0, %v655_v52, 0.0  ;;  %v683_v4 = vld [vmem:[%s1173_s0 + $0x78] sm:$0xff]  ;;  %v159_v6 = vsel %vm74_vm0, %v662_v55, 0.0  ;;  %v690_v8 = vld [vmem:[%s1173_s0 + $0x150] sm:$0xff]  ;;  %v102_v9 = vsel %vm74_vm0, %v669_v58, 0.0 }
   0xa   :  { %v150_v45 = vadd.f32 %v149_v36, %v148_v39  ;;  %v697_v12 = vld [vmem:[%s1173_s0 + $0x80] sm:$0xff]  ;;  %v725_v33 = vld [vmem:[%s1173_s0 + $0x90] sm:$0xff] }
   0xb   :  { %v85_v21 = vadd.f32 %v84_v15, %v83_v17  ;;  %v161_v15 = vsel %vm74_vm0, %v676_v61, 0.0  ;;  %v704_v17 = vld [vmem:[%s1173_s0 + $0x158] sm:$0xff]  ;;  %v718_v29 = vld [vmem:[%s1173_s0 + $0x160] sm:$0xff]  ;;  %v106_v30 = vsel %vm74_vm0, %v697_v12, 0.0 }
   0xc   :  { %v152_v51 = vadd.f32 %v151_v42, %v150_v45  ;;  %v165_v36 = vsel %vm74_vm0, %v704_v17, 0.0  ;;  %v739_v42 = vld [vmem:[%s1173_s0 + $0x98] sm:$0xff]  ;;  %v167_v45 = vsel %vm74_vm0, %v718_v29, 0.0 }
   0xd   :  { %v87_v28 = vadd.f32 %v86_v18, %v85_v21  ;;  %v104_v18 = vsel %vm74_vm0, %v683_v4, 0.0 }
   0xe   :  { %v154_v57 = vadd.f32 %v153_v48, %v152_v51  ;;  %v110_v48 = vsel %vm74_vm0, %v725_v33, 0.0  ;;  %v753_v51 = vld [vmem:[%s1173_s0 + $0xa0] sm:$0xff] }
   0xf   :  { %v89_v35 = vadd.f32 %v88_v25, %v87_v28  ;;  %v711_v25 = vld [vmem:[%s1173_s0 + $0x88] sm:$0xff]  ;;  %v163_v28 = vsel %vm74_vm0, %v690_v8, 0.0 }
  0x10   :  { %v156_v63 = vadd.f32 %v155_v54, %v154_v57  ;;  %v108_v39 = vsel %vm74_vm0, %v711_v25, 0.0  ;;  %v112_v57 = vsel %vm74_vm0, %v739_v42, 0.0 }
  0x11   :  { %v91_v41 = vadd.f32 %v90_v32, %v89_v35 }
  0x12   :  { %v158_v11 = vadd.f32 %v157_v60, %v156_v63  ;;  %v767_v60 = vld [vmem:[%s1173_s0 + $0xa8] sm:$0xff] }
  0x13   :  { %v93_v47 = vadd.f32 %v92_v38, %v91_v41  ;;  %v732_v38 = vld [vmem:[%s1173_s0 + $0x168] sm:$0xff] }
  0x14   :  { %v160_v21 = vadd.f32 %v159_v6, %v158_v11  ;;  %v169_v54 = vsel %vm74_vm0, %v732_v38, 0.0  ;;  %v114_v6 = vsel %vm74_vm0, %v753_v51, 0.0  ;;  %v781_v11 = vld [vmem:[%s1173_s0 + $0xb0] sm:$0xff] }
  0x15   :  { %v95_v53 = vadd.f32 %v94_v44, %v93_v47  ;;  %v746_v47 = vld [vmem:[%s1173_s0 + $0x170] sm:$0xff] }
  0x16   :  { %v162_v32 = vadd.f32 %v161_v15, %v160_v21  ;;  %v171_v63 = vsel %vm74_vm0, %v746_v47, 0.0  ;;  %v116_v21 = vsel %vm74_vm0, %v767_v60, 0.0 }
  0x17   :  { %v97_v59 = vadd.f32 %v96_v50, %v95_v53 }
  0x18   :  { %v164_v41 = vadd.f32 %v163_v28, %v162_v32  ;;  %v795_v28 = vld [vmem:[%s1173_s0 + $0xb8] sm:$0xff] }
  0x19   :  { %v99_v5 = vadd.f32 %v98_v56, %v97_v59  ;;  %v760_v56 = vld [vmem:[%s1173_s0 + $0x178] sm:$0xff] }
  0x1a   :  { %v166_v50 = vadd.f32 %v165_v36, %v164_v41  ;;  %v173_v15 = vsel %vm74_vm0, %v760_v56, 0.0  ;;  %v118_v36 = vsel %vm74_vm0, %v781_v11, 0.0  ;;  %v809_v41 = vld [vmem:[%s1173_s0 + $0xc0] sm:$0xff] }
  0x1b   :  { %v101_v14 = vadd.f32 %v100_v62, %v99_v5  ;;  %v774_v5 = vld [vmem:[%s1173_s0 + $0x180] sm:$0xff] }
  0x1c   :  { %v168_v59 = vadd.f32 %v167_v45, %v166_v50  ;;  %v175_v32 = vsel %vm74_vm0, %v774_v5, 0.0  ;;  %v120_v50 = vsel %vm74_vm0, %v795_v28, 0.0 }
  0x1d   :  { %v103_v26 = vadd.f32 %v102_v9, %v101_v14 }
  0x1e   :  { %v170_v9 = vadd.f32 %v169_v54, %v168_v59  ;;  %v823_v54 = vld [vmem:[%s1173_s0 + $0xc8] sm:$0xff] }
  0x1f   :  { %v105_v35 = vadd.f32 %v104_v18, %v103_v26  ;;  %v788_v18 = vld [vmem:[%s1173_s0 + $0x188] sm:$0xff]  ;;  %1193 = vst [vmem:[#allocation2_spill] sm:$0xff] %v823_v54 }
  0x20   :  { %v172_v26 = vadd.f32 %v171_v63, %v170_v9  ;;  %v177_v45 = vsel %vm74_vm0, %v788_v18, 0.0  ;;  %v122_v63 = vsel %vm74_vm0, %v809_v41, 0.0  ;;  %v837_v9 = vld [vmem:[%s1173_s0 + $0xd0] sm:$0xff] }
  0x21   :  { %v107_v44 = vadd.f32 %v106_v30, %v105_v35  ;;  %v802_v35 = vld [vmem:[%s1173_s0 + $0x190] sm:$0xff]  ;;  %1195 = vst [vmem:[#allocation4_spill] sm:$0xff] %v837_v9 }
  0x22   :  { %v179_v59 = vsel %vm74_vm0, %v802_v35, 0.0 }
  0x23   :  { %v109_v53 = vadd.f32 %v108_v39, %v107_v44  ;;  %v174_v39 = vadd.f32 %v173_v15, %v172_v26  ;;  %v124_v26 = vsel %vm74_vm0, %v823_v54, 0.0 }
  0x25   :  { %v111_v62 = vadd.f32 %v110_v48, %v109_v53  ;;  %v816_v48 = vld [vmem:[%s1173_s0 + $0x198] sm:$0xff]  ;;  %v176_v53 = vadd.f32 %v175_v32, %v174_v39 }
  0x26   :  { %v181_v15 = vsel %vm74_vm0, %v816_v48, 0.0  ;;  %v851_v32 = vld [vmem:[%s1173_s0 + $0xd8] sm:$0xff] }
  0x27   :  { %v113_v14 = vadd.f32 %v112_v57, %v111_v62  ;;  %v830_v62 = vld [vmem:[%s1173_s0 + $0x1a0] sm:$0xff]  ;;  %1197 = vst [vmem:[#allocation6_spill] sm:$0xff] %v851_v32 }
  0x28   :  { %1194 = vst [vmem:[#allocation3_spill] sm:$0xff] %v830_v62  ;;  %v183_v39 = vsel %vm74_vm0, %v830_v62, 0.0 }
  0x29   :  { %v115_v30 = vadd.f32 %v114_v6, %v113_v14  ;;  %v178_v6 = vadd.f32 %v177_v45, %v176_v53  ;;  %v126_v45 = vsel %vm74_vm0, %v837_v9, 0.0  ;;  %v865_v53 = vld [vmem:[%s1173_s0 + $0xe0] sm:$0xff] }
  0x2a   :  { %1199 = vst [vmem:[#allocation8_spill] sm:$0xff] %v865_v53  ;;  %v130_v9 = vsel %vm74_vm0, %v865_v53, 0.0 }
  0x2b   :  { %v117_v44 = vadd.f32 %v116_v21, %v115_v30  ;;  %v844_v21 = vld [vmem:[%s1173_s0 + $0x1a8] sm:$0xff]  ;;  %v180_v30 = vadd.f32 %v179_v59, %v178_v6  ;;  %v128_v6 = vsel %vm74_vm0, %v851_v32, 0.0 }
  0x2c   :  { %1196 = vst [vmem:[#allocation5_spill] sm:$0xff] %v844_v21  ;;  %v185_v59 = vsel %vm74_vm0, %v844_v21, 0.0 }
  0x2d   :  { %v119_v57 = vadd.f32 %v118_v36, %v117_v44  ;;  %v858_v44 = vld [vmem:[%s1173_s0 + $0x1b0] sm:$0xff] }
  0x2e   :  { %1198 = vst [vmem:[#allocation7_spill] sm:$0xff] %v858_v44 }
  0x2f   :  { %v121_v14 = vadd.f32 %v120_v50, %v119_v57  ;;  %v182_v50 = vadd.f32 %v181_v15, %v180_v30  ;;  %v879_v15 = vld [vmem:[%s1173_s0 + $0xe8] sm:$0xff] }
  0x30   :  { %1201 = vst [vmem:[#allocation10_spill] sm:$0xff] %v879_v15  ;;  %v132_v32 = vsel %vm74_vm0, %v879_v15, 0.0 }
  0x31   :  { %v123_v36 = vadd.f32 %v122_v63, %v121_v14  ;;  %v872_v63 = vld [vmem:[%s1173_s0 + $0x1b8] sm:$0xff]  ;;  %v184_v14 = vadd.f32 %v183_v39, %v182_v50  ;;  %v893_v39 = vld [vmem:[%s1173_s0 + $0xf0] sm:$0xff] }
  0x32   :  { %1200 = vst [vmem:[#allocation9_spill] sm:$0xff] %v872_v63  ;;  %1203 = vst [vmem:[#allocation12_spill] sm:$0xff] %v893_v39  ;;  %v134_v53 = vsel %vm74_vm0, %v893_v39, 0.0  ;;  %v939_v39 = vld [vmem:[%s1173_s0 + $0x1e8] sm:$0xff] }
  0x33   :  { %v125_v57 = vadd.f32 %v124_v26, %v123_v36  ;;  %v187_v26 = vsel %vm74_vm0, %v858_v44, 0.0  ;;  %v886_v36 = vld [vmem:[%s1173_s0 + $0x1c0] sm:$0xff]  ;;  %v186_v21 = vadd.f32 %v185_v59, %v184_v14  ;;  %v907_v59 = vld [vmem:[%s1173_s0 + $0xf8] sm:$0xff]  ;;  %1209 = vst [vmem:[#allocation18_spill] sm:$0xff] %v939_v39 }
  0x34   :  { %1202 = vst [vmem:[#allocation11_spill] sm:$0xff] %v886_v36  ;;  %1205 = vst [vmem:[#allocation14_spill] sm:$0xff] %v907_v59 }
  0x35   :  { %v127_v30 = vadd.f32 %v126_v45, %v125_v57  ;;  %v189_v45 = vsel %vm74_vm0, %v872_v63, 0.0  ;;  %v900_v57 = vld [vmem:[%s1173_s0 + $0x1c8] sm:$0xff]  ;;  %v188_v44 = vadd.f32 %v187_v26, %v186_v21  ;;  %v136_v26 = vsel %vm74_vm0, %v907_v59, 0.0 }
  0x36   :  { %1204 = vst [vmem:[#allocation13_spill] sm:$0xff] %v900_v57  ;;  %v193_v21 = vsel %vm74_vm0, %v900_v57, 0.0 }
  0x37   :  { %v129_v50 = vadd.f32 %v128_v6, %v127_v30  ;;  %v191_v6 = vsel %vm74_vm0, %v886_v36, 0.0  ;;  %v914_v30 = vld [vmem:[%s1173_s0 + $0x1d0] sm:$0xff]  ;;  %v190_v63 = vadd.f32 %v189_v45, %v188_v44 }
  0x38   :  { %1206 = vst [vmem:[#allocation15_spill] sm:$0xff] %v914_v30  ;;  %v195_v54 = vsel %vm74_vm0, %v914_v30, 0.0 }
  0x39   :  { %v131_v14 = vadd.f32 %v130_v9, %v129_v50  ;;  %v923_v9 = vld [vmem:[%s1173_s0 + $0x1d8] sm:$0xff]  ;;  %v192_v50 = vadd.f32 %v191_v6, %v190_v63  ;;  %v946_v6 = vld [vmem:[%s1173_s0 + $0x1f0] sm:$0xff] }
  0x3a   :  { %1207 = vst [vmem:[#allocation16_spill] sm:$0xff] %v923_v9 }
  0x3b   :  { %v133_v15 = vadd.f32 %v132_v32, %v131_v14  ;;  %v932_v32 = vld [vmem:[%s1173_s0 + $0x1e0] sm:$0xff]  ;;  %v194_v44 = vadd.f32 %v193_v21, %v192_v50  ;;  %v197_v14 = vsel %vm74_vm0, %v923_v9, 0.0  ;;  %v953_v50 = vld [vmem:[%s1173_s0 + $0x1f8] sm:$0xff] }
  0x3c   :  { %1208 = vst [vmem:[#allocation17_spill] sm:$0xff] %v932_v32  ;;  %v205_v30 = vsel %vm74_vm0, %v953_v50, 0.0 }
  0x3d   :  { %v135_v36 = vadd.f32 %v134_v53, %v133_v15  ;;  %v196_v63 = vadd.f32 %v195_v54, %v194_v44  ;;  %v199_v15 = vsel %vm74_vm0, %v932_v32, 0.0  ;;  %v203_v32 = vsel %vm74_vm0, %v946_v6, 0.0 }
  0x3f   :  { %v137_v45 = vadd.f32 %v136_v26, %v135_v36  ;;  %v198_v21 = vadd.f32 %v197_v14, %v196_v63  ;;  %v201_v26 = vsel %vm74_vm0, %v939_v39, 0.0 }
  0x41   :  { %v138_v53 = vrot.slane %v137_v45, 4  ;;  %v200_v54 = vadd.f32 %v199_v15, %v198_v21 }
  0x43   :  { %v139_v36 = vadd.f32 %v138_v53, %v137_v45  ;;  %v202_v9 = vadd.f32 %v201_v26, %v200_v54 }
  0x45   :  { %v140_v44 = vrot.slane %v139_v36, 2  ;;  %v204_v14 = vadd.f32 %v203_v32, %v202_v9 }
  0x47   :  { %v141_v59 = vadd.f32 %v140_v44, %v139_v36  ;;  %v206_v63 = vadd.f32 %v205_v30, %v204_v14 }
  0x49   :  { %v142_v45 = vrot.slane %v141_v59, 1  ;;  %v207_v39 = vrot.slane %v206_v63, 4 }
  0x4b   :  { %v143_v53 = vadd.f32 %v142_v45, %v141_v59  ;;  %v208_v62 = vadd.f32 %v207_v39, %v206_v63 }
  0x4d   :  { %v959_v57 = vmul.f32 0.00390625, %v143_v53  ;;  %v209_v15 = vrot.slane %v208_v62, 2 }
  0x4f   :  { %484 = vst.msk [vmem:[%s1174_s1] sm:$0x1] %vm483_vm1, %v959_v57  ;;  %v210_v21 = vadd.f32 %v209_v15, %v208_v62  ;;  %v215_v39 = vsub.f32 %v514_v0, %v959_v57  ;;  %v216_v59 = vsub.f32 %v519_v1, %v959_v57  ;;  %v217_v30 = vsub.f32 %v524_v2, %v959_v57 }
  0x50   :  { %v218_v62 = vsub.f32 %v529_v3, %v959_v57  ;;  %v219_v9 = vsub.f32 %v540_v7, %v959_v57  ;;  %v220_v45 = vsub.f32 %v547_v10, %v959_v57  ;;  %v221_v0 = vsub.f32 %v554_v13, %v959_v57 }
  0x51   :  { %v211_v36 = vrot.slane %v210_v21, 1  ;;  %v279_v32 = vmul.f32 %v215_v39, %v215_v39  ;;  %v280_v44 = vmul.f32 %v216_v59, %v216_v59  ;;  %v281_v14 = vmul.f32 %v217_v30, %v217_v30 }
  0x52   :  { %v282_v63 = vmul.f32 %v218_v62, %v218_v62  ;;  %v283_v1 = vmul.f32 %v219_v9, %v219_v9  ;;  %v222_v10 = vsub.f32 %v561_v16, %v959_v57  ;;  %v285_v30 = vmul.f32 %v221_v0, %v221_v0 }
  0x53   :  { %v212_v26 = vadd.f32 %v211_v36, %v210_v21  ;;  %v343_v53 = vsel %vm74_vm0, %v279_v32, 0.0  ;;  %v344_v2 = vsel %vm74_vm0, %v280_v44, 0.0  ;;  %v346_v3 = vsel %vm74_vm0, %v281_v14, 0.0 }
  0x54   :  { %v345_v21 = vadd.f32 %v344_v2, %v343_v53  ;;  %v284_v36 = vmul.f32 %v220_v45, %v220_v45  ;;  %v286_v44 = vmul.f32 %v222_v10, %v222_v10  ;;  %v225_v45 = vsub.f32 %v613_v34, %v959_v57 }
  0x55   :  { %v966_v54 = vmul.f32 0.00390625, %v212_v26  ;;  %v348_v26 = vsel %vm74_vm0, %v282_v63, 0.0 }
  0x56   :  { %v347_v59 = vadd.f32 %v346_v3, %v345_v21 }
  0x57   :  { %485 = vst.msk [vmem:[%s1174_s1 + $0x1] sm:$0x1] %vm483_vm1, %v966_v54  ;;  %v247_v7 = vsub.f32 %v573_v20, %v966_v54  ;;  %v248_v15 = vsub.f32 %v578_v22, %v966_v54  ;;  %v249_v13 = vsub.f32 %v583_v23, %v966_v54  ;;  %v250_v39 = vsub.f32 %v588_v24, %v966_v54 }
  0x58   :  { %v223_v20 = vsub.f32 %v568_v19, %v959_v57  ;;  %v350_v22 = vsel %vm74_vm0, %v283_v1, 0.0  ;;  %v251_v62 = vsub.f32 %v606_v31, %v966_v54  ;;  %v349_v32 = vadd.f32 %v348_v26, %v347_v59 }
  0x59   :  { %v311_v16 = vmul.f32 %v247_v7, %v247_v7  ;;  %v312_v9 = vmul.f32 %v248_v15, %v248_v15  ;;  %v224_v23 = vsub.f32 %v597_v27, %v959_v57  ;;  %v313_v14 = vmul.f32 %v249_v13, %v249_v13 }
  0x5a   :  { %v352_v24 = vsel %vm74_vm0, %v284_v36, 0.0  ;;  %v252_v19 = vsub.f32 %v620_v37, %v966_v54  ;;  %v314_v63 = vmul.f32 %v250_v39, %v250_v39  ;;  %v351_v0 = vadd.f32 %v350_v22, %v349_v32 }
  0x5b   :  { %v226_v31 = vsub.f32 %v627_v40, %v959_v57  ;;  %v253_v1 = vsub.f32 %v634_v43, %v966_v54  ;;  %v287_v53 = vmul.f32 %v223_v20, %v223_v20  ;;  %v354_v27 = vsel %vm74_vm0, %v285_v30, 0.0 }
  0x5c   :  { %v315_v2 = vmul.f32 %v251_v62, %v251_v62  ;;  %v353_v3 = vadd.f32 %v352_v24, %v351_v0  ;;  %v412_v7 = vsel %vm74_vm0, %v311_v16, 0.0  ;;  %v413_v34 = vsel %vm74_vm0, %v312_v9, 0.0 }
  0x5d   :  { %v288_v15 = vmul.f32 %v224_v23, %v224_v23  ;;  %v356_v37 = vsel %vm74_vm0, %v286_v44, 0.0  ;;  %v414_v21 = vadd.f32 %v413_v34, %v412_v7  ;;  %v415_v10 = vsel %vm74_vm0, %v313_v14, 0.0 }
  0x5e   :  { %v254_v40 = vsub.f32 %v648_v49, %v966_v54  ;;  %v316_v13 = vmul.f32 %v252_v19, %v252_v19  ;;  %v355_v43 = vadd.f32 %v354_v27, %v353_v3  ;;  %v417_v36 = vsel %vm74_vm0, %v314_v63, 0.0 }
  0x5f   :  { %v227_v26 = vsub.f32 %v641_v46, %v959_v57  ;;  %v289_v39 = vmul.f32 %v225_v45, %v225_v45  ;;  %v358_v59 = vsel %vm74_vm0, %v287_v53, 0.0  ;;  %v416_v20 = vadd.f32 %v415_v10, %v414_v21 }
  0x60   :  { %v255_v30 = vsub.f32 %v662_v55, %v966_v54  ;;  %v317_v22 = vmul.f32 %v253_v1, %v253_v1  ;;  %v357_v62 = vadd.f32 %v356_v37, %v355_v43  ;;  %v419_v16 = vsel %vm74_vm0, %v315_v2, 0.0 }
  0x61   :  { %v228_v49 = vsub.f32 %v655_v52, %v959_v57  ;;  %v290_v9 = vmul.f32 %v226_v31, %v226_v31  ;;  %v360_v32 = vsel %vm74_vm0, %v288_v15, 0.0  ;;  %v418_v23 = vadd.f32 %v417_v36, %v416_v20 }
  0x62   :  { %v256_v46 = vsub.f32 %v676_v61, %v966_v54  ;;  %v318_v44 = vmul.f32 %v254_v40, %v254_v40  ;;  %v359_v14 = vadd.f32 %v358_v59, %v357_v62  ;;  %v421_v24 = vsel %vm74_vm0, %v316_v13, 0.0 }
  0x63   :  { %v229_v55 = vsub.f32 %v669_v58, %v959_v57  ;;  %v291_v45 = vmul.f32 %v227_v26, %v227_v26  ;;  %v362_v19 = vsel %vm74_vm0, %v289_v39, 0.0  ;;  %v420_v63 = vadd.f32 %v419_v16, %v418_v23 }
  0x64   :  { %v257_v52 = vsub.f32 %v690_v8, %v966_v54  ;;  %v319_v0 = vmul.f32 %v255_v30, %v255_v30  ;;  %v361_v31 = vadd.f32 %v360_v32, %v359_v14  ;;  %v423_v1 = vsel %vm74_vm0, %v317_v22, 0.0 }
  0x65   :  { %v230_v61 = vsub.f32 %v683_v4, %v959_v57  ;;  %v292_v53 = vmul.f32 %v228_v49, %v228_v49  ;;  %v364_v27 = vsel %vm74_vm0, %v290_v9, 0.0  ;;  %v422_v2 = vadd.f32 %v421_v24, %v420_v63 }
  0x66   :  { %v258_v58 = vsub.f32 %v704_v17, %v966_v54  ;;  %v320_v3 = vmul.f32 %v256_v46, %v256_v46  ;;  %v363_v7 = vadd.f32 %v362_v19, %v361_v31  ;;  %v425_v34 = vsel %vm74_vm0, %v318_v44, 0.0 }
  0x67   :  { %v231_v8 = vsub.f32 %v697_v12, %v959_v57  ;;  %v293_v15 = vmul.f32 %v229_v55, %v229_v55  ;;  %v366_v37 = vsel %vm74_vm0, %v291_v45, 0.0  ;;  %v424_v21 = vadd.f32 %v423_v1, %v422_v2 }
  0x68   :  { %v259_v4 = vsub.f32 %v718_v29, %v966_v54  ;;  %v321_v10 = vmul.f32 %v257_v52, %v257_v52  ;;  %v365_v40 = vadd.f32 %v364_v27, %v363_v7  ;;  %v427_v13 = vsel %vm74_vm0, %v319_v0, 0.0 }
  0x69   :  { %v232_v17 = vsub.f32 %v711_v25, %v959_v57  ;;  %v294_v43 = vmul.f32 %v230_v61, %v230_v61  ;;  %v368_v36 = vsel %vm74_vm0, %v292_v53, 0.0  ;;  %v426_v26 = vadd.f32 %v425_v34, %v424_v21 }
  0x6a   :  { %v260_v12 = vsub.f32 %v732_v38, %v966_v54  ;;  %v322_v39 = vmul.f32 %v258_v58, %v258_v58  ;;  %v367_v59 = vadd.f32 %v366_v37, %v365_v40  ;;  %v429_v20 = vsel %vm74_vm0, %v320_v3, 0.0 }
  0x6b   :  { %v233_v29 = vsub.f32 %v725_v33, %v959_v57  ;;  %v295_v30 = vmul.f32 %v231_v8, %v231_v8  ;;  %v370_v22 = vsel %vm74_vm0, %v293_v15, 0.0  ;;  %v428_v62 = vadd.f32 %v427_v13, %v426_v26 }
  0x6c   :  { %v261_v25 = vsub.f32 %v746_v47, %v966_v54  ;;  %v323_v16 = vmul.f32 %v259_v4, %v259_v4  ;;  %v369_v49 = vadd.f32 %v368_v36, %v367_v59  ;;  %v431_v9 = vsel %vm74_vm0, %v321_v10, 0.0 }
  0x6d   :  { %v234_v38 = vsub.f32 %v739_v42, %v959_v57  ;;  %v296_v32 = vmul.f32 %v232_v17, %v232_v17  ;;  %v372_v23 = vsel %vm74_vm0, %v294_v43, 0.0  ;;  %v430_v46 = vadd.f32 %v429_v20, %v428_v62 }
  0x6e   :  { %v262_v33 = vsub.f32 %v760_v56, %v966_v54  ;;  %v324_v44 = vmul.f32 %v260_v12, %v260_v12  ;;  %v371_v14 = vadd.f32 %v370_v22, %v369_v49  ;;  %v433_v24 = vsel %vm74_vm0, %v322_v39, 0.0 }
  0x6f   :  { %v235_v47 = vsub.f32 %v753_v51, %v959_v57  ;;  %v297_v55 = vmul.f32 %v233_v29, %v233_v29  ;;  %v374_v45 = vsel %vm74_vm0, %v295_v30, 0.0  ;;  %v432_v19 = vadd.f32 %v431_v9, %v430_v46  ;;  %v1213_v9 = vld [vmem:[#allocation4_spill] sm:$0xff] }
  0x70   :  { %v263_v42 = vsub.f32 %v774_v5, %v966_v54  ;;  %v325_v63 = vmul.f32 %v261_v25, %v261_v25  ;;  %v373_v52 = vadd.f32 %v372_v23, %v371_v14  ;;  %v435_v0 = vsel %vm74_vm0, %v323_v16, 0.0 }
  0x71   :  { %v236_v56 = vsub.f32 %v767_v60, %v959_v57  ;;  %v298_v31 = vmul.f32 %v234_v38, %v234_v38  ;;  %v376_v1 = vsel %vm74_vm0, %v296_v32, 0.0  ;;  %v434_v61 = vadd.f32 %v433_v24, %v432_v19 }
  0x72   :  { %v264_v51 = vsub.f32 %v788_v18, %v966_v54  ;;  %v326_v53 = vmul.f32 %v262_v33, %v262_v33  ;;  %v375_v27 = vadd.f32 %v374_v45, %v373_v52  ;;  %v437_v2 = vsel %vm74_vm0, %v324_v44, 0.0  ;;  %v1214_v33 = vld [vmem:[#allocation7_spill] sm:$0xff]  ;;  %v1216_v52 = vld [vmem:[#allocation9_spill] sm:$0xff] }
  0x73   :  { %v237_v5 = vsub.f32 %v781_v11, %v959_v57  ;;  %v299_v58 = vmul.f32 %v235_v47, %v235_v47  ;;  %v378_v3 = vsel %vm74_vm0, %v297_v55, 0.0  ;;  %v436_v7 = vadd.f32 %v435_v0, %v434_v61  ;;  %v1215_v55 = vld [vmem:[#allocation6_spill] sm:$0xff]  ;;  %v1217_v61 = vld [vmem:[#allocation8_spill] sm:$0xff] }
  0x74   :  { %v265_v60 = vsub.f32 %v802_v35, %v966_v54  ;;  %v327_v34 = vmul.f32 %v263_v42, %v263_v42  ;;  %v377_v8 = vadd.f32 %v376_v1, %v375_v27  ;;  %v439_v15 = vsel %vm74_vm0, %v325_v63, 0.0 }
  0x75   :  { %v238_v18 = vsub.f32 %v795_v28, %v959_v57  ;;  %v300_v37 = vmul.f32 %v236_v56, %v236_v56  ;;  %v380_v21 = vsel %vm74_vm0, %v298_v31, 0.0  ;;  %v438_v4 = vadd.f32 %v437_v2, %v436_v7  ;;  %v1210_v28 = vld [vmem:[#allocation3_spill] sm:$0xff] }
  0x76   :  { %v266_v11 = vsub.f32 %v816_v48, %v966_v54  ;;  %v328_v10 = vmul.f32 %v264_v51, %v264_v51  ;;  %v379_v40 = vadd.f32 %v378_v3, %v377_v8  ;;  %v441_v13 = vsel %vm74_vm0, %v326_v53, 0.0  ;;  %v1211_v48 = vld [vmem:[#allocation2_spill] sm:$0xff] }
  0x77   :  { %v239_v35 = vsub.f32 %v809_v41, %v959_v57  ;;  %v301_v17 = vmul.f32 %v237_v5, %v237_v5  ;;  %v382_v43 = vsel %vm74_vm0, %v299_v58, 0.0  ;;  %v440_v36 = vadd.f32 %v439_v15, %v438_v4  ;;  %v1212_v41 = vld [vmem:[#allocation5_spill] sm:$0xff]  ;;  %v1218_v5 = vld [vmem:[#allocation11_spill] sm:$0xff] }
  0x78   :  { %v267_v26 = vsub.f32 %v1210_v28, %v966_v54  ;;  %v329_v12 = vmul.f32 %v265_v60, %v265_v60  ;;  %v381_v39 = vadd.f32 %v380_v21, %v379_v40  ;;  %v443_v59 = vsel %vm74_vm0, %v327_v34, 0.0  ;;  %v1219_v34 = vld [vmem:[#allocation10_spill] sm:$0xff]  ;;  %v1220_v21 = vld [vmem:[#allocation13_spill] sm:$0xff]  ;;  %v1222_v28 = vld [vmem:[#allocation15_spill] sm:$0xff] }
  0x79   :  { %v240_v20 = vsub.f32 %v1211_v48, %v959_v57  ;;  %v302_v29 = vmul.f32 %v238_v18, %v238_v18  ;;  %v384_v30 = vsel %vm74_vm0, %v300_v37, 0.0  ;;  %v442_v22 = vadd.f32 %v441_v13, %v440_v36  ;;  %v1221_v13 = vld [vmem:[#allocation12_spill] sm:$0xff]  ;;  %v1223_v48 = vld [vmem:[#allocation14_spill] sm:$0xff] }
  0x7a   :  { %v268_v62 = vsub.f32 %v1212_v41, %v966_v54  ;;  %v330_v25 = vmul.f32 %v266_v11, %v266_v11  ;;  %v383_v16 = vadd.f32 %v382_v43, %v381_v39  ;;  %v445_v49 = vsel %vm74_vm0, %v328_v10, 0.0  ;;  %v1224_v41 = vld [vmem:[#allocation16_spill] sm:$0xff] }
  0x7b   :  { %v241_v38 = vsub.f32 %v1213_v9, %v959_v57  ;;  %v303_v32 = vmul.f32 %v239_v35, %v239_v35  ;;  %v386_v23 = vsel %vm74_vm0, %v301_v17, 0.0  ;;  %v444_v46 = vadd.f32 %v443_v59, %v442_v22 }
  0x7c   :  { %v269_v44 = vsub.f32 %v1214_v33, %v966_v54  ;;  %v331_v14 = vmul.f32 %v267_v26, %v267_v26  ;;  %v385_v24 = vadd.f32 %v384_v30, %v383_v16  ;;  %v447_v47 = vsel %vm74_vm0, %v329_v12, 0.0 }
  0x7d   :  { %v242_v45 = vsub.f32 %v1215_v55, %v959_v57  ;;  %v304_v19 = vmul.f32 %v240_v20, %v240_v20  ;;  %v388_v42 = vsel %vm74_vm0, %v302_v29, 0.0  ;;  %v446_v63 = vadd.f32 %v445_v49, %v444_v46  ;;  %v1226_v55 = vld [vmem:[#allocation18_spill] sm:$0xff] }
  0x7e   :  { %v270_v0 = vsub.f32 %v1216_v52, %v966_v54  ;;  %v332_v56 = vmul.f32 %v268_v62, %v268_v62  ;;  %v387_v31 = vadd.f32 %v386_v23, %v385_v24  ;;  %v449_v1 = vsel %vm74_vm0, %v330_v25, 0.0  ;;  %v1225_v23 = vld [vmem:[#allocation17_spill] sm:$0xff] }
  0x7f   :  { %v243_v51 = vsub.f32 %v1217_v61, %v959_v57  ;;  %v305_v53 = vmul.f32 %v241_v38, %v241_v38  ;;  %v390_v27 = vsel %vm74_vm0, %v303_v32, 0.0  ;;  %v448_v2 = vadd.f32 %v447_v47, %v446_v63 }
  0x80   :  { %v271_v58 = vsub.f32 %v1218_v5, %v966_v54  ;;  %v333_v3 = vmul.f32 %v269_v44, %v269_v44  ;;  %v389_v7 = vadd.f32 %v388_v42, %v387_v31  ;;  %v451_v60 = vsel %vm74_vm0, %v331_v14, 0.0 }
  0x81   :  { %v244_v8 = vsub.f32 %v1219_v34, %v959_v57  ;;  %v306_v15 = vmul.f32 %v242_v45, %v242_v45  ;;  %v392_v18 = vsel %vm74_vm0, %v304_v19, 0.0  ;;  %v450_v37 = vadd.f32 %v449_v1, %v448_v2 }
  0x82   :  { %v272_v4 = vsub.f32 %v1220_v21, %v966_v54  ;;  %v334_v11 = vmul.f32 %v270_v0, %v270_v0  ;;  %v391_v10 = vadd.f32 %v390_v27, %v389_v7  ;;  %v453_v40 = vsel %vm74_vm0, %v332_v56, 0.0 }
  0x83   :  { %v245_v35 = vsub.f32 %v1221_v13, %v959_v57  ;;  %v307_v17 = vmul.f32 %v243_v51, %v243_v51  ;;  %v394_v43 = vsel %vm74_vm0, %v305_v53, 0.0  ;;  %v452_v36 = vadd.f32 %v451_v60, %v450_v37 }
  0x84   :  { %v273_v26 = vsub.f32 %v1222_v28, %v966_v54  ;;  %v335_v12 = vmul.f32 %v271_v58, %v271_v58  ;;  %v393_v39 = vadd.f32 %v392_v18, %v391_v10  ;;  %v455_v59 = vsel %vm74_vm0, %v333_v3, 0.0 }
  0x85   :  { %v246_v20 = vsub.f32 %v1223_v48, %v959_v57  ;;  %v308_v29 = vmul.f32 %v244_v8, %v244_v8  ;;  %v396_v30 = vsel %vm74_vm0, %v306_v15, 0.0  ;;  %v454_v22 = vadd.f32 %v453_v40, %v452_v36 }
  0x86   :  { %v274_v62 = vsub.f32 %v1224_v41, %v966_v54  ;;  %v336_v25 = vmul.f32 %v272_v4, %v272_v4  ;;  %v395_v16 = vadd.f32 %v394_v43, %v393_v39  ;;  %v457_v49 = vsel %vm74_vm0, %v334_v11, 0.0 }
  0x87   :  { %v309_v9 = vmul.f32 %v245_v35, %v245_v35  ;;  %v398_v38 = vsel %vm74_vm0, %v307_v17, 0.0  ;;  %v456_v32 = vadd.f32 %v455_v59, %v454_v22  ;;  %v275_v46 = vsub.f32 %v1225_v23, %v966_v54 }
  0x88   :  { %v337_v33 = vmul.f32 %v273_v26, %v273_v26  ;;  %v397_v57 = vadd.f32 %v396_v30, %v395_v16  ;;  %v459_v44 = vsel %vm74_vm0, %v335_v12, 0.0  ;;  %v310_v14 = vmul.f32 %v246_v20, %v246_v20 }
  0x89   :  { %v400_v24 = vsel %vm74_vm0, %v308_v29, 0.0  ;;  %v458_v47 = vadd.f32 %v457_v49, %v456_v32  ;;  %v276_v45 = vsub.f32 %v1226_v55, %v966_v54  ;;  %v338_v19 = vmul.f32 %v274_v62, %v274_v62 }
  0x8a   :  { %v399_v42 = vadd.f32 %v398_v38, %v397_v57  ;;  %v461_v63 = vsel %vm74_vm0, %v336_v25, 0.0  ;;  %v402_v52 = vsel %vm74_vm0, %v309_v9, 0.0  ;;  %v277_v56 = vsub.f32 %v946_v6, %v966_v54 }
  0x8b   :  { %v460_v0 = vadd.f32 %v459_v44, %v458_v47  ;;  %v339_v31 = vmul.f32 %v275_v46, %v275_v46  ;;  %v463_v61 = vsel %vm74_vm0, %v337_v33, 0.0  ;;  %v404_v51 = vsel %vm74_vm0, %v310_v14, 0.0 }
  0x8c   :  { %v401_v1 = vadd.f32 %v400_v24, %v399_v42  ;;  %v278_v27 = vsub.f32 %v953_v50, %v966_v54  ;;  %v340_v2 = vmul.f32 %v276_v45, %v276_v45  ;;  %v465_v58 = vsel %vm74_vm0, %v338_v19, 0.0 }
  0x8d   :  { %v462_v53 = vadd.f32 %v461_v63, %v460_v0  ;;  %v341_v7 = vmul.f32 %v277_v56, %v277_v56  ;;  %v467_v34 = vsel %vm74_vm0, %v339_v31, 0.0 }
  0x8e   :  { %v403_v5 = vadd.f32 %v402_v52, %v401_v1  ;;  %v342_v8 = vmul.f32 %v278_v27, %v278_v27  ;;  %v469_v18 = vsel %vm74_vm0, %v340_v2, 0.0 }
  0x8f   :  { %v464_v3 = vadd.f32 %v463_v61, %v462_v53  ;;  %v471_v4 = vsel %vm74_vm0, %v341_v7, 0.0 }
  0x90   :  { %v405_v60 = vadd.f32 %v404_v51, %v403_v5  ;;  %v473_v54 = vsel %vm74_vm0, %v342_v8, 0.0 }
  0x91   :  { %v466_v6 = vadd.f32 %v465_v58, %v464_v3 }
  0x92   :  { %v406_v15 = vrot.slane %v405_v60, 4 }
  0x93   :  { %v468_v37 = vadd.f32 %v467_v34, %v466_v6 }
  0x94   :  { %v407_v21 = vadd.f32 %v406_v15, %v405_v60 }
  0x95   :  { %v470_v11 = vadd.f32 %v469_v18, %v468_v37 }
  0x96   :  { %v408_v50 = vrot.slane %v407_v21, 2 }
  0x97   :  { %v472_v10 = vadd.f32 %v471_v4, %v470_v11 }
  0x98   :  { %v409_v40 = vadd.f32 %v408_v50, %v407_v21 }
  0x99   :  { %v474_v13 = vadd.f32 %v473_v54, %v472_v10 }
  0x9a   :  { %v410_v35 = vrot.slane %v409_v40, 1 }
  0x9b   :  { %v475_v17 = vrot.slane %v474_v13, 4 }
  0x9c   :  { %v411_v43 = vadd.f32 %v410_v35, %v409_v40 }
  0x9d   :  { %v476_v36 = vadd.f32 %v475_v17, %v474_v13 }
  0x9e   :  { %v481_v28 = vmul.f32 0.003921569, %v411_v43 }
  0x9f   :  { %v477_v26 = vrot.slane %v476_v36, 2 }
  0xa0   :  { %486 = vst.msk [vmem:[%s1175_s2] sm:$0x1] %vm483_vm1, %v481_v28 }
  0xa1   :  { %v478_v12 = vadd.f32 %v477_v26, %v476_v36 }
  0xa3   :  { %v479_v39 = vrot.slane %v478_v12, 1 }
  0xa5   :  { %v480_v59 = vadd.f32 %v479_v39, %v478_v12 }
  0xa7   :  { %v482_v48 = vmul.f32 0.003921569, %v480_v59 }
  0xa9   :  { %487 = vst.msk [vmem:[%s1175_s2 + $0x1] sm:$0x1] %vm483_vm1, %v482_v48 }

// kernel: run_no_noise.4
= control target key start
LH: loop header
LB: loop body
LE: loop exit
PB: predicated region body
PF: predicated region fallthrough
CT: control target
= control target key end

     0   :  { %vm291_vm0 = vcmask 1042432   ;;  %vm98_vm1 = vcmask 23552   ;;  %vm752_vm2 = vcmask 64512   ;;  %vm1403_vm3 = vcmask 130048   ;;  %s3802_s1 = inlined_call_operand.vmem [shape: f32[3,8], index: 1, kind: input, shape index: {}]   ;;  %s3803_s0 = inlined_call_operand.vmem [shape: f32[512,3], index: 0, kind: input, shape index: {}]   ;;  %s3804_s3 = inlined_call_operand.vmem [shape: f32[8,16], index: 3, kind: input, shape index: {}]   ;;  %s3805_s2 = inlined_call_operand.vmem [shape: f32[1,8], index: 2, kind: input, shape index: {}]   ;;  %s3806_s5 = inlined_call_operand.vmem [shape: f32[16,16], index: 5, kind: input, shape index: {}]   ;;  %s3807_s4 = inlined_call_operand.vmem [shape: f32[1,16], index: 4, kind: input, shape index: {}, may-alias: {4,6}]   ;;  %s3808_s6 = inlined_call_operand.vmem [shape: f32[1,16], index: 6, kind: input, shape index: {}, may-alias: {4,6}]   ;;  %s3809_s7 = inlined_call_operand.vmem [shape: f32[512,16], index: 7, kind: output, shape index: {}]  }
   0x1   :  { %v90_v0 = vld [vmem:[%s3802_s1] sm:$0x7]  ;;  %v27_v2 = vld [vmem:[%s3803_s0 + $0x8] sm:$0xff]  ;;  %v28_v3 = vld [vmem:[%s3803_s0 + $0x10] sm:$0xff] }
   0x2   :  { %v26_v1 = vld [vmem:[%s3803_s0] sm:$0xff]  ;;  %2505 = vmatprep.subr.msk.mxu0 %vm291_vm0, %v90_v0  ;;  %2805 = vmatprep.subr.msk.mxu1 %vm291_vm0, %v90_v0  ;;  %v29_v4 = vld [vmem:[%s3803_s0 + $0x18] sm:$0xff]  ;;  %v31_v6 = vld [vmem:[%s3803_s0 + $0x28] sm:$0xff] }
   0x3   :  { %2507 = vmatprep.mubr.msk.f32.mxu0 %vm98_vm1, %v26_v1  ;;  %2506 = vmatpush3.msk.msra.mxu0 %vm291_vm0, %v90_v0  ;;  %v30_v5 = vld [vmem:[%s3803_s0 + $0x20] sm:$0xff]  ;;  %v32_v7 = vld [vmem:[%s3803_s0 + $0x30] sm:$0xff]  ;;  %v59_v9 = vld [vmem:[%s3803_s0 + $0x108] sm:$0xff] }
   0x4   :  { %2508 = vmatmul.mubr.msk.f32.vlgmr.msra.gmra.mrb[0].mxu0 %vm98_vm1, %v27_v2  ;;  %2806 = vmatpush3.msk.msra.mxu1 %vm291_vm0, %v90_v0  ;;  %v58_v8 = vld [vmem:[%s3803_s0 + $0x100] sm:$0xff]  ;;  %v60_v10 = vld [vmem:[%s3803_s0 + $0x110] sm:$0xff]  ;;  %v33_v11 = vld [vmem:[%s3803_s0 + $0x38] sm:$0xff] }
   0x5   :  { %2510 = vmatprep.mubr.msk.f32.mxu0 %vm98_vm1, %v28_v3  ;;  %2555 = vmatprep.mubr.msk.f32.mxu1 %vm98_vm1, %v58_v8  ;;  %v34_v12 = vld [vmem:[%s3803_s0 + $0x40] sm:$0xff]  ;;  %v61_v13 = vld [vmem:[%s3803_s0 + $0x118] sm:$0xff]  ;;  %v35_v15 = vld [vmem:[%s3803_s0 + $0x48] sm:$0xff] }
   0x6   :  { %2556 = vmatmul.mubr.msk.f32.vlgmr.msra.gmra.mrb[0].mxu1 %vm98_vm1, %v59_v9  ;;  %v62_v14 = vld [vmem:[%s3803_s0 + $0x120] sm:$0xff]  ;;  %v36_v16 = vld [vmem:[%s3803_s0 + $0x50] sm:$0xff]  ;;  %v63_v17 = vld [vmem:[%s3803_s0 + $0x128] sm:$0xff] }
   0x7   :  { %2558 = vmatprep.mubr.msk.f32.mxu1 %vm98_vm1, %v60_v10  ;;  %v64_v18 = vld [vmem:[%s3803_s0 + $0x130] sm:$0xff]  ;;  %v37_v19 = vld [vmem:[%s3803_s0 + $0x58] sm:$0xff]  ;;  %v38_v20 = vld [vmem:[%s3803_s0 + $0x60] sm:$0xff] }
   0x8   :  { %2511 = vmatmul.mubr.msk.f32.gmra.mrb[2].mxu0 %vm98_vm1, %v29_v4  ;;  %v744_v21 = vld [vmem:[%s3804_s3] sm:$0xff]  ;;  %v65_v22 = vld [vmem:[%s3803_s0 + $0x138] sm:$0xff]  ;;  %v39_v24 = vld [vmem:[%s3803_s0 + $0x68] sm:$0xff] }
   0x9   :  { %2513 = vmatprep.mubr.msk.f32.mxu0 %vm98_vm1, %v30_v5  ;;  %2603 = vmatprep.subr.mxu1 %v744_v21  ;;  %v66_v23 = vld [vmem:[%s3803_s0 + $0x140] sm:$0xff]  ;;  %v40_v25 = vld [vmem:[%s3803_s0 + $0x70] sm:$0xff]  ;;  %v67_v26 = vld [vmem:[%s3803_s0 + $0x148] sm:$0xff] }
   0xa   :  { %2559 = vmatmul.mubr.msk.f32.gmra.mrb[2].mxu1 %vm98_vm1, %v61_v13  ;;  %v68_v27 = vld [vmem:[%s3803_s0 + $0x150] sm:$0xff]  ;;  %v41_v28 = vld [vmem:[%s3803_s0 + $0x78] sm:$0xff]  ;;  %v42_v29 = vld [vmem:[%s3803_s0 + $0x80] sm:$0xff] }
   0xb   :  { %2561 = vmatprep.mubr.msk.f32.mxu1 %vm98_vm1, %v62_v14  ;;  %2604 = vmatpush3.msra.mxu1 %v744_v21  ;;  %v69_v30 = vld [vmem:[%s3803_s0 + $0x158] sm:$0xff]  ;;  %v70_v31 = vld [vmem:[%s3803_s0 + $0x160] sm:$0xff]  ;;  %v43_v32 = vld [vmem:[%s3803_s0 + $0x88] sm:$0xff] }
   0xc   :  { %2514 = vmatmul.mubr.msk.f32.gmra.mrb[4].mxu0 %vm98_vm1, %v31_v6  ;;  %v44_v33 = vld [vmem:[%s3803_s0 + $0x90] sm:$0xff]  ;;  %v71_v34 = vld [vmem:[%s3803_s0 + $0x168] sm:$0xff]  ;;  %v45_v36 = vld [vmem:[%s3803_s0 + $0x98] sm:$0xff] }
   0xd   :  { %2516 = vmatprep.mubr.msk.f32.mxu0 %vm98_vm1, %v32_v7  ;;  %v72_v35 = vld [vmem:[%s3803_s0 + $0x170] sm:$0xff]  ;;  %v46_v37 = vld [vmem:[%s3803_s0 + $0xa0] sm:$0xff]  ;;  %v73_v38 = vld [vmem:[%s3803_s0 + $0x178] sm:$0xff] }
   0xe   :  { %2562 = vmatmul.mubr.msk.f32.gmra.mrb[4].mxu1 %vm98_vm1, %v63_v17  ;;  %v74_v39 = vld [vmem:[%s3803_s0 + $0x180] sm:$0xff]  ;;  %v47_v40 = vld [vmem:[%s3803_s0 + $0xa8] sm:$0xff]  ;;  %v48_v41 = vld [vmem:[%s3803_s0 + $0xb0] sm:$0xff] }
   0xf   :  { %2564 = vmatprep.mubr.msk.f32.mxu1 %vm98_vm1, %v64_v18  ;;  %v75_v42 = vld [vmem:[%s3803_s0 + $0x188] sm:$0xff]  ;;  %v76_v43 = vld [vmem:[%s3803_s0 + $0x190] sm:$0xff]  ;;  %v49_v44 = vld [vmem:[%s3803_s0 + $0xb8] sm:$0xff] }
  0x10   :  { %2517 = vmatmul.mubr.msk.f32.gmra.mrb[6].mxu0 %vm98_vm1, %v33_v11  ;;  %v50_v45 = vld [vmem:[%s3803_s0 + $0xc0] sm:$0xff]  ;;  %v77_v46 = vld [vmem:[%s3803_s0 + $0x198] sm:$0xff]  ;;  %v51_v48 = vld [vmem:[%s3803_s0 + $0xc8] sm:$0xff] }
  0x11   :  { %2519 = vmatprep.mubr.msk.f32.mxu0 %vm98_vm1, %v34_v12  ;;  %v78_v47 = vld [vmem:[%s3803_s0 + $0x1a0] sm:$0xff]  ;;  %v52_v49 = vld [vmem:[%s3803_s0 + $0xd0] sm:$0xff]  ;;  %v79_v50 = vld [vmem:[%s3803_s0 + $0x1a8] sm:$0xff] }
  0x12   :  { %2565 = vmatmul.mubr.msk.f32.gmra.mrb[6].mxu1 %vm98_vm1, %v65_v22  ;;  %v80_v51 = vld [vmem:[%s3803_s0 + $0x1b0] sm:$0xff]  ;;  %v53_v52 = vld [vmem:[%s3803_s0 + $0xd8] sm:$0xff]  ;;  %v54_v53 = vld [vmem:[%s3803_s0 + $0xe0] sm:$0xff] }
  0x13   :  { %2567 = vmatprep.mubr.msk.f32.mxu1 %vm98_vm1, %v66_v23  ;;  %v81_v54 = vld [vmem:[%s3803_s0 + $0x1b8] sm:$0xff]  ;;  %v82_v55 = vld [vmem:[%s3803_s0 + $0x1c0] sm:$0xff]  ;;  %v55_v56 = vld [vmem:[%s3803_s0 + $0xe8] sm:$0xff] }
  0x14   :  { %2520 = vmatmul.mubr.msk.f32.gmra.mrb[8].mxu0 %vm98_vm1, %v35_v15  ;;  %v56_v57 = vld [vmem:[%s3803_s0 + $0xf0] sm:$0xff]  ;;  %v83_v58 = vld [vmem:[%s3803_s0 + $0x1c8] sm:$0xff]  ;;  %v57_v60 = vld [vmem:[%s3803_s0 + $0xf8] sm:$0xff] }
  0x15   :  { %2522 = vmatprep.mubr.msk.f32.mxu0 %vm98_vm1, %v36_v16  ;;  %v84_v59 = vld [vmem:[%s3803_s0 + $0x1d0] sm:$0xff]  ;;  %v85_v61 = vld [vmem:[%s3803_s0 + $0x1d8] sm:$0xff]  ;;  %v86_v62 = vld [vmem:[%s3803_s0 + $0x1e0] sm:$0xff] }
  0x16   :  { %2568 = vmatmul.mubr.msk.f32.gmra.mrb[8].mxu1 %vm98_vm1, %v67_v26  ;;  %v87_v63 = vld [vmem:[%s3803_s0 + $0x1e8] sm:$0xff]  ;;  %v88_v0 = vld [vmem:[%s3803_s0 + $0x1f0] sm:$0xff]  ;;  %v89_v1 = vld [vmem:[%s3803_s0 + $0x1f8] sm:$0xff] }
  0x17   :  { %2570 = vmatprep.mubr.msk.f32.mxu1 %vm98_vm1, %v68_v27  ;;  %v3112_v2 = vld [vmem:[%s3805_s2] ss:$0 sm:$0xff]  ;;  %v1395_v10 = vld [vmem:[%s3806_s5 + $0x8] sm:$0xff] }
  0x18   :  { %2523 = vmatmul.mubr.msk.f32.gmra.mrb[10].mxu0 %vm98_vm1, %v37_v19  ;;  %v1394_v9 = vld [vmem:[%s3806_s5] sm:$0xff] }
  0x19   :  { %2525 = vmatprep.mubr.msk.f32.mxu0 %vm98_vm1, %v38_v20  ;;  %v2801_v14 = vpack.c.bf16 %v1395_v10, %v1394_v9 }
  0x1a   :  { %2571 = vmatmul.mubr.msk.f32.gmra.mrb[10].mxu1 %vm98_vm1, %v69_v30 }
  0x1b   :  { %2573 = vmatprep.mubr.msk.f32.mxu1 %vm98_vm1, %v70_v31  ;;  %2802 = vmatprep.subr.bf16.mxu0 %v2801_v14 }
  0x1c   :  { %2526 = vmatmul.mubr.msk.f32.gmra.mrb[12].mxu0 %vm98_vm1, %v39_v24 }
  0x1d   :  { %2528 = vmatprep.mubr.msk.f32.mxu0 %vm98_vm1, %v40_v25  ;;  %2804 = vmatpush3.bf16.msra.mxu0 %v2801_v14 }
  0x1e   :  { %2574 = vmatmul.mubr.msk.f32.gmra.mrb[12].mxu1 %vm98_vm1, %v71_v34 }
  0x1f   :  { %2576 = vmatprep.mubr.msk.f32.mxu1 %vm98_vm1, %v72_v35 }
  0x20   :  { %2529 = vmatmul.mubr.msk.f32.gmra.mrb[14].mxu0 %vm98_vm1, %v41_v28 }
  0x21   :  { %2531 = vmatprep.mubr.msk.f32.mxu0 %vm98_vm1, %v42_v29 }
  0x22   :  { %2577 = vmatmul.mubr.msk.f32.gmra.mrb[14].mxu1 %vm98_vm1, %v73_v38 }
  0x23   :  { %2579 = vmatprep.mubr.msk.f32.mxu1 %vm98_vm1, %v74_v39 }
  0x24   :  { %2532 = vmatmul.mubr.msk.f32.gmra.mrb[16].mxu0 %vm98_vm1, %v43_v32 }
  0x25   :  { %2534 = vmatprep.mubr.msk.f32.mxu0 %vm98_vm1, %v44_v33 }
  0x26   :  { %2580 = vmatmul.mubr.msk.f32.gmra.mrb[16].mxu1 %vm98_vm1, %v75_v42 }
  0x27   :  { %2582 = vmatprep.mubr.msk.f32.mxu1 %vm98_vm1, %v76_v43 }
  0x28   :  { %2535 = vmatmul.mubr.msk.f32.gmra.mrb[18].mxu0 %vm98_vm1, %v45_v36 }
  0x29   :  { %2537 = vmatprep.mubr.msk.f32.mxu0 %vm98_vm1, %v46_v37 }
  0x2a   :  { %2583 = vmatmul.mubr.msk.f32.gmra.mrb[18].mxu1 %vm98_vm1, %v77_v46 }
  0x2b   :  { %2585 = vmatprep.mubr.msk.f32.mxu1 %vm98_vm1, %v78_v47 }
  0x2c   :  { %2538 = vmatmul.mubr.msk.f32.gmra.mrb[20].mxu0 %vm98_vm1, %v47_v40 }
  0x2d   :  { %2540 = vmatprep.mubr.msk.f32.mxu0 %vm98_vm1, %v48_v41 }
  0x2e   :  { %2586 = vmatmul.mubr.msk.f32.gmra.mrb[20].mxu1 %vm98_vm1, %v79_v50 }
  0x2f   :  { %2588 = vmatprep.mubr.msk.f32.mxu1 %vm98_vm1, %v80_v51 }
  0x30   :  { %2541 = vmatmul.mubr.msk.f32.gmra.mrb[22].mxu0 %vm98_vm1, %v49_v44 }
  0x31   :  { %2543 = vmatprep.mubr.msk.f32.mxu0 %vm98_vm1, %v50_v45 }
  0x32   :  { %2589 = vmatmul.mubr.msk.f32.gmra.mrb[22].mxu1 %vm98_vm1, %v81_v54 }
  0x33   :  { %2591 = vmatprep.mubr.msk.f32.mxu1 %vm98_vm1, %v82_v55 }
  0x34   :  { %2544 = vmatmul.mubr.msk.f32.gmra.mrb[24].mxu0 %vm98_vm1, %v51_v48 }
  0x35   :  { %2546 = vmatprep.mubr.msk.f32.mxu0 %vm98_vm1, %v52_v49 }
  0x36   :  { %2592 = vmatmul.mubr.msk.f32.gmra.mrb[24].mxu1 %vm98_vm1, %v83_v58 }
  0x37   :  { %2594 = vmatprep.mubr.msk.f32.mxu1 %vm98_vm1, %v84_v59 }
  0x38   :  { %2547 = vmatmul.mubr.msk.f32.gmra.mrb[26].mxu0 %vm98_vm1, %v53_v52 }
  0x39   :  { %2549 = vmatprep.mubr.msk.f32.mxu0 %vm98_vm1, %v54_v53 }
  0x3a   :  { %2595 = vmatmul.mubr.msk.f32.gmra.mrb[26].mxu1 %vm98_vm1, %v85_v61 }
  0x3b   :  { %2597 = vmatprep.mubr.msk.f32.mxu1 %vm98_vm1, %v86_v62 }
  0x3c   :  { %2550 = vmatmul.mubr.msk.f32.gmra.mrb[28].mxu0 %vm98_vm1, %v55_v56 }
  0x3d   :  { %2552 = vmatprep.mubr.msk.f32.mxu0 %vm98_vm1, %v56_v57 }
  0x3e   :  { %2598 = vmatmul.mubr.msk.f32.gmra.mrb[28].mxu1 %vm98_vm1, %v87_v63 }
  0x3f   :  { %2600 = vmatprep.mubr.msk.f32.mxu1 %vm98_vm1, %v88_v0 }
  0x40   :  { %2553 = vmatmul.mubr.msk.f32.gmra.mrb[30].mxu0 %vm98_vm1, %v57_v60 }
  0x42   :  { %2601 = vmatmul.mubr.msk.f32.gmra.mrb[30].mxu1 %vm98_vm1, %v89_v1 }
  0xd7   :  { %v2509_v3 = vpop.f32.mrb[0].mxu0 }
  0xd8   :  { %v367_v4 = vadd.f32 %v2509_v3, %v3112_v2  ;;  %v361_v5 = vpop.f32.mrb[1].mxu0 }
  0xd9   :  { %v362_v6 = vadd.f32 %v3112_v2, %v361_v5  ;;  %v3129_v22 = vpop.f32.mrb[0].mxu1 }
  0xda   :  { %v681_v11 = vmax.f32 %v367_v4, 0.0  ;;  %v3132_v23 = vpop.f32.mrb[1].mxu1 }
  0xdb   :  { %v680_v7 = vmax.f32 %v362_v6, 0.0  ;;  %v2512_v8 = vpop.f32.mrb[2].mxu0 }
  0xdc   :  { %v377_v12 = vadd.f32 %v2512_v8, %v3112_v2  ;;  %v371_v13 = vpop.f32.mrb[3].mxu0 }
  0xdd   :  { %v372_v15 = vadd.f32 %v3112_v2, %v371_v13  ;;  %2605 = vmatprep.mubr.msk.f32.mxu1 %vm752_vm2, %v680_v7  ;;  %v3137_v30 = vpop.f32.mrb[2].mxu1 }
  0xde   :  { %2606 = vmatmul.mubr.msk.f32.vlgmr.msra.gmra.mrb[32].mxu1 %vm752_vm2, %v681_v11  ;;  %v683_v18 = vmax.f32 %v377_v12, 0.0  ;;  %v3140_v31 = vpop.f32.mrb[3].mxu1 }
  0xdf   :  { %v682_v16 = vmax.f32 %v372_v15, 0.0  ;;  %v2515_v17 = vpop.f32.mrb[4].mxu0 }
  0xe0   :  { %v387_v19 = vadd.f32 %v2515_v17, %v3112_v2  ;;  %v381_v20 = vpop.f32.mrb[5].mxu0 }
  0xe1   :  { %v382_v21 = vadd.f32 %v3112_v2, %v381_v20  ;;  %2608 = vmatprep.mubr.msk.f32.mxu1 %vm752_vm2, %v682_v16  ;;  %v3145_v38 = vpop.f32.mrb[4].mxu1 }
  0xe2   :  { %2609 = vmatmul.mubr.msk.f32.gmra.mrb[34].mxu1 %vm752_vm2, %v683_v18  ;;  %v685_v26 = vmax.f32 %v387_v19, 0.0  ;;  %v3148_v39 = vpop.f32.mrb[5].mxu1 }
  0xe3   :  { %v684_v24 = vmax.f32 %v382_v21, 0.0  ;;  %v2518_v25 = vpop.f32.mrb[6].mxu0 }
  0xe4   :  { %v397_v27 = vadd.f32 %v2518_v25, %v3112_v2  ;;  %v391_v28 = vpop.f32.mrb[7].mxu0 }
  0xe5   :  { %v392_v29 = vadd.f32 %v3112_v2, %v391_v28  ;;  %2611 = vmatprep.mubr.msk.f32.mxu1 %vm752_vm2, %v684_v24  ;;  %v3153_v46 = vpop.f32.mrb[6].mxu1 }
  0xe6   :  { %2612 = vmatmul.mubr.msk.f32.gmra.mrb[36].mxu1 %vm752_vm2, %v685_v26  ;;  %v687_v34 = vmax.f32 %v397_v27, 0.0  ;;  %v3156_v47 = vpop.f32.mrb[7].mxu1 }
  0xe7   :  { %v686_v32 = vmax.f32 %v392_v29, 0.0  ;;  %v2521_v33 = vpop.f32.mrb[8].mxu0 }
  0xe8   :  { %v407_v35 = vadd.f32 %v2521_v33, %v3112_v2  ;;  %v401_v36 = vpop.f32.mrb[9].mxu0 }
  0xe9   :  { %v402_v37 = vadd.f32 %v3112_v2, %v401_v36  ;;  %2614 = vmatprep.mubr.msk.f32.mxu1 %vm752_vm2, %v686_v32  ;;  %v3161_v54 = vpop.f32.mrb[8].mxu1 }
  0xea   :  { %2615 = vmatmul.mubr.msk.f32.gmra.mrb[38].mxu1 %vm752_vm2, %v687_v34  ;;  %v689_v42 = vmax.f32 %v407_v35, 0.0  ;;  %v3164_v55 = vpop.f32.mrb[9].mxu1 }
  0xeb   :  { %v688_v40 = vmax.f32 %v402_v37, 0.0  ;;  %v2524_v41 = vpop.f32.mrb[10].mxu0 }
  0xec   :  { %v417_v43 = vadd.f32 %v2524_v41, %v3112_v2  ;;  %v411_v44 = vpop.f32.mrb[11].mxu0 }
  0xed   :  { %v412_v45 = vadd.f32 %v3112_v2, %v411_v44  ;;  %2617 = vmatprep.mubr.msk.f32.mxu1 %vm752_vm2, %v688_v40  ;;  %v3169_v62 = vpop.f32.mrb[10].mxu1 }
  0xee   :  { %2618 = vmatmul.mubr.msk.f32.gmra.mrb[40].mxu1 %vm752_vm2, %v689_v42  ;;  %v691_v50 = vmax.f32 %v417_v43, 0.0  ;;  %v3172_v63 = vpop.f32.mrb[11].mxu1 }
  0xef   :  { %v690_v48 = vmax.f32 %v412_v45, 0.0  ;;  %v2527_v49 = vpop.f32.mrb[12].mxu0 }
  0xf0   :  { %v427_v51 = vadd.f32 %v2527_v49, %v3112_v2  ;;  %v421_v52 = vpop.f32.mrb[13].mxu0 }
  0xf1   :  { %v422_v53 = vadd.f32 %v3112_v2, %v421_v52  ;;  %2620 = vmatprep.mubr.msk.f32.mxu1 %vm752_vm2, %v690_v48  ;;  %v3177_v7 = vpop.f32.mrb[12].mxu1 }
  0xf2   :  { %2621 = vmatmul.mubr.msk.f32.gmra.mrb[42].mxu1 %vm752_vm2, %v691_v50  ;;  %v693_v58 = vmax.f32 %v427_v51, 0.0  ;;  %v3180_v8 = vpop.f32.mrb[13].mxu1 }
  0xf3   :  { %v692_v56 = vmax.f32 %v422_v53, 0.0  ;;  %v2530_v57 = vpop.f32.mrb[14].mxu0 }
  0xf4   :  { %v437_v59 = vadd.f32 %v2530_v57, %v3112_v2  ;;  %v431_v60 = vpop.f32.mrb[15].mxu0 }
  0xf5   :  { %v432_v61 = vadd.f32 %v3112_v2, %v431_v60  ;;  %2623 = vmatprep.mubr.msk.f32.mxu1 %vm752_vm2, %v692_v56  ;;  %v3185_v15 = vpop.f32.mrb[14].mxu1 }
  0xf6   :  { %2624 = vmatmul.mubr.msk.f32.gmra.mrb[44].mxu1 %vm752_vm2, %v693_v58  ;;  %v695_v3 = vmax.f32 %v437_v59, 0.0  ;;  %v3188_v16 = vpop.f32.mrb[15].mxu1 }
  0xf7   :  { %v694_v0 = vmax.f32 %v432_v61, 0.0  ;;  %v2533_v1 = vpop.f32.mrb[16].mxu0 }
  0xf8   :  { %v447_v4 = vadd.f32 %v2533_v1, %v3112_v2  ;;  %v441_v5 = vpop.f32.mrb[17].mxu0 }
  0xf9   :  { %v442_v6 = vadd.f32 %v3112_v2, %v441_v5  ;;  %2626 = vmatprep.mubr.msk.f32.mxu1 %vm752_vm2, %v694_v0  ;;  %v3193_v25 = vpop.f32.mrb[16].mxu1 }
  0xfa   :  { %2627 = vmatmul.mubr.msk.f32.gmra.mrb[46].mxu1 %vm752_vm2, %v695_v3  ;;  %v697_v11 = vmax.f32 %v447_v4, 0.0  ;;  %v3196_v26 = vpop.f32.mrb[17].mxu1 }
  0xfb   :  { %v696_v9 = vmax.f32 %v442_v6, 0.0  ;;  %v2536_v10 = vpop.f32.mrb[18].mxu0 }
  0xfc   :  { %v457_v12 = vadd.f32 %v2536_v10, %v3112_v2  ;;  %v451_v13 = vpop.f32.mrb[19].mxu0  ;;  %v522_v10 = vadd.f32 %v3112_v2, %v3132_v23 }
  0xfd   :  { %v452_v14 = vadd.f32 %v3112_v2, %v451_v13  ;;  %2629 = vmatprep.mubr.msk.f32.mxu1 %vm752_vm2, %v696_v9  ;;  %v3201_v35 = vpop.f32.mrb[18].mxu1 }
  0xfe   :  { %2630 = vmatmul.mubr.msk.f32.gmra.mrb[48].mxu1 %vm752_vm2, %v697_v11  ;;  %v699_v19 = vmax.f32 %v457_v12, 0.0  ;;  %v3204_v36 = vpop.f32.mrb[19].mxu1 }
  0xff   :  { %v698_v17 = vmax.f32 %v452_v14, 0.0  ;;  %v2539_v18 = vpop.f32.mrb[20].mxu0 }
 0x100   :  { %v467_v20 = vadd.f32 %v2539_v18, %v3112_v2  ;;  %v461_v21 = vpop.f32.mrb[21].mxu0 }
 0x101   :  { %v462_v24 = vadd.f32 %v3112_v2, %v461_v21  ;;  %2632 = vmatprep.mubr.msk.f32.mxu1 %vm752_vm2, %v698_v17  ;;  %v3209_v45 = vpop.f32.mrb[20].mxu1  ;;  %v532_v21 = vadd.f32 %v3112_v2, %v3140_v31  ;;  %v537_v31 = vadd.f32 %v3137_v30, %v3112_v2  ;;  %v562_v30 = vadd.f32 %v3112_v2, %v3164_v55 }
 0x102   :  { %2633 = vmatmul.mubr.msk.f32.gmra.mrb[50].mxu1 %vm752_vm2, %v699_v19  ;;  %v701_v29 = vmax.f32 %v467_v20, 0.0  ;;  %v3212_v48 = vpop.f32.mrb[21].mxu1  ;;  %v712_v20 = vmax.f32 %v522_v10, 0.0 }
 0x103   :  { %v700_v27 = vmax.f32 %v462_v24, 0.0  ;;  %v2542_v28 = vpop.f32.mrb[22].mxu0  ;;  %v527_v24 = vadd.f32 %v3129_v22, %v3112_v2 }
 0x104   :  { %v477_v32 = vadd.f32 %v2542_v28, %v3112_v2  ;;  %v471_v33 = vpop.f32.mrb[23].mxu0 }
 0x105   :  { %v472_v34 = vadd.f32 %v3112_v2, %v471_v33  ;;  %2635 = vmatprep.mubr.msk.f32.mxu1 %vm752_vm2, %v700_v27  ;;  %v3217_v57 = vpop.f32.mrb[22].mxu1  ;;  %v713_v33 = vmax.f32 %v527_v24, 0.0 }
 0x106   :  { %2636 = vmatmul.mubr.msk.f32.gmra.mrb[52].mxu1 %vm752_vm2, %v701_v29  ;;  %v703_v41 = vmax.f32 %v477_v32, 0.0  ;;  %v3220_v58 = vpop.f32.mrb[23].mxu1  ;;  %v714_v29 = vmax.f32 %v532_v21, 0.0  ;;  %v542_v32 = vadd.f32 %v3112_v2, %v3148_v39  ;;  %v547_v39 = vadd.f32 %v3145_v38, %v3112_v2 }
 0x107   :  { %v702_v37 = vmax.f32 %v472_v34, 0.0  ;;  %v2545_v40 = vpop.f32.mrb[24].mxu0  ;;  %v572_v38 = vadd.f32 %v3112_v2, %v3172_v63 }
 0x108   :  { %v487_v42 = vadd.f32 %v2545_v40, %v3112_v2  ;;  %v481_v43 = vpop.f32.mrb[25].mxu0  ;;  %v552_v40 = vadd.f32 %v3112_v2, %v3156_v47 }
 0x109   :  { %v482_v44 = vadd.f32 %v3112_v2, %v481_v43  ;;  %2638 = vmatprep.mubr.msk.f32.mxu1 %vm752_vm2, %v702_v37  ;;  %v3225_v4 = vpop.f32.mrb[24].mxu1  ;;  %v716_v37 = vmax.f32 %v542_v32, 0.0  ;;  %v717_v43 = vmax.f32 %v547_v39, 0.0 }
 0x10a   :  { %2639 = vmatmul.mubr.msk.f32.gmra.mrb[54].mxu1 %vm752_vm2, %v703_v41  ;;  %v705_v51 = vmax.f32 %v487_v42, 0.0  ;;  %v3228_v5 = vpop.f32.mrb[25].mxu1  ;;  %v715_v41 = vmax.f32 %v537_v31, 0.0  ;;  %v718_v42 = vmax.f32 %v552_v40, 0.0 }
 0x10b   :  { %v704_v49 = vmax.f32 %v482_v44, 0.0  ;;  %v2548_v50 = vpop.f32.mrb[26].mxu0  ;;  %v557_v44 = vadd.f32 %v3153_v46, %v3112_v2  ;;  %v582_v46 = vadd.f32 %v3112_v2, %v3180_v8 }
 0x10c   :  { %v497_v52 = vadd.f32 %v2548_v50, %v3112_v2  ;;  %v491_v53 = vpop.f32.mrb[27].mxu0  ;;  %v567_v50 = vadd.f32 %v3161_v54, %v3112_v2  ;;  %v592_v54 = vadd.f32 %v3112_v2, %v3188_v16 }
 0x10d   :  { %v492_v56 = vadd.f32 %v3112_v2, %v491_v53  ;;  %2641 = vmatprep.mubr.msk.f32.mxu1 %vm752_vm2, %v704_v49  ;;  %v3235_v17 = vpop.f32.mrb[26].mxu1  ;;  %v720_v49 = vmax.f32 %v562_v30, 0.0  ;;  %v719_v47 = vmax.f32 %v557_v44, 0.0  ;;  %v724_v53 = vmax.f32 %v582_v46, 0.0 }
 0x10e   :  { %2642 = vmatmul.mubr.msk.f32.gmra.mrb[56].mxu1 %vm752_vm2, %v705_v51  ;;  %v707_v61 = vmax.f32 %v497_v52, 0.0  ;;  %v3238_v18 = vpop.f32.mrb[27].mxu1  ;;  %v722_v51 = vmax.f32 %v572_v38, 0.0  ;;  %v721_v55 = vmax.f32 %v567_v50, 0.0  ;;  %v577_v52 = vadd.f32 %v3169_v62, %v3112_v2 }
 0x10f   :  { %v706_v59 = vmax.f32 %v492_v56, 0.0  ;;  %v2551_v60 = vpop.f32.mrb[28].mxu0  ;;  %v587_v56 = vadd.f32 %v3177_v7, %v3112_v2  ;;  %v602_v62 = vadd.f32 %v3112_v2, %v3196_v26  ;;  %v612_v7 = vadd.f32 %v3112_v2, %v3204_v36 }
 0x110   :  { %v507_v0 = vadd.f32 %v2551_v60, %v3112_v2  ;;  %v501_v1 = vpop.f32.mrb[29].mxu0  ;;  %v723_v63 = vmax.f32 %v577_v52, 0.0  ;;  %v597_v60 = vadd.f32 %v3185_v15, %v3112_v2  ;;  %v622_v15 = vadd.f32 %v3112_v2, %v3212_v48 }
 0x111   :  { %v502_v3 = vadd.f32 %v3112_v2, %v501_v1  ;;  %2644 = vmatprep.mubr.msk.f32.mxu1 %vm752_vm2, %v706_v59  ;;  %v3245_v27 = vpop.f32.mrb[28].mxu1  ;;  %v726_v59 = vmax.f32 %v592_v54, 0.0  ;;  %v725_v8 = vmax.f32 %v587_v56, 0.0  ;;  %v730_v1 = vmax.f32 %v612_v7, 0.0 }
 0x112   :  { %2645 = vmatmul.mubr.msk.f32.gmra.mrb[58].mxu1 %vm752_vm2, %v707_v61  ;;  %v709_v11 = vmax.f32 %v507_v0, 0.0  ;;  %v3248_v28 = vpop.f32.mrb[29].mxu1  ;;  %v728_v61 = vmax.f32 %v602_v62, 0.0  ;;  %v727_v16 = vmax.f32 %v597_v60, 0.0  ;;  %v607_v0 = vadd.f32 %v3193_v25, %v3112_v2 }
 0x113   :  { %v708_v6 = vmax.f32 %v502_v3, 0.0  ;;  %v2554_v9 = vpop.f32.mrb[30].mxu0  ;;  %v617_v3 = vadd.f32 %v3201_v35, %v3112_v2  ;;  %v632_v25 = vadd.f32 %v3112_v2, %v3220_v58  ;;  %v642_v35 = vadd.f32 %v3112_v2, %v3228_v5 }
 0x114   :  { %v517_v12 = vadd.f32 %v2554_v9, %v3112_v2  ;;  %v511_v13 = vpop.f32.mrb[31].mxu0  ;;  %v729_v26 = vmax.f32 %v607_v0, 0.0  ;;  %v627_v9 = vadd.f32 %v3209_v45, %v3112_v2  ;;  %v652_v45 = vadd.f32 %v3112_v2, %v3238_v18 }
 0x115   :  { %v512_v14 = vadd.f32 %v3112_v2, %v511_v13  ;;  %2647 = vmatprep.mubr.msk.f32.mxu1 %vm752_vm2, %v708_v6  ;;  %v3255_v34 = vpop.f32.mrb[30].mxu1  ;;  %v732_v6 = vmax.f32 %v622_v15, 0.0  ;;  %v731_v36 = vmax.f32 %v617_v3, 0.0  ;;  %v734_v10 = vmax.f32 %v632_v25, 0.0 }
 0x116   :  { %2648 = vmatmul.mubr.msk.f32.gmra.mrb[60].mxu1 %vm752_vm2, %v709_v11  ;;  %v711_v23 = vmax.f32 %v517_v12, 0.0  ;;  %v3258_v22 = vpop.f32.mrb[31].mxu1  ;;  %v733_v48 = vmax.f32 %v627_v9, 0.0  ;;  %v637_v11 = vadd.f32 %v3217_v57, %v3112_v2  ;;  %v736_v12 = vmax.f32 %v642_v35, 0.0 }
 0x117   :  { %v710_v19 = vmax.f32 %v512_v14, 0.0  ;;  %v647_v13 = vadd.f32 %v3225_v4, %v3112_v2  ;;  %v738_v14 = vmax.f32 %v652_v45, 0.0  ;;  %v662_v57 = vadd.f32 %v3112_v2, %v3248_v28 }
 0x118   :  { %v735_v58 = vmax.f32 %v637_v11, 0.0  ;;  %v672_v4 = vadd.f32 %v3112_v2, %v3258_v22  ;;  %v667_v21 = vadd.f32 %v3245_v27, %v3112_v2  ;;  %v3347_v27 = vld [vmem:[%s3807_s4] ss:$0 sm:$0xff] }
 0x119   :  { %2650 = vmatprep.mubr.msk.f32.mxu1 %vm752_vm2, %v710_v19  ;;  %v737_v5 = vmax.f32 %v647_v13, 0.0  ;;  %v657_v19 = vadd.f32 %v3235_v17, %v3112_v2  ;;  %v677_v17 = vadd.f32 %v3255_v34, %v3112_v2 }
 0x11a   :  { %2651 = vmatmul.mubr.msk.f32.gmra.mrb[62].mxu1 %vm752_vm2, %v711_v23  ;;  %v742_v23 = vmax.f32 %v672_v4, 0.0  ;;  %v741_v24 = vmax.f32 %v667_v21, 0.0 }
 0x11b   :  { %2653 = vmatprep.mubr.msk.f32.mxu1 %vm752_vm2, %v712_v20  ;;  %v740_v20 = vmax.f32 %v662_v57, 0.0  ;;  %v739_v18 = vmax.f32 %v657_v19, 0.0  ;;  %v743_v28 = vmax.f32 %v677_v17, 0.0 }
 0x11e   :  { %2654 = vmatmul.mubr.msk.f32.gmra.mrb[64].mxu1 %vm752_vm2, %v713_v33 }
 0x11f   :  { %2656 = vmatprep.mubr.msk.f32.mxu1 %vm752_vm2, %v714_v29 }
 0x122   :  { %2657 = vmatmul.mubr.msk.f32.gmra.mrb[66].mxu1 %vm752_vm2, %v715_v41 }
 0x123   :  { %2659 = vmatprep.mubr.msk.f32.mxu1 %vm752_vm2, %v716_v37 }
 0x126   :  { %2660 = vmatmul.mubr.msk.f32.gmra.mrb[68].mxu1 %vm752_vm2, %v717_v43 }
 0x127   :  { %2662 = vmatprep.mubr.msk.f32.mxu1 %vm752_vm2, %v718_v42 }
 0x12a   :  { %2663 = vmatmul.mubr.msk.f32.gmra.mrb[70].mxu1 %vm752_vm2, %v719_v47 }
 0x12b   :  { %2665 = vmatprep.mubr.msk.f32.mxu1 %vm752_vm2, %v720_v49 }
 0x12e   :  { %2666 = vmatmul.mubr.msk.f32.gmra.mrb[72].mxu1 %vm752_vm2, %v721_v55 }
 0x12f   :  { %2668 = vmatprep.mubr.msk.f32.mxu1 %vm752_vm2, %v722_v51 }
 0x132   :  { %2669 = vmatmul.mubr.msk.f32.gmra.mrb[74].mxu1 %vm752_vm2, %v723_v63 }
 0x133   :  { %2671 = vmatprep.mubr.msk.f32.mxu1 %vm752_vm2, %v724_v53 }
 0x136   :  { %2672 = vmatmul.mubr.msk.f32.gmra.mrb[76].mxu1 %vm752_vm2, %v725_v8 }
 0x137   :  { %2674 = vmatprep.mubr.msk.f32.mxu1 %vm752_vm2, %v726_v59 }
 0x13a   :  { %2675 = vmatmul.mubr.msk.f32.gmra.mrb[78].mxu1 %vm752_vm2, %v727_v16 }
 0x13b   :  { %2677 = vmatprep.mubr.msk.f32.mxu1 %vm752_vm2, %v728_v61 }
 0x13e   :  { %2678 = vmatmul.mubr.msk.f32.gmra.mrb[80].mxu1 %vm752_vm2, %v729_v26 }
 0x13f   :  { %2680 = vmatprep.mubr.msk.f32.mxu1 %vm752_vm2, %v730_v1 }
 0x142   :  { %2681 = vmatmul.mubr.msk.f32.gmra.mrb[82].mxu1 %vm752_vm2, %v731_v36 }
 0x143   :  { %2683 = vmatprep.mubr.msk.f32.mxu1 %vm752_vm2, %v732_v6 }
 0x146   :  { %2684 = vmatmul.mubr.msk.f32.gmra.mrb[84].mxu1 %vm752_vm2, %v733_v48 }
 0x147   :  { %2686 = vmatprep.mubr.msk.f32.mxu1 %vm752_vm2, %v734_v10 }
 0x14a   :  { %2687 = vmatmul.mubr.msk.f32.gmra.mrb[86].mxu1 %vm752_vm2, %v735_v58 }
 0x14b   :  { %2689 = vmatprep.mubr.msk.f32.mxu1 %vm752_vm2, %v736_v12 }
 0x14e   :  { %2690 = vmatmul.mubr.msk.f32.gmra.mrb[88].mxu1 %vm752_vm2, %v737_v5 }
 0x14f   :  { %2692 = vmatprep.mubr.msk.f32.mxu1 %vm752_vm2, %v738_v14 }
 0x152   :  { %2693 = vmatmul.mubr.msk.f32.gmra.mrb[90].mxu1 %vm752_vm2, %v739_v18 }
 0x153   :  { %2695 = vmatprep.mubr.msk.f32.mxu1 %vm752_vm2, %v740_v20 }
 0x156   :  { %2696 = vmatmul.mubr.msk.f32.gmra.mrb[92].mxu1 %vm752_vm2, %v741_v24 }
 0x157   :  { %2698 = vmatprep.mubr.msk.f32.mxu1 %vm752_vm2, %v742_v23 }
 0x15a   :  { %2699 = vmatmul.mubr.msk.f32.gmra.mrb[94].mxu1 %vm752_vm2, %v743_v28 }
 0x1b1   :  { %v2607_v29 = vpop.f32.mrb[32].mxu1 }
 0x1b2   :  { %v1017_v32 = vadd.f32 %v2607_v29, %v3347_v27  ;;  %v1011_v33 = vpop.f32.mrb[33].mxu1 }
 0x1b3   :  { %v1012_v31 = vadd.f32 %v3347_v27, %v1011_v33 }
 0x1b4   :  { %v1331_v22 = vmax.f32 %v1017_v32, 0.0 }
 0x1b5   :  { %v1330_v2 = vmax.f32 %v1012_v31, 0.0  ;;  %v2610_v34 = vpop.f32.mrb[34].mxu1 }
 0x1b6   :  { %v1027_v37 = vadd.f32 %v2610_v34, %v3347_v27  ;;  %v1021_v40 = vpop.f32.mrb[35].mxu1 }
 0x1b7   :  { %v1022_v41 = vadd.f32 %v3347_v27, %v1021_v40  ;;  %2705 = vmatprep.mubr.msk.f32.mxu0 %vm1403_vm3, %v1330_v2 }
 0x1b8   :  { %2706 = vmatmul.mubr.msk.f32.vlgmr.msra.gmra.mrb[32].mxu0 %vm1403_vm3, %v1331_v22  ;;  %v1333_v30 = vmax.f32 %v1027_v37, 0.0 }
 0x1b9   :  { %v1332_v39 = vmax.f32 %v1022_v41, 0.0  ;;  %v2613_v42 = vpop.f32.mrb[36].mxu1 }
 0x1ba   :  { %v1037_v43 = vadd.f32 %v2613_v42, %v3347_v27  ;;  %v1031_v44 = vpop.f32.mrb[37].mxu1 }
 0x1bb   :  { %v1032_v49 = vadd.f32 %v3347_v27, %v1031_v44  ;;  %2708 = vmatprep.mubr.msk.f32.mxu0 %vm1403_vm3, %v1332_v39 }
 0x1bc   :  { %2709 = vmatmul.mubr.msk.f32.gmra.mrb[34].mxu0 %vm1403_vm3, %v1333_v30  ;;  %v1335_v50 = vmax.f32 %v1037_v43, 0.0 }
 0x1bd   :  { %v1334_v38 = vmax.f32 %v1032_v49, 0.0  ;;  %v2616_v47 = vpop.f32.mrb[38].mxu1 }
 0x1be   :  { %v1047_v51 = vadd.f32 %v2616_v47, %v3347_v27  ;;  %v1041_v46 = vpop.f32.mrb[39].mxu1 }
 0x1bf   :  { %v1042_v55 = vadd.f32 %v3347_v27, %v1041_v46  ;;  %2711 = vmatprep.mubr.msk.f32.mxu0 %vm1403_vm3, %v1334_v38 }
 0x1c0   :  { %2712 = vmatmul.mubr.msk.f32.gmra.mrb[36].mxu0 %vm1403_vm3, %v1335_v50  ;;  %v1337_v54 = vmax.f32 %v1047_v51, 0.0 }
 0x1c1   :  { %v1336_v52 = vmax.f32 %v1042_v55, 0.0  ;;  %v2619_v53 = vpop.f32.mrb[40].mxu1 }
 0x1c2   :  { %v1057_v63 = vadd.f32 %v2619_v53, %v3347_v27  ;;  %v1051_v56 = vpop.f32.mrb[41].mxu1 }
 0x1c3   :  { %v1052_v59 = vadd.f32 %v3347_v27, %v1051_v56  ;;  %2714 = vmatprep.mubr.msk.f32.mxu0 %vm1403_vm3, %v1336_v52 }
 0x1c4   :  { %2715 = vmatmul.mubr.msk.f32.gmra.mrb[38].mxu0 %vm1403_vm3, %v1337_v54  ;;  %v1339_v60 = vmax.f32 %v1057_v63, 0.0 }
 0x1c5   :  { %v1338_v62 = vmax.f32 %v1052_v59, 0.0  ;;  %v2622_v8 = vpop.f32.mrb[42].mxu1 }
 0x1c6   :  { %v1067_v61 = vadd.f32 %v2622_v8, %v3347_v27  ;;  %v1061_v7 = vpop.f32.mrb[43].mxu1 }
 0x1c7   :  { %v1062_v16 = vadd.f32 %v3347_v27, %v1061_v7  ;;  %2717 = vmatprep.mubr.msk.f32.mxu0 %vm1403_vm3, %v1338_v62 }
 0x1c8   :  { %2718 = vmatmul.mubr.msk.f32.gmra.mrb[40].mxu0 %vm1403_vm3, %v1339_v60  ;;  %v1341_v15 = vmax.f32 %v1067_v61, 0.0 }
 0x1c9   :  { %v1340_v0 = vmax.f32 %v1062_v16, 0.0  ;;  %v2625_v1 = vpop.f32.mrb[44].mxu1 }
 0x1ca   :  { %v1077_v26 = vadd.f32 %v2625_v1, %v3347_v27  ;;  %v1071_v3 = vpop.f32.mrb[45].mxu1 }
 0x1cb   :  { %v1072_v6 = vadd.f32 %v3347_v27, %v1071_v3  ;;  %2720 = vmatprep.mubr.msk.f32.mxu0 %vm1403_vm3, %v1340_v0 }
 0x1cc   :  { %2721 = vmatmul.mubr.msk.f32.gmra.mrb[42].mxu0 %vm1403_vm3, %v1341_v15  ;;  %v1343_v9 = vmax.f32 %v1077_v26, 0.0 }
 0x1cd   :  { %v1342_v25 = vmax.f32 %v1072_v6, 0.0  ;;  %v2628_v36 = vpop.f32.mrb[46].mxu1 }
 0x1ce   :  { %v1087_v10 = vadd.f32 %v2628_v36, %v3347_v27  ;;  %v1081_v35 = vpop.f32.mrb[47].mxu1 }
 0x1cf   :  { %v1082_v48 = vadd.f32 %v3347_v27, %v1081_v35  ;;  %2723 = vmatprep.mubr.msk.f32.mxu0 %vm1403_vm3, %v1342_v25 }
 0x1d0   :  { %2724 = vmatmul.mubr.msk.f32.gmra.mrb[44].mxu0 %vm1403_vm3, %v1343_v9  ;;  %v1345_v45 = vmax.f32 %v1087_v10, 0.0 }
 0x1d1   :  { %v1344_v11 = vmax.f32 %v1082_v48, 0.0  ;;  %v2631_v12 = vpop.f32.mrb[48].mxu1 }
 0x1d2   :  { %v1097_v58 = vadd.f32 %v2631_v12, %v3347_v27  ;;  %v1091_v13 = vpop.f32.mrb[49].mxu1 }
 0x1d3   :  { %v1092_v14 = vadd.f32 %v3347_v27, %v1091_v13  ;;  %2726 = vmatprep.mubr.msk.f32.mxu0 %vm1403_vm3, %v1344_v11 }
 0x1d4   :  { %2727 = vmatmul.mubr.msk.f32.gmra.mrb[46].mxu0 %vm1403_vm3, %v1345_v45  ;;  %v1347_v19 = vmax.f32 %v1097_v58, 0.0 }
 0x1d5   :  { %v1346_v57 = vmax.f32 %v1092_v14, 0.0  ;;  %v2634_v5 = vpop.f32.mrb[50].mxu1 }
 0x1d6   :  { %v1107_v20 = vadd.f32 %v2634_v5, %v3347_v27  ;;  %v1101_v4 = vpop.f32.mrb[51].mxu1 }
 0x1d7   :  { %v1102_v18 = vadd.f32 %v3347_v27, %v1101_v4  ;;  %2729 = vmatprep.mubr.msk.f32.mxu0 %vm1403_vm3, %v1346_v57 }
 0x1d8   :  { %2730 = vmatmul.mubr.msk.f32.gmra.mrb[48].mxu0 %vm1403_vm3, %v1347_v19  ;;  %v1349_v24 = vmax.f32 %v1107_v20, 0.0 }
 0x1d9   :  { %v1348_v21 = vmax.f32 %v1102_v18, 0.0  ;;  %v2637_v23 = vpop.f32.mrb[52].mxu1 }
 0x1da   :  { %v1117_v17 = vadd.f32 %v2637_v23, %v3347_v27  ;;  %v1111_v28 = vpop.f32.mrb[53].mxu1 }
 0x1db   :  { %v1112_v29 = vadd.f32 %v3347_v27, %v1111_v28  ;;  %2732 = vmatprep.mubr.msk.f32.mxu0 %vm1403_vm3, %v1348_v21 }
 0x1dc   :  { %2733 = vmatmul.mubr.msk.f32.gmra.mrb[50].mxu0 %vm1403_vm3, %v1349_v24  ;;  %v1351_v31 = vmax.f32 %v1117_v17, 0.0 }
 0x1dd   :  { %v1350_v32 = vmax.f32 %v1112_v29, 0.0  ;;  %v2640_v33 = vpop.f32.mrb[54].mxu1 }
 0x1de   :  { %v1127_v2 = vadd.f32 %v2640_v33, %v3347_v27  ;;  %v1121_v34 = vpop.f32.mrb[55].mxu1 }
 0x1df   :  { %v1122_v22 = vadd.f32 %v3347_v27, %v1121_v34  ;;  %2735 = vmatprep.mubr.msk.f32.mxu0 %vm1403_vm3, %v1350_v32 }
 0x1e0   :  { %2736 = vmatmul.mubr.msk.f32.gmra.mrb[52].mxu0 %vm1403_vm3, %v1351_v31  ;;  %v1353_v41 = vmax.f32 %v1127_v2, 0.0 }
 0x1e1   :  { %v1352_v37 = vmax.f32 %v1122_v22, 0.0  ;;  %v2643_v40 = vpop.f32.mrb[56].mxu1 }
 0x1e2   :  { %v1137_v39 = vadd.f32 %v2643_v40, %v3347_v27  ;;  %v1131_v42 = vpop.f32.mrb[57].mxu1 }
 0x1e3   :  { %v1132_v30 = vadd.f32 %v3347_v27, %v1131_v42  ;;  %2738 = vmatprep.mubr.msk.f32.mxu0 %vm1403_vm3, %v1352_v37 }
 0x1e4   :  { %2739 = vmatmul.mubr.msk.f32.gmra.mrb[54].mxu0 %vm1403_vm3, %v1353_v41  ;;  %v1355_v49 = vmax.f32 %v1137_v39, 0.0 }
 0x1e5   :  { %v1354_v43 = vmax.f32 %v1132_v30, 0.0  ;;  %v2646_v44 = vpop.f32.mrb[58].mxu1 }
 0x1e6   :  { %v1147_v38 = vadd.f32 %v2646_v44, %v3347_v27  ;;  %v1141_v47 = vpop.f32.mrb[59].mxu1 }
 0x1e7   :  { %v1142_v50 = vadd.f32 %v3347_v27, %v1141_v47  ;;  %2741 = vmatprep.mubr.msk.f32.mxu0 %vm1403_vm3, %v1354_v43 }
 0x1e8   :  { %2742 = vmatmul.mubr.msk.f32.gmra.mrb[56].mxu0 %vm1403_vm3, %v1355_v49  ;;  %v1357_v55 = vmax.f32 %v1147_v38, 0.0 }
 0x1e9   :  { %v1356_v51 = vmax.f32 %v1142_v50, 0.0  ;;  %v2649_v46 = vpop.f32.mrb[60].mxu1 }
 0x1ea   :  { %v1157_v52 = vadd.f32 %v2649_v46, %v3347_v27  ;;  %v1151_v53 = vpop.f32.mrb[61].mxu1 }
 0x1eb   :  { %v1152_v54 = vadd.f32 %v3347_v27, %v1151_v53  ;;  %2744 = vmatprep.mubr.msk.f32.mxu0 %vm1403_vm3, %v1356_v51 }
 0x1ec   :  { %2745 = vmatmul.mubr.msk.f32.gmra.mrb[58].mxu0 %vm1403_vm3, %v1357_v55  ;;  %v1359_v59 = vmax.f32 %v1157_v52, 0.0 }
 0x1ed   :  { %v1358_v63 = vmax.f32 %v1152_v54, 0.0  ;;  %v2652_v56 = vpop.f32.mrb[62].mxu1 }
 0x1ee   :  { %v1167_v62 = vadd.f32 %v2652_v56, %v3347_v27  ;;  %v1161_v8 = vpop.f32.mrb[63].mxu1 }
 0x1ef   :  { %v1162_v60 = vadd.f32 %v3347_v27, %v1161_v8  ;;  %2747 = vmatprep.mubr.msk.f32.mxu0 %vm1403_vm3, %v1358_v63 }
 0x1f0   :  { %2748 = vmatmul.mubr.msk.f32.gmra.mrb[60].mxu0 %vm1403_vm3, %v1359_v59  ;;  %v1361_v16 = vmax.f32 %v1167_v62, 0.0 }
 0x1f1   :  { %v1360_v61 = vmax.f32 %v1162_v60, 0.0  ;;  %v2655_v7 = vpop.f32.mrb[64].mxu1 }
 0x1f2   :  { %v1177_v0 = vadd.f32 %v2655_v7, %v3347_v27  ;;  %v1171_v1 = vpop.f32.mrb[65].mxu1 }
 0x1f3   :  { %v1172_v15 = vadd.f32 %v3347_v27, %v1171_v1  ;;  %2750 = vmatprep.mubr.msk.f32.mxu0 %vm1403_vm3, %v1360_v61 }
 0x1f4   :  { %2751 = vmatmul.mubr.msk.f32.gmra.mrb[62].mxu0 %vm1403_vm3, %v1361_v16  ;;  %v1363_v6 = vmax.f32 %v1177_v0, 0.0 }
 0x1f5   :  { %v1362_v26 = vmax.f32 %v1172_v15, 0.0  ;;  %v2658_v3 = vpop.f32.mrb[66].mxu1 }
 0x1f6   :  { %v1187_v25 = vadd.f32 %v2658_v3, %v3347_v27  ;;  %v1181_v36 = vpop.f32.mrb[67].mxu1 }
 0x1f7   :  { %v1182_v9 = vadd.f32 %v3347_v27, %v1181_v36  ;;  %2753 = vmatprep.mubr.msk.f32.mxu0 %vm1403_vm3, %v1362_v26 }
 0x1f8   :  { %2754 = vmatmul.mubr.msk.f32.gmra.mrb[64].mxu0 %vm1403_vm3, %v1363_v6  ;;  %v1365_v48 = vmax.f32 %v1187_v25, 0.0 }
 0x1f9   :  { %v1364_v10 = vmax.f32 %v1182_v9, 0.0  ;;  %v2661_v35 = vpop.f32.mrb[68].mxu1 }
 0x1fa   :  { %v1197_v11 = vadd.f32 %v2661_v35, %v3347_v27  ;;  %v1191_v12 = vpop.f32.mrb[69].mxu1 }
 0x1fb   :  { %v1192_v45 = vadd.f32 %v3347_v27, %v1191_v12  ;;  %2756 = vmatprep.mubr.msk.f32.mxu0 %vm1403_vm3, %v1364_v10 }
 0x1fc   :  { %2757 = vmatmul.mubr.msk.f32.gmra.mrb[66].mxu0 %vm1403_vm3, %v1365_v48  ;;  %v1367_v14 = vmax.f32 %v1197_v11, 0.0 }
 0x1fd   :  { %v1366_v58 = vmax.f32 %v1192_v45, 0.0  ;;  %v2664_v13 = vpop.f32.mrb[70].mxu1 }
 0x1fe   :  { %v1207_v57 = vadd.f32 %v2664_v13, %v3347_v27  ;;  %v1201_v5 = vpop.f32.mrb[71].mxu1 }
 0x1ff   :  { %v1202_v19 = vadd.f32 %v3347_v27, %v1201_v5  ;;  %2759 = vmatprep.mubr.msk.f32.mxu0 %vm1403_vm3, %v1366_v58 }
 0x200   :  { %2760 = vmatmul.mubr.msk.f32.gmra.mrb[68].mxu0 %vm1403_vm3, %v1367_v14  ;;  %v1369_v18 = vmax.f32 %v1207_v57, 0.0 }
 0x201   :  { %v1368_v20 = vmax.f32 %v1202_v19, 0.0  ;;  %v2667_v4 = vpop.f32.mrb[72].mxu1 }
 0x202   :  { %v1217_v21 = vadd.f32 %v2667_v4, %v3347_v27  ;;  %v1211_v23 = vpop.f32.mrb[73].mxu1 }
 0x203   :  { %v1212_v24 = vadd.f32 %v3347_v27, %v1211_v23  ;;  %2762 = vmatprep.mubr.msk.f32.mxu0 %vm1403_vm3, %v1368_v20 }
 0x204   :  { %2763 = vmatmul.mubr.msk.f32.gmra.mrb[70].mxu0 %vm1403_vm3, %v1369_v18  ;;  %v1371_v29 = vmax.f32 %v1217_v21, 0.0 }
 0x205   :  { %v1370_v17 = vmax.f32 %v1212_v24, 0.0  ;;  %v2670_v28 = vpop.f32.mrb[74].mxu1 }
 0x206   :  { %v1227_v32 = vadd.f32 %v2670_v28, %v3347_v27  ;;  %v1221_v33 = vpop.f32.mrb[75].mxu1 }
 0x207   :  { %v1222_v31 = vadd.f32 %v3347_v27, %v1221_v33  ;;  %2765 = vmatprep.mubr.msk.f32.mxu0 %vm1403_vm3, %v1370_v17 }
 0x208   :  { %2766 = vmatmul.mubr.msk.f32.gmra.mrb[72].mxu0 %vm1403_vm3, %v1371_v29  ;;  %v1373_v22 = vmax.f32 %v1227_v32, 0.0 }
 0x209   :  { %v1372_v2 = vmax.f32 %v1222_v31, 0.0  ;;  %v2673_v34 = vpop.f32.mrb[76].mxu1  ;;  %v3480_v31 = vld [vmem:[%s3808_s6] ss:$0 sm:$0xff] }
 0x20a   :  { %v1237_v37 = vadd.f32 %v2673_v34, %v3347_v27  ;;  %v1231_v40 = vpop.f32.mrb[77].mxu1 }
 0x20b   :  { %v1232_v41 = vadd.f32 %v3347_v27, %v1231_v40  ;;  %2768 = vmatprep.mubr.msk.f32.mxu0 %vm1403_vm3, %v1372_v2 }
 0x20c   :  { %2769 = vmatmul.mubr.msk.f32.gmra.mrb[74].mxu0 %vm1403_vm3, %v1373_v22  ;;  %v1375_v30 = vmax.f32 %v1237_v37, 0.0 }
 0x20d   :  { %v1374_v39 = vmax.f32 %v1232_v41, 0.0  ;;  %v2676_v42 = vpop.f32.mrb[78].mxu1 }
 0x20e   :  { %v1247_v43 = vadd.f32 %v2676_v42, %v3347_v27  ;;  %v1241_v44 = vpop.f32.mrb[79].mxu1 }
 0x20f   :  { %v1242_v49 = vadd.f32 %v3347_v27, %v1241_v44  ;;  %2771 = vmatprep.mubr.msk.f32.mxu0 %vm1403_vm3, %v1374_v39 }
 0x210   :  { %2772 = vmatmul.mubr.msk.f32.gmra.mrb[76].mxu0 %vm1403_vm3, %v1375_v30  ;;  %v1377_v50 = vmax.f32 %v1247_v43, 0.0 }
 0x211   :  { %v1376_v38 = vmax.f32 %v1242_v49, 0.0  ;;  %v2679_v47 = vpop.f32.mrb[80].mxu1 }
 0x212   :  { %v1257_v51 = vadd.f32 %v2679_v47, %v3347_v27  ;;  %v1251_v46 = vpop.f32.mrb[81].mxu1 }
 0x213   :  { %v1252_v55 = vadd.f32 %v3347_v27, %v1251_v46  ;;  %2774 = vmatprep.mubr.msk.f32.mxu0 %vm1403_vm3, %v1376_v38 }
 0x214   :  { %2775 = vmatmul.mubr.msk.f32.gmra.mrb[78].mxu0 %vm1403_vm3, %v1377_v50  ;;  %v1379_v54 = vmax.f32 %v1257_v51, 0.0 }
 0x215   :  { %v1378_v52 = vmax.f32 %v1252_v55, 0.0  ;;  %v2682_v53 = vpop.f32.mrb[82].mxu1 }
 0x216   :  { %v1267_v63 = vadd.f32 %v2682_v53, %v3347_v27  ;;  %v1261_v56 = vpop.f32.mrb[83].mxu1 }
 0x217   :  { %v1262_v59 = vadd.f32 %v3347_v27, %v1261_v56  ;;  %2777 = vmatprep.mubr.msk.f32.mxu0 %vm1403_vm3, %v1378_v52 }
 0x218   :  { %2778 = vmatmul.mubr.msk.f32.gmra.mrb[80].mxu0 %vm1403_vm3, %v1379_v54  ;;  %v1381_v60 = vmax.f32 %v1267_v63, 0.0 }
 0x219   :  { %v1380_v62 = vmax.f32 %v1262_v59, 0.0  ;;  %v2685_v8 = vpop.f32.mrb[84].mxu1 }
 0x21a   :  { %v1277_v61 = vadd.f32 %v2685_v8, %v3347_v27  ;;  %v1271_v7 = vpop.f32.mrb[85].mxu1 }
 0x21b   :  { %v1272_v16 = vadd.f32 %v3347_v27, %v1271_v7  ;;  %2780 = vmatprep.mubr.msk.f32.mxu0 %vm1403_vm3, %v1380_v62 }
 0x21c   :  { %2781 = vmatmul.mubr.msk.f32.gmra.mrb[82].mxu0 %vm1403_vm3, %v1381_v60  ;;  %v1383_v15 = vmax.f32 %v1277_v61, 0.0 }
 0x21d   :  { %v1382_v0 = vmax.f32 %v1272_v16, 0.0  ;;  %v2688_v1 = vpop.f32.mrb[86].mxu1 }
 0x21e   :  { %v1287_v26 = vadd.f32 %v2688_v1, %v3347_v27  ;;  %v1281_v3 = vpop.f32.mrb[87].mxu1 }
 0x21f   :  { %v1282_v6 = vadd.f32 %v3347_v27, %v1281_v3  ;;  %2783 = vmatprep.mubr.msk.f32.mxu0 %vm1403_vm3, %v1382_v0 }
 0x220   :  { %2784 = vmatmul.mubr.msk.f32.gmra.mrb[84].mxu0 %vm1403_vm3, %v1383_v15  ;;  %v1385_v9 = vmax.f32 %v1287_v26, 0.0 }
 0x221   :  { %v1384_v25 = vmax.f32 %v1282_v6, 0.0  ;;  %v2691_v36 = vpop.f32.mrb[88].mxu1 }
 0x222   :  { %v1297_v10 = vadd.f32 %v2691_v36, %v3347_v27  ;;  %v1291_v35 = vpop.f32.mrb[89].mxu1 }
 0x223   :  { %v1292_v48 = vadd.f32 %v3347_v27, %v1291_v35  ;;  %2786 = vmatprep.mubr.msk.f32.mxu0 %vm1403_vm3, %v1384_v25 }
 0x224   :  { %2787 = vmatmul.mubr.msk.f32.gmra.mrb[86].mxu0 %vm1403_vm3, %v1385_v9  ;;  %v1387_v45 = vmax.f32 %v1297_v10, 0.0 }
 0x225   :  { %v1386_v11 = vmax.f32 %v1292_v48, 0.0  ;;  %v2694_v12 = vpop.f32.mrb[90].mxu1 }
 0x226   :  { %v1307_v58 = vadd.f32 %v2694_v12, %v3347_v27  ;;  %v1301_v13 = vpop.f32.mrb[91].mxu1 }
 0x227   :  { %v1302_v14 = vadd.f32 %v3347_v27, %v1301_v13  ;;  %2789 = vmatprep.mubr.msk.f32.mxu0 %vm1403_vm3, %v1386_v11 }
 0x228   :  { %2790 = vmatmul.mubr.msk.f32.gmra.mrb[88].mxu0 %vm1403_vm3, %v1387_v45  ;;  %v1389_v19 = vmax.f32 %v1307_v58, 0.0 }
 0x229   :  { %v1388_v57 = vmax.f32 %v1302_v14, 0.0  ;;  %v2697_v5 = vpop.f32.mrb[92].mxu1 }
 0x22a   :  { %v1317_v20 = vadd.f32 %v2697_v5, %v3347_v27  ;;  %v1311_v4 = vpop.f32.mrb[93].mxu1 }
 0x22b   :  { %v1312_v18 = vadd.f32 %v3347_v27, %v1311_v4  ;;  %2792 = vmatprep.mubr.msk.f32.mxu0 %vm1403_vm3, %v1388_v57 }
 0x22c   :  { %2793 = vmatmul.mubr.msk.f32.gmra.mrb[90].mxu0 %vm1403_vm3, %v1389_v19  ;;  %v1391_v24 = vmax.f32 %v1317_v20, 0.0 }
 0x22d   :  { %v1390_v21 = vmax.f32 %v1312_v18, 0.0  ;;  %v2700_v23 = vpop.f32.mrb[94].mxu1 }
 0x22e   :  { %v1327_v17 = vadd.f32 %v2700_v23, %v3347_v27  ;;  %v1321_v28 = vpop.f32.mrb[95].mxu1 }
 0x22f   :  { %v1322_v29 = vadd.f32 %v3347_v27, %v1321_v28  ;;  %2795 = vmatprep.mubr.msk.f32.mxu0 %vm1403_vm3, %v1390_v21 }
 0x230   :  { %2796 = vmatmul.mubr.msk.f32.gmra.mrb[92].mxu0 %vm1403_vm3, %v1391_v24  ;;  %v1393_v33 = vmax.f32 %v1327_v17, 0.0 }
 0x231   :  { %v1392_v32 = vmax.f32 %v1322_v29, 0.0 }
 0x233   :  { %2798 = vmatprep.mubr.msk.f32.mxu0 %vm1403_vm3, %v1392_v32 }
 0x234   :  { %2799 = vmatmul.mubr.msk.f32.gmra.mrb[94].mxu0 %vm1403_vm3, %v1393_v33 }
 0x28b   :  { %v2707_v2 = vpop.f32.mrb[32].mxu0 }
 0x28c   :  { %v1668_v34 = vadd.f32 %v2707_v2, %v3480_v31  ;;  %v1662_v22 = vpop.f32.mrb[33].mxu0 }
 0x28d   :  { %v1663_v27 = vadd.f32 %v3480_v31, %v1662_v22 }
 0x28e   :  { %v1982_v37 = vmax.f32 %v1668_v34, 0.0 }
 0x28f   :  { %v1981_v40 = vmax.f32 %v1663_v27, 0.0  ;;  %v2710_v41 = vpop.f32.mrb[34].mxu0 }
 0x290   :  { %2046 = vst.msk [vmem:[%s3809_s7 + $0x8] sm:$0xff] %vm1403_vm3, %v1982_v37  ;;  %v1678_v39 = vadd.f32 %v2710_v41, %v3480_v31  ;;  %v1672_v42 = vpop.f32.mrb[35].mxu0 }
 0x291   :  { %2045 = vst.msk [vmem:[%s3809_s7] sm:$0xff] %vm1403_vm3, %v1981_v40  ;;  %v1673_v30 = vadd.f32 %v3480_v31, %v1672_v42 }
 0x292   :  { %v1984_v43 = vmax.f32 %v1678_v39, 0.0 }
 0x293   :  { %v1983_v44 = vmax.f32 %v1673_v30, 0.0  ;;  %v2713_v49 = vpop.f32.mrb[36].mxu0 }
 0x294   :  { %2048 = vst.msk [vmem:[%s3809_s7 + $0x18] sm:$0xff] %vm1403_vm3, %v1984_v43  ;;  %v1688_v38 = vadd.f32 %v2713_v49, %v3480_v31  ;;  %v1682_v47 = vpop.f32.mrb[37].mxu0 }
 0x295   :  { %2047 = vst.msk [vmem:[%s3809_s7 + $0x10] sm:$0xff] %vm1403_vm3, %v1983_v44  ;;  %v1683_v50 = vadd.f32 %v3480_v31, %v1682_v47 }
 0x296   :  { %v1986_v51 = vmax.f32 %v1688_v38, 0.0 }
 0x297   :  { %v1985_v46 = vmax.f32 %v1683_v50, 0.0  ;;  %v2716_v55 = vpop.f32.mrb[38].mxu0 }
 0x298   :  { %2050 = vst.msk [vmem:[%s3809_s7 + $0x28] sm:$0xff] %vm1403_vm3, %v1986_v51  ;;  %v1698_v52 = vadd.f32 %v2716_v55, %v3480_v31  ;;  %v1692_v53 = vpop.f32.mrb[39].mxu0 }
 0x299   :  { %2049 = vst.msk [vmem:[%s3809_s7 + $0x20] sm:$0xff] %vm1403_vm3, %v1985_v46  ;;  %v1693_v54 = vadd.f32 %v3480_v31, %v1692_v53 }
 0x29a   :  { %v1988_v63 = vmax.f32 %v1698_v52, 0.0 }
 0x29b   :  { %v1987_v56 = vmax.f32 %v1693_v54, 0.0  ;;  %v2719_v59 = vpop.f32.mrb[40].mxu0 }
 0x29c   :  { %2052 = vst.msk [vmem:[%s3809_s7 + $0x38] sm:$0xff] %vm1403_vm3, %v1988_v63  ;;  %v1708_v62 = vadd.f32 %v2719_v59, %v3480_v31  ;;  %v1702_v8 = vpop.f32.mrb[41].mxu0 }
 0x29d   :  { %2051 = vst.msk [vmem:[%s3809_s7 + $0x30] sm:$0xff] %vm1403_vm3, %v1987_v56  ;;  %v1703_v60 = vadd.f32 %v3480_v31, %v1702_v8 }
 0x29e   :  { %v1990_v61 = vmax.f32 %v1708_v62, 0.0 }
 0x29f   :  { %v1989_v7 = vmax.f32 %v1703_v60, 0.0  ;;  %v2722_v16 = vpop.f32.mrb[42].mxu0 }
 0x2a0   :  { %2054 = vst.msk [vmem:[%s3809_s7 + $0x48] sm:$0xff] %vm1403_vm3, %v1990_v61  ;;  %v1718_v0 = vadd.f32 %v2722_v16, %v3480_v31  ;;  %v1712_v1 = vpop.f32.mrb[43].mxu0 }
 0x2a1   :  { %2053 = vst.msk [vmem:[%s3809_s7 + $0x40] sm:$0xff] %vm1403_vm3, %v1989_v7  ;;  %v1713_v15 = vadd.f32 %v3480_v31, %v1712_v1 }
 0x2a2   :  { %v1992_v26 = vmax.f32 %v1718_v0, 0.0 }
 0x2a3   :  { %v1991_v3 = vmax.f32 %v1713_v15, 0.0  ;;  %v2725_v6 = vpop.f32.mrb[44].mxu0 }
 0x2a4   :  { %2056 = vst.msk [vmem:[%s3809_s7 + $0x58] sm:$0xff] %vm1403_vm3, %v1992_v26  ;;  %v1728_v25 = vadd.f32 %v2725_v6, %v3480_v31  ;;  %v1722_v36 = vpop.f32.mrb[45].mxu0 }
 0x2a5   :  { %2055 = vst.msk [vmem:[%s3809_s7 + $0x50] sm:$0xff] %vm1403_vm3, %v1991_v3  ;;  %v1723_v9 = vadd.f32 %v3480_v31, %v1722_v36 }
 0x2a6   :  { %v1994_v10 = vmax.f32 %v1728_v25, 0.0 }
 0x2a7   :  { %v1993_v35 = vmax.f32 %v1723_v9, 0.0  ;;  %v2728_v48 = vpop.f32.mrb[46].mxu0 }
 0x2a8   :  { %2058 = vst.msk [vmem:[%s3809_s7 + $0x68] sm:$0xff] %vm1403_vm3, %v1994_v10  ;;  %v1738_v11 = vadd.f32 %v2728_v48, %v3480_v31  ;;  %v1732_v12 = vpop.f32.mrb[47].mxu0 }
 0x2a9   :  { %2057 = vst.msk [vmem:[%s3809_s7 + $0x60] sm:$0xff] %vm1403_vm3, %v1993_v35  ;;  %v1733_v45 = vadd.f32 %v3480_v31, %v1732_v12 }
 0x2aa   :  { %v1996_v58 = vmax.f32 %v1738_v11, 0.0 }
 0x2ab   :  { %v1995_v13 = vmax.f32 %v1733_v45, 0.0  ;;  %v2731_v14 = vpop.f32.mrb[48].mxu0 }
 0x2ac   :  { %2060 = vst.msk [vmem:[%s3809_s7 + $0x78] sm:$0xff] %vm1403_vm3, %v1996_v58  ;;  %v1748_v57 = vadd.f32 %v2731_v14, %v3480_v31  ;;  %v1742_v5 = vpop.f32.mrb[49].mxu0 }
 0x2ad   :  { %2059 = vst.msk [vmem:[%s3809_s7 + $0x70] sm:$0xff] %vm1403_vm3, %v1995_v13  ;;  %v1743_v19 = vadd.f32 %v3480_v31, %v1742_v5 }
 0x2ae   :  { %v1998_v20 = vmax.f32 %v1748_v57, 0.0 }
 0x2af   :  { %v1997_v4 = vmax.f32 %v1743_v19, 0.0  ;;  %v2734_v18 = vpop.f32.mrb[50].mxu0 }
 0x2b0   :  { %2062 = vst.msk [vmem:[%s3809_s7 + $0x88] sm:$0xff] %vm1403_vm3, %v1998_v20  ;;  %v1758_v21 = vadd.f32 %v2734_v18, %v3480_v31  ;;  %v1752_v23 = vpop.f32.mrb[51].mxu0 }
 0x2b1   :  { %2061 = vst.msk [vmem:[%s3809_s7 + $0x80] sm:$0xff] %vm1403_vm3, %v1997_v4  ;;  %v1753_v24 = vadd.f32 %v3480_v31, %v1752_v23 }
 0x2b2   :  { %v2000_v17 = vmax.f32 %v1758_v21, 0.0 }
 0x2b3   :  { %v1999_v28 = vmax.f32 %v1753_v24, 0.0  ;;  %v2737_v29 = vpop.f32.mrb[52].mxu0 }
 0x2b4   :  { %2064 = vst.msk [vmem:[%s3809_s7 + $0x98] sm:$0xff] %vm1403_vm3, %v2000_v17  ;;  %v1768_v32 = vadd.f32 %v2737_v29, %v3480_v31  ;;  %v1762_v33 = vpop.f32.mrb[53].mxu0 }
 0x2b5   :  { %2063 = vst.msk [vmem:[%s3809_s7 + $0x90] sm:$0xff] %vm1403_vm3, %v1999_v28  ;;  %v1763_v2 = vadd.f32 %v3480_v31, %v1762_v33 }
 0x2b6   :  { %v2002_v34 = vmax.f32 %v1768_v32, 0.0 }
 0x2b7   :  { %v2001_v22 = vmax.f32 %v1763_v2, 0.0  ;;  %v2740_v27 = vpop.f32.mrb[54].mxu0 }
 0x2b8   :  { %2066 = vst.msk [vmem:[%s3809_s7 + $0xa8] sm:$0xff] %vm1403_vm3, %v2002_v34  ;;  %v1778_v37 = vadd.f32 %v2740_v27, %v3480_v31  ;;  %v1772_v40 = vpop.f32.mrb[55].mxu0 }
 0x2b9   :  { %2065 = vst.msk [vmem:[%s3809_s7 + $0xa0] sm:$0xff] %vm1403_vm3, %v2001_v22  ;;  %v1773_v41 = vadd.f32 %v3480_v31, %v1772_v40 }
 0x2ba   :  { %v2004_v39 = vmax.f32 %v1778_v37, 0.0 }
 0x2bb   :  { %v2003_v42 = vmax.f32 %v1773_v41, 0.0  ;;  %v2743_v30 = vpop.f32.mrb[56].mxu0 }
 0x2bc   :  { %2068 = vst.msk [vmem:[%s3809_s7 + $0xb8] sm:$0xff] %vm1403_vm3, %v2004_v39  ;;  %v1788_v43 = vadd.f32 %v2743_v30, %v3480_v31  ;;  %v1782_v44 = vpop.f32.mrb[57].mxu0 }
 0x2bd   :  { %2067 = vst.msk [vmem:[%s3809_s7 + $0xb0] sm:$0xff] %vm1403_vm3, %v2003_v42  ;;  %v1783_v49 = vadd.f32 %v3480_v31, %v1782_v44 }
 0x2be   :  { %v2006_v38 = vmax.f32 %v1788_v43, 0.0 }
 0x2bf   :  { %v2005_v47 = vmax.f32 %v1783_v49, 0.0  ;;  %v2746_v50 = vpop.f32.mrb[58].mxu0 }
 0x2c0   :  { %2070 = vst.msk [vmem:[%s3809_s7 + $0xc8] sm:$0xff] %vm1403_vm3, %v2006_v38  ;;  %v1798_v51 = vadd.f32 %v2746_v50, %v3480_v31  ;;  %v1792_v46 = vpop.f32.mrb[59].mxu0 }
 0x2c1   :  { %2069 = vst.msk [vmem:[%s3809_s7 + $0xc0] sm:$0xff] %vm1403_vm3, %v2005_v47  ;;  %v1793_v55 = vadd.f32 %v3480_v31, %v1792_v46 }
 0x2c2   :  { %v2008_v52 = vmax.f32 %v1798_v51, 0.0 }
 0x2c3   :  { %v2007_v53 = vmax.f32 %v1793_v55, 0.0  ;;  %v2749_v54 = vpop.f32.mrb[60].mxu0 }
 0x2c4   :  { %2072 = vst.msk [vmem:[%s3809_s7 + $0xd8] sm:$0xff] %vm1403_vm3, %v2008_v52  ;;  %v1808_v63 = vadd.f32 %v2749_v54, %v3480_v31  ;;  %v1802_v56 = vpop.f32.mrb[61].mxu0 }
 0x2c5   :  { %2071 = vst.msk [vmem:[%s3809_s7 + $0xd0] sm:$0xff] %vm1403_vm3, %v2007_v53  ;;  %v1803_v59 = vadd.f32 %v3480_v31, %v1802_v56 }
 0x2c6   :  { %v2010_v62 = vmax.f32 %v1808_v63, 0.0 }
 0x2c7   :  { %v2009_v8 = vmax.f32 %v1803_v59, 0.0  ;;  %v2752_v60 = vpop.f32.mrb[62].mxu0 }
 0x2c8   :  { %2074 = vst.msk [vmem:[%s3809_s7 + $0xe8] sm:$0xff] %vm1403_vm3, %v2010_v62  ;;  %v1818_v61 = vadd.f32 %v2752_v60, %v3480_v31  ;;  %v1812_v7 = vpop.f32.mrb[63].mxu0 }
 0x2c9   :  { %2073 = vst.msk [vmem:[%s3809_s7 + $0xe0] sm:$0xff] %vm1403_vm3, %v2009_v8  ;;  %v1813_v16 = vadd.f32 %v3480_v31, %v1812_v7 }
 0x2ca   :  { %v2012_v0 = vmax.f32 %v1818_v61, 0.0 }
 0x2cb   :  { %v2011_v1 = vmax.f32 %v1813_v16, 0.0  ;;  %v2755_v15 = vpop.f32.mrb[64].mxu0 }
 0x2cc   :  { %2076 = vst.msk [vmem:[%s3809_s7 + $0xf8] sm:$0xff] %vm1403_vm3, %v2012_v0  ;;  %v1828_v26 = vadd.f32 %v2755_v15, %v3480_v31  ;;  %v1822_v3 = vpop.f32.mrb[65].mxu0 }
 0x2cd   :  { %2075 = vst.msk [vmem:[%s3809_s7 + $0xf0] sm:$0xff] %vm1403_vm3, %v2011_v1  ;;  %v1823_v6 = vadd.f32 %v3480_v31, %v1822_v3 }
 0x2ce   :  { %v2014_v25 = vmax.f32 %v1828_v26, 0.0 }
 0x2cf   :  { %v2013_v36 = vmax.f32 %v1823_v6, 0.0  ;;  %v2758_v9 = vpop.f32.mrb[66].mxu0 }
 0x2d0   :  { %2078 = vst.msk [vmem:[%s3809_s7 + $0x108] sm:$0xff] %vm1403_vm3, %v2014_v25  ;;  %v1838_v10 = vadd.f32 %v2758_v9, %v3480_v31  ;;  %v1832_v35 = vpop.f32.mrb[67].mxu0 }
 0x2d1   :  { %2077 = vst.msk [vmem:[%s3809_s7 + $0x100] sm:$0xff] %vm1403_vm3, %v2013_v36  ;;  %v1833_v48 = vadd.f32 %v3480_v31, %v1832_v35 }
 0x2d2   :  { %v2016_v11 = vmax.f32 %v1838_v10, 0.0 }
 0x2d3   :  { %v2015_v12 = vmax.f32 %v1833_v48, 0.0  ;;  %v2761_v45 = vpop.f32.mrb[68].mxu0 }
 0x2d4   :  { %2080 = vst.msk [vmem:[%s3809_s7 + $0x118] sm:$0xff] %vm1403_vm3, %v2016_v11  ;;  %v1848_v58 = vadd.f32 %v2761_v45, %v3480_v31  ;;  %v1842_v13 = vpop.f32.mrb[69].mxu0 }
 0x2d5   :  { %2079 = vst.msk [vmem:[%s3809_s7 + $0x110] sm:$0xff] %vm1403_vm3, %v2015_v12  ;;  %v1843_v14 = vadd.f32 %v3480_v31, %v1842_v13 }
 0x2d6   :  { %v2018_v57 = vmax.f32 %v1848_v58, 0.0 }
 0x2d7   :  { %v2017_v5 = vmax.f32 %v1843_v14, 0.0  ;;  %v2764_v19 = vpop.f32.mrb[70].mxu0 }
 0x2d8   :  { %2082 = vst.msk [vmem:[%s3809_s7 + $0x128] sm:$0xff] %vm1403_vm3, %v2018_v57  ;;  %v1858_v20 = vadd.f32 %v2764_v19, %v3480_v31  ;;  %v1852_v4 = vpop.f32.mrb[71].mxu0 }
 0x2d9   :  { %2081 = vst.msk [vmem:[%s3809_s7 + $0x120] sm:$0xff] %vm1403_vm3, %v2017_v5  ;;  %v1853_v18 = vadd.f32 %v3480_v31, %v1852_v4 }
 0x2da   :  { %v2020_v21 = vmax.f32 %v1858_v20, 0.0 }
 0x2db   :  { %v2019_v23 = vmax.f32 %v1853_v18, 0.0  ;;  %v2767_v24 = vpop.f32.mrb[72].mxu0 }
 0x2dc   :  { %2084 = vst.msk [vmem:[%s3809_s7 + $0x138] sm:$0xff] %vm1403_vm3, %v2020_v21  ;;  %v1868_v17 = vadd.f32 %v2767_v24, %v3480_v31  ;;  %v1862_v28 = vpop.f32.mrb[73].mxu0 }
 0x2dd   :  { %2083 = vst.msk [vmem:[%s3809_s7 + $0x130] sm:$0xff] %vm1403_vm3, %v2019_v23  ;;  %v1863_v29 = vadd.f32 %v3480_v31, %v1862_v28 }
 0x2de   :  { %v2022_v32 = vmax.f32 %v1868_v17, 0.0 }
 0x2df   :  { %v2021_v33 = vmax.f32 %v1863_v29, 0.0  ;;  %v2770_v2 = vpop.f32.mrb[74].mxu0 }
 0x2e0   :  { %2086 = vst.msk [vmem:[%s3809_s7 + $0x148] sm:$0xff] %vm1403_vm3, %v2022_v32  ;;  %v1878_v34 = vadd.f32 %v2770_v2, %v3480_v31  ;;  %v1872_v22 = vpop.f32.mrb[75].mxu0 }
 0x2e1   :  { %2085 = vst.msk [vmem:[%s3809_s7 + $0x140] sm:$0xff] %vm1403_vm3, %v2021_v33  ;;  %v1873_v27 = vadd.f32 %v3480_v31, %v1872_v22 }
 0x2e2   :  { %v2024_v37 = vmax.f32 %v1878_v34, 0.0 }
 0x2e3   :  { %v2023_v40 = vmax.f32 %v1873_v27, 0.0  ;;  %v2773_v41 = vpop.f32.mrb[76].mxu0 }
 0x2e4   :  { %2088 = vst.msk [vmem:[%s3809_s7 + $0x158] sm:$0xff] %vm1403_vm3, %v2024_v37  ;;  %v1888_v39 = vadd.f32 %v2773_v41, %v3480_v31  ;;  %v1882_v42 = vpop.f32.mrb[77].mxu0 }
 0x2e5   :  { %2087 = vst.msk [vmem:[%s3809_s7 + $0x150] sm:$0xff] %vm1403_vm3, %v2023_v40  ;;  %v1883_v30 = vadd.f32 %v3480_v31, %v1882_v42 }
 0x2e6   :  { %v2026_v43 = vmax.f32 %v1888_v39, 0.0 }
 0x2e7   :  { %v2025_v44 = vmax.f32 %v1883_v30, 0.0  ;;  %v2776_v49 = vpop.f32.mrb[78].mxu0 }
 0x2e8   :  { %2090 = vst.msk [vmem:[%s3809_s7 + $0x168] sm:$0xff] %vm1403_vm3, %v2026_v43  ;;  %v1898_v38 = vadd.f32 %v2776_v49, %v3480_v31  ;;  %v1892_v47 = vpop.f32.mrb[79].mxu0 }
 0x2e9   :  { %2089 = vst.msk [vmem:[%s3809_s7 + $0x160] sm:$0xff] %vm1403_vm3, %v2025_v44  ;;  %v1893_v50 = vadd.f32 %v3480_v31, %v1892_v47 }
 0x2ea   :  { %v2028_v51 = vmax.f32 %v1898_v38, 0.0 }
 0x2eb   :  { %v2027_v46 = vmax.f32 %v1893_v50, 0.0  ;;  %v2779_v55 = vpop.f32.mrb[80].mxu0 }
 0x2ec   :  { %2092 = vst.msk [vmem:[%s3809_s7 + $0x178] sm:$0xff] %vm1403_vm3, %v2028_v51  ;;  %v1908_v52 = vadd.f32 %v2779_v55, %v3480_v31  ;;  %v1902_v53 = vpop.f32.mrb[81].mxu0 }
 0x2ed   :  { %2091 = vst.msk [vmem:[%s3809_s7 + $0x170] sm:$0xff] %vm1403_vm3, %v2027_v46  ;;  %v1903_v54 = vadd.f32 %v3480_v31, %v1902_v53 }
 0x2ee   :  { %v2030_v63 = vmax.f32 %v1908_v52, 0.0 }
 0x2ef   :  { %v2029_v56 = vmax.f32 %v1903_v54, 0.0  ;;  %v2782_v59 = vpop.f32.mrb[82].mxu0 }
 0x2f0   :  { %2094 = vst.msk [vmem:[%s3809_s7 + $0x188] sm:$0xff] %vm1403_vm3, %v2030_v63  ;;  %v1918_v62 = vadd.f32 %v2782_v59, %v3480_v31  ;;  %v1912_v8 = vpop.f32.mrb[83].mxu0 }
 0x2f1   :  { %2093 = vst.msk [vmem:[%s3809_s7 + $0x180] sm:$0xff] %vm1403_vm3, %v2029_v56  ;;  %v1913_v60 = vadd.f32 %v3480_v31, %v1912_v8 }
 0x2f2   :  { %v2032_v61 = vmax.f32 %v1918_v62, 0.0 }
 0x2f3   :  { %v2031_v7 = vmax.f32 %v1913_v60, 0.0  ;;  %v2785_v16 = vpop.f32.mrb[84].mxu0 }
 0x2f4   :  { %2096 = vst.msk [vmem:[%s3809_s7 + $0x198] sm:$0xff] %vm1403_vm3, %v2032_v61  ;;  %v1928_v0 = vadd.f32 %v2785_v16, %v3480_v31  ;;  %v1922_v1 = vpop.f32.mrb[85].mxu0 }
 0x2f5   :  { %2095 = vst.msk [vmem:[%s3809_s7 + $0x190] sm:$0xff] %vm1403_vm3, %v2031_v7  ;;  %v1923_v15 = vadd.f32 %v3480_v31, %v1922_v1 }
 0x2f6   :  { %v2034_v26 = vmax.f32 %v1928_v0, 0.0 }
 0x2f7   :  { %v2033_v3 = vmax.f32 %v1923_v15, 0.0  ;;  %v2788_v6 = vpop.f32.mrb[86].mxu0 }
 0x2f8   :  { %2098 = vst.msk [vmem:[%s3809_s7 + $0x1a8] sm:$0xff] %vm1403_vm3, %v2034_v26  ;;  %v1938_v25 = vadd.f32 %v2788_v6, %v3480_v31  ;;  %v1932_v36 = vpop.f32.mrb[87].mxu0 }
 0x2f9   :  { %2097 = vst.msk [vmem:[%s3809_s7 + $0x1a0] sm:$0xff] %vm1403_vm3, %v2033_v3  ;;  %v1933_v9 = vadd.f32 %v3480_v31, %v1932_v36 }
 0x2fa   :  { %v2036_v10 = vmax.f32 %v1938_v25, 0.0 }
 0x2fb   :  { %v2035_v35 = vmax.f32 %v1933_v9, 0.0  ;;  %v2791_v48 = vpop.f32.mrb[88].mxu0 }
 0x2fc   :  { %2100 = vst.msk [vmem:[%s3809_s7 + $0x1b8] sm:$0xff] %vm1403_vm3, %v2036_v10  ;;  %v1948_v11 = vadd.f32 %v2791_v48, %v3480_v31  ;;  %v1942_v12 = vpop.f32.mrb[89].mxu0 }
 0x2fd   :  { %2099 = vst.msk [vmem:[%s3809_s7 + $0x1b0] sm:$0xff] %vm1403_vm3, %v2035_v35  ;;  %v1943_v45 = vadd.f32 %v3480_v31, %v1942_v12 }
 0x2fe   :  { %v2038_v58 = vmax.f32 %v1948_v11, 0.0 }
 0x2ff   :  { %v2037_v13 = vmax.f32 %v1943_v45, 0.0  ;;  %v2794_v14 = vpop.f32.mrb[90].mxu0 }
 0x300   :  { %2102 = vst.msk [vmem:[%s3809_s7 + $0x1c8] sm:$0xff] %vm1403_vm3, %v2038_v58  ;;  %v1958_v57 = vadd.f32 %v2794_v14, %v3480_v31  ;;  %v1952_v5 = vpop.f32.mrb[91].mxu0 }
 0x301   :  { %2101 = vst.msk [vmem:[%s3809_s7 + $0x1c0] sm:$0xff] %vm1403_vm3, %v2037_v13  ;;  %v1953_v19 = vadd.f32 %v3480_v31, %v1952_v5 }
 0x302   :  { %v2040_v20 = vmax.f32 %v1958_v57, 0.0 }
 0x303   :  { %v2039_v4 = vmax.f32 %v1953_v19, 0.0  ;;  %v2797_v18 = vpop.f32.mrb[92].mxu0 }
 0x304   :  { %2104 = vst.msk [vmem:[%s3809_s7 + $0x1d8] sm:$0xff] %vm1403_vm3, %v2040_v20  ;;  %v1968_v21 = vadd.f32 %v2797_v18, %v3480_v31  ;;  %v1962_v23 = vpop.f32.mrb[93].mxu0 }
 0x305   :  { %2103 = vst.msk [vmem:[%s3809_s7 + $0x1d0] sm:$0xff] %vm1403_vm3, %v2039_v4  ;;  %v1963_v24 = vadd.f32 %v3480_v31, %v1962_v23 }
 0x306   :  { %v2042_v17 = vmax.f32 %v1968_v21, 0.0 }
 0x307   :  { %v2041_v28 = vmax.f32 %v1963_v24, 0.0  ;;  %v2800_v29 = vpop.f32.mrb[94].mxu0 }
 0x308   :  { %2106 = vst.msk [vmem:[%s3809_s7 + $0x1e8] sm:$0xff] %vm1403_vm3, %v2042_v17  ;;  %v1978_v32 = vadd.f32 %v2800_v29, %v3480_v31  ;;  %v1972_v33 = vpop.f32.mrb[95].mxu0 }
 0x309   :  { %2105 = vst.msk [vmem:[%s3809_s7 + $0x1e0] sm:$0xff] %vm1403_vm3, %v2041_v28  ;;  %v1973_v2 = vadd.f32 %v3480_v31, %v1972_v33 }
 0x30a   :  { %v2044_v34 = vmax.f32 %v1978_v32, 0.0 }
 0x30b   :  { %v2043_v22 = vmax.f32 %v1973_v2, 0.0 }
 0x30c   :  { %2108 = vst.msk [vmem:[%s3809_s7 + $0x1f8] sm:$0xff] %vm1403_vm3, %v2044_v34 }
 0x30d   :  { %2107 = vst.msk [vmem:[%s3809_s7 + $0x1f0] sm:$0xff] %vm1403_vm3, %v2043_v22 }

// kernel: run_no_noise.6
= control target key start
LH: loop header
LB: loop body
LE: loop exit
PB: predicated region body
PF: predicated region fallthrough
CT: control target
= control target key end

     0   :  { %v561_v8 = vmov 1.0   ;;  %v563_v9 = vmov 1.0   ;;  %v565_v10 = vmov 0.0   ;;  %v567_v11 = vmov 0.0   ;;  %s627_s0 = inlined_call_operand.vmem [shape: f32[2,16], index: 0, kind: input, shape index: {}]   ;;  %s628_s1 = inlined_call_operand.vmem [shape: f32[2,16], index: 1, kind: input, shape index: {}]   ;;  %s629_s2 = inlined_call_operand.vmem [shape: f32[2,10], index: 2, kind: input, shape index: {}]   ;;  %s630_s3 = inlined_call_operand.vmem [shape: f32[16,10], index: 3, kind: input, shape index: {}]   ;;  %s631_s4 = inlined_call_operand.vmem [shape: f32[10,16], index: 4, kind: input, shape index: {}]   ;;  %s632_s5 = inlined_call_operand.vmem [shape: f32[1,10], index: 5, kind: input, shape index: {}]   ;;  %s633_s6 = inlined_call_operand.vmem [shape: f32[200,2,16], index: 6, kind: input, shape index: {}]   ;;  %s634_s7 = inlined_call_operand.vmem [shape: f32[2,16], index: 7, kind: output, shape index: {}]  }
   0x1   :  { %v524_v0 = vld [vmem:[%s627_s0] sm:$0x3]  ;;  %v544_v4 = vld [vmem:[%s630_s3 + $0x8] sm:$0xff]  ;;  %v569_v12 = vmov 0.0  }
   0x2   :  { %v529_v1 = vld [vmem:[%s628_s1] sm:$0x3]  ;;  %v554_v6 = vld [vmem:[%s631_s4 + $0x8] sm:$0x3] }
   0x3   :  { %v534_v2 = vld [vmem:[%s629_s2] sm:$0x3] }
   0x4   :  { %v539_v3 = vld [vmem:[%s630_s3] sm:$0xff]  ;;  %s571_s3 = smov 0  }
   0x5   :  { %v549_v5 = vld [vmem:[%s631_s4] sm:$0xff] }
   0x6   :  { %v559_v7 = vld [vmem:[%s632_s5] ss:$0 sm:$0xff] }
   0x7 LB: > { %v343_v13 = vpack.c.bf16 %v544_v4, %v539_v3  ;;  %v477_v14 = vmov 0.0|0.0   ;;  %vm478_vm0 = vmmov 0   ;;  %v479_v15 = vmov 0.0   ;;  %s317_s4 = sshll.u32 %s475_s3, 1  ;;  %s39_s3 = sadd.s32 1, %s475_s3   ;;  %s475_s3 = sphi %s571_s3, %s39_s3   ;;  %v471_v12 = vphi %v569_v12, %v635_v12   ;;  %v467_v11 = vphi %v567_v11, %v257_v11   ;;  %v463_v10 = vphi %v565_v10, %v261_v10   ;;  %v459_v9 = vphi %v563_v9, %v253_v9   ;;  %v455_v8 = vphi %v561_v8, %v254_v8  }
   0x8   : > { %342 = vmatprep.subr.bf16.mxu0 %v477_v14  ;;  %332 = vmatprep.mubr.msk.f32.mxu0 %vm478_vm0, %v479_v15  ;;  %v49_v16 = vand.u32 2147483647, %v471_v12  ;;  %s46_s15 = scalar_lea.vmem %s633_s6, %s317_s4  ;;  %v48_v21 = vmax.f32 %v471_v12, 0.0  ;;  %vm65_vm1 = vcmask 130048   ;;  %vm139_vm2 = vcmask 74752   ;;  %p36_p0 = scmp.ge.s32.totalorder %s39_s3, 200  }
   0x9   : > { %344 = vmatpush3.bf16.msra.mxu0 %v343_v13  ;;  %345 = vmatprep.subr.bf16.mxu1 %v477_v14  ;;  %v47_v24 = vld [vmem:[%s46_s15] sm:$0x3]  ;;  %vm157_vm3 = vcmask 1041408   ;;  %v346_v37 = vpack.c.bf16 %v554_v6, %v549_v5  ;;  %vm480_vm4 = vmmov 1   ;;  %vm153_vm6 = vcmask 80896  }
   0xa   : > { %339 = vmatprep.mubr.msk.f32.mxu1 %vm478_vm0, %v479_v15  ;;  %v50_v17 = vsub.f32 0.0, %v49_v16  ;;  %vm347_vm5 = vmpackc.low %vm157_vm3, %vm480_vm4  ;;  %v246_v46 = vsub.f32 0.0, %v471_v12  ;;  %v254_v8 = vmul.f32 0.999, %v455_v8   ;;  %v258_v15 = vmul.f32 0.999, %v463_v10 }
   0xb   : > { %348 = vmatpush3.bf16.msk.msra.mxu1 %vm347_vm5, %v346_v37  ;;  %v253_v9 = vmul.f32 0.9, %v459_v9   ;;  %vm289_vm9 = vcmask (%p36_p0), 123904  }
   0xc   : > { %v51_v18 = vmul.f32 1.442695, %v50_v17  ;;  %v247_v47 = vmul.f32 1.442695, %v246_v46  ;;  %v265_v58 = vsub.f32 1.0, %v254_v8 }
   0xe   : > { %401 = vpow2.f32 %v51_v18 }
  0x18   : > { %v402_v19 = vpop.eup %401 }
  0x19   : > { %v53_v20 = vadd.f32 1.0, %v402_v19 }
  0x1b   : > { %403 = vlog2.f32 %v53_v20  ;;  %v262_v20 = vsub.f32 1.0, %v253_v9 }
  0x25   : > { %v404_v22 = vpop.eup %403 }
  0x26   : > { %v55_v23 = vmul.f32 0.6931472, %v404_v22 }
  0x28   : > { %v56_v25 = vadd.f32 %v55_v23, %v48_v21 }
  0x2a   : > { %v57_v26 = vmul.f32 %v56_v25, %v47_v24  ;;  %v232_v43 = vmul.f32 %v56_v25, %v56_v25 }
  0x2c   : > { %v58_v27 = vadd.f32 %v57_v26, %v524_v0  ;;  %v233_v44 = vadd.f32 1e-10, %v232_v43 }
  0x2e   : > { %333 = vmatmul.mubr.msk.f32.vlgmr.msra.gmra.mrb[0].mxu0 %vm65_vm1, %v58_v27  ;;  %v236_v45 = vmul.f32 %v233_v44, %v233_v44 }
 0x101   : > { %v135_v28 = vpop.f32.mrb[0].mxu0 }
 0x102   : > { %v136_v29 = vadd.f32 %v559_v7, %v135_v28  ;;  %v334_v30 = vpop.f32.mrb[1].mxu0 }
 0x104   : > { %v140_v31 = vsel %vm139_vm2, %v136_v29, -inf }
 0x105   : > { %141 = vmax.xlane.f32.xlu0 %v140_v31 }
 0x192   : > { %v142_v32 = vpop.xlane.xlu0 %141 }
 0x193   : > { %v143_v33 = vsub.f32 %v136_v29, %v142_v32 }
 0x195   : > { %v144_v34 = vmul.f32 1.442695, %v143_v33 }
 0x197   : > { %405 = vpow2.f32 %v144_v34 }
 0x1a1   : > { %v406_v35 = vpop.eup %405 }
 0x1a2   : > { %v146_v36 = vsel %vm139_vm2, %v406_v35, 0.0 }
 0x1a3   : > { %147 = vadd.xlane.f32.xlu0 %v146_v36 }
 0x230   : > { %v148_v38 = vpop.xlane.xlu0 %147 }
 0x231   : > { %407 = vrcp.f32 %v148_v38 }
 0x232   : > { %409 = vrcp.f32 %v236_v45 }
 0x233   : > { %411 = vrcp.f32 %v233_v44 }
 0x234   : > { %413 = vpow2.f32 %v247_v47 }
 0x23b   : > { %v408_v39 = vpop.eup %407 }
 0x23c   : > { %v150_v40 = vmul.f32 %v408_v39, %v406_v35  ;;  %v410_v48 = vpop.eup %409 }
 0x23d   : > { %v238_v49 = vmul.f32 %v410_v48, %v529_v1  ;;  %v412_v50 = vpop.eup %411 }
 0x23e   : > { %v151_v41 = vsub.f32 %v150_v40, %v534_v2  ;;  %v414_v53 = vpop.eup %413 }
 0x23f   : > { %v239_v51 = vsub.f32 %v412_v50, %v238_v49  ;;  %v249_v55 = vadd.f32 1.0, %v414_v53 }
 0x240   : > { %v152_v42 = vmul.f32 0.5, %v151_v41 }
 0x241   : > { %v240_v52 = vmul.f32 0.5, %v239_v51  ;;  %415 = vrcp.f32 %v249_v55 }
 0x242   : > { %340 = vmatmul.mubr.msk.f32.vlgmr.msra.gmra.mrb[0].mxu1 %vm153_vm6, %v152_v42  ;;  %417 = vrcp.f32 %v265_v58 }
 0x243   : > { %v241_v54 = vmul.f32 0.03125, %v240_v52 }
 0x245   : > { %v242_v56 = vmul.f32 0.3, %v241_v54 }
 0x247   : > { %v243_v57 = vmul.f32 2.0, %v242_v56 }
 0x249   : > { %v244_v59 = vmul.f32 %v243_v57, %v56_v25  ;;  %v255_v25 = vmul.f32 0.9, %v467_v11 }
 0x24b   : > { %v416_v63 = vpop.eup %415 }
 0x24c   : > { %v418_v18 = vpop.eup %417 }
 0x315   : > { %v227_v60 = vpop.f32.mrb[0].mxu1 }
 0x316   : > { %v231_v61 = vmul.f32 %v227_v60, %v47_v24  ;;  %v341_v62 = vpop.f32.mrb[1].mxu1 }
 0x318   : > { %v245_v13 = vadd.f32 %v244_v59, %v231_v61 }
 0x31a   : > { %v252_v14 = vmul.f32 %v416_v63, %v245_v13 }
 0x31c   : > { %v259_v16 = vmul.f32 %v252_v14, %v252_v14  ;;  %v256_v26 = vmul.f32 0.1, %v252_v14 }
 0x31e   : > { %v260_v17 = vmul.f32 0.001, %v259_v16  ;;  %v257_v11 = vadd.f32 %v256_v26, %v255_v25  }
 0x320   : > { %v261_v10 = vadd.f32 %v260_v17, %v258_v15  }
 0x322   : > { %v267_v19 = vmul.f32 %v418_v18, %v261_v10 }
 0x324   : > { %419 = vrsqrt.f32 %v267_v19  ;;  %vm271_vm7 = vcmp.eq.f32.partialorder %v267_v19, inf  ;;  %v274_v23 = vand.u32 2147483648, %v267_v19  ;;  %vm273_vm8 = vcmp.eq.f32.partialorder %v267_v19, 0.0 }
 0x325   : > { %421 = vrcp.f32 %v262_v20 }
 0x32e   : > { %v420_v21 = vpop.eup %419 }
 0x32f   : > { %v270_v22 = vmul.f32 %v420_v21, %v267_v19  ;;  %v422_v29 = vpop.eup %421 }
 0x330   : > { %v264_v30 = vmul.f32 %v422_v29, %v257_v11 }
 0x331   : > { %v272_v24 = vsel %vm271_vm7, %v267_v19, %v270_v22 }
 0x332   : > { %v275_v27 = vsel %vm273_vm8, %v274_v23, %v272_v24  ;;  %v268_v31 = vmul.f32 0.1, %v264_v30 }
 0x333   : > { %v276_v28 = vadd.f32 1e-08, %v275_v27 }
 0x335   : > { %423 = vrcp.f32 %v276_v28 }
 0x33e   :  { %38 = sbr.rel (!%p36_p0) target bundleno = 7 (0x7), region = 56 }
 0x33f   : > { %v424_v32 = vpop.eup %423 }
 0x340   : > { %v278_v33 = vmul.f32 %v424_v32, %v268_v31 }
 0x342   : > { %v279_v34 = vsub.f32 %v471_v12, %v278_v33  }
 0x344   : > { %v635_v12 = vmov %v279_v34  ;;  %v281_v35 = vand.u32 (%p36_p0), 2147483647, %v279_v34  ;;  %v280_v39 = vmax.f32 (%p36_p0), %v279_v34, 0.0 }
 0x346   :  { %v282_v36 = vsub.f32 0.0, %v281_v35 }
 0x348   :  { %v283_v37 = vmul.f32 1.442695, %v282_v36 }
 0x34a   :  { %425 = vpow2.f32 %v283_v37 }
 0x354   :  { %v426_v12 = vpop.eup %425 }
 0x355   :  { %v285_v38 = vadd.f32 1.0, %v426_v12 }
 0x357   :  { %427 = vlog2.f32 %v285_v38 }
 0x361   :  { %v428_v40 = vpop.eup %427 }
 0x362   :  { %v287_v41 = vmul.f32 0.6931472, %v428_v40 }
 0x364   :  { %v288_v42 = vadd.f32 %v287_v41, %v280_v39 }
 0x366   :  { %290 = vst.msk [vmem:[%s634_s7] sm:$0x3] %vm289_vm9, %v288_v42 }

// kernel: run_no_noise.7
= control target key start
LH: loop header
LB: loop body
LE: loop exit
PB: predicated region body
PF: predicated region fallthrough
CT: control target
= control target key end

     0   :  { %vm40_vm0 = vcmask 123904   ;;  %s712_s0 = inlined_call_operand.<no memory space> [shape: f32[1,1], index: 0, kind: input, shape index: {}]   ;;  %s713_s1 = inlined_call_operand.vmem [shape: f32[2,16], index: 1, kind: input, shape index: {}]   ;;  %s714_s2 = inlined_call_operand.vmem [shape: f32[2,16], index: 2, kind: input, shape index: {}]   ;;  %s715_s3 = inlined_call_operand.vmem [shape: f32[2,16], index: 3, kind: input, shape index: {}]   ;;  %s716_s4 = inlined_call_operand.vmem [shape: f32[2,16], index: 4, kind: input, shape index: {}, may-alias: {4,5}]   ;;  %s717_s5 = inlined_call_operand.vmem [shape: f32[2,16], index: 5, kind: input, shape index: {}, may-alias: {4,5}]   ;;  %s718_s6 = inlined_call_operand.vmem [shape: f32[16,10], index: 6, kind: input, shape index: {}]   ;;  %s719_s7 = inlined_call_operand.vmem [shape: f32[1,10], index: 7, kind: input, shape index: {}]   ;;  %s720_s8 = inlined_call_operand.vmem [shape: s32[4,2], index: 8, kind: output, shape index: {0}]   ;;  %s721_s9 = inlined_call_operand.hbm [shape: f32[2,16], index: 9, kind: output, shape index: {1}]  }
   0x1   :  { %v39_v0 = vld [vmem:[%s714_s2] sm:$0x3] }
   0x2   :  { %16 = vsyncpa [#allocation4], 0  ;;  %v41_v1 = vsel %vm40_vm0, %v39_v0, -inf  ;;  %v36_v2 = vld [vmem:[%s718_s6] sm:$0xff]  ;;  %v37_v3 = vld [vmem:[%s718_s6 + $0x8] sm:$0xff]  ;;  %v576_v5 = vmov 0.0|0.0   ;;  %v268_v14 = vstv %s712_s0  ;;  %v142_v48 = vlaneseq }
   0x3   :  { %42 = vmax.xlane.f32.xlu0 %v41_v1  ;;  %v537_v4 = vpack.c.bf16 %v37_v3, %v36_v2  ;;  %536 = vmatprep.subr.bf16.mxu0 %v576_v5  ;;  %vm577_vm1 = vmmov 0   ;;  %v578_v6 = vmov 0.0   ;;  %vm44_vm2 = vcmask 1041408   ;;  %v35_v12 = vld [vmem:[%s715_s3] sm:$0x3]  ;;  %s579_s3 = smov [#allocation3]  }
   0x4   :  { %539 = vmatprep.subr.bf16.mxu1 %v576_v5  ;;  %512 = vmatprep.mubr.msk.f32.mxu0 %vm577_vm1, %v578_v6  ;;  %v267_v15 = vld [vmem:[%s716_s4] sm:$0x3]  ;;  %v52_v17 = vmul.f32 %v35_v12, %v35_v12  ;;  %vm64_vm4 = vcmask 130048   ;;  %vm138_vm5 = vcmask 74752   ;;  %v672_v49 = vand.u32 127, %v142_v48  ;;  %s480_s4 = sshll.u32 %s579_s3, 4  ;;  %s481_s4 = int_to_ptr.vmem [resolvable:$true] %s480_s4 }
   0x5   :  { %538 = vmatpush3.bf16.msra.mxu0 %v537_v4  ;;  %541 = vmatpush3.bf16.msra.mxu1 %v537_v4  ;;  %v370_v18 = vld [vmem:[%s717_s5] sm:$0x3]  ;;  %v269_v20 = vmul.f32 %v268_v14, %v267_v15  ;;  %s552_s5 = scalar_lea.vmem %s481_s4, 32  ;;  %p557_p1 = scmp.lt.s32.totalorder %s481_s4, %s481_s4 }
   0x6   :  { %542 = vmatprep.subr.bf16.mxu0 %v576_v5  ;;  %519 = vmatprep.mubr.msk.f32.mxu1 %vm577_vm1, %v578_v6  ;;  %v34_v21 = vld [vmem:[%s713_s1] sm:$0x3]  ;;  %v371_v22 = vmul.f32 %v370_v18, %v268_v14  ;;  %p553_p0 = scmp.ne.s32.totalorder %s481_s4, %s552_s5  ;;  %p558_p2 = scmp.lt.s32.totalorder %s552_s5, %s552_s5 }
   0x7   :  { %545 = vmatprep.subr.bf16.mxu1 %v576_v5  ;;  %v270_v26 = vadd.f32 %v269_v20, %v34_v21  ;;  %v491_v31 = vld [vmem:[%s719_s7] ss:$0 sm:$0xff] }
   0x8   :  { %v372_v28 = vadd.f32 %v371_v22, %v34_v21  ;;  %p559_p3 = por %p558_p2, %p557_p1 }
   0xa   :  { %p560_p4 = pnand %p559_p3, %p553_p0 }
  0x90   :  { %v43_v7 = vpop.xlane.xlu0 %42 }
  0x91   :  { %v45_v8 = vsel %vm44_vm2, %v43_v7, -inf }
  0x92   :  { %v46_v9 = vrot.slane %v45_v8, 4 }
  0x94   :  { %v47_v10 = vmax.f32 %v45_v8, %v46_v9 }
  0x96   :  { %v48_v11 = vrot.slane %v47_v10, 2 }
  0x98   :  { %v49_v13 = vmax.f32 %v47_v10, %v48_v11 }
  0x9a   :  { %v50_v16 = vrot.slane %v49_v13, 1 }
  0x9c   :  { %v51_v19 = vmax.f32 %v49_v13, %v50_v16 }
  0x9e   :  { %vm53_vm3 = vcmp.gt.f32.partialorder %v52_v17, %v51_v19 }
  0x9f   :  { %v490_v23 = vsel %vm53_vm3, 1.0, %v578_v6 }
  0xa0   :  { %v57_v24 = vmul.f32 %v490_v23, %v34_v21  ;;  %56 = vst.msk [vmem:[#allocation3] sm:$0x3] %vm40_vm0, %v490_v23  ;;  %v167_v25 = vsub.f32 1.0, %v490_v23  ;;  %v271_v29 = vmul.f32 %v490_v23, %v270_v26 }
  0xa2   :  { %513 = vmatmul.mubr.msk.f32.vlgmr.msra.gmra.mrb[0].mxu0 %vm64_vm4, %v57_v24  ;;  %v168_v27 = vmul.f32 %v167_v25, %v34_v21  ;;  %v373_v30 = vmul.f32 %v372_v28, %v167_v25 }
  0xa3   :  { %544 = vmatpush3.bf16.msra.mxu0 %v537_v4  ;;  %526 = vmatprep.mubr.msk.f32.mxu0 %vm577_vm1, %v578_v6 }
  0xa4   :  { %520 = vmatmul.mubr.msk.f32.vlgmr.msra.gmra.mrb[0].mxu1 %vm64_vm4, %v168_v27 }
  0xa5   :  { %547 = vmatpush3.bf16.msra.mxu1 %v537_v4  ;;  %533 = vmatprep.mubr.msk.f32.mxu1 %vm577_vm1, %v578_v6 }
  0xa6   :  { %527 = vmatmul.mubr.msk.f32.vlgmr.msra.gmra.mrb[2].mxu0 %vm64_vm4, %v271_v29 }
  0xa8   :  { %534 = vmatmul.mubr.msk.f32.vlgmr.msra.gmra.mrb[2].mxu1 %vm64_vm4, %v373_v30 }
 0x175   :  { %v134_v32 = vpop.f32.mrb[0].mxu0 }
 0x176   :  { %v135_v33 = vadd.f32 %v491_v31, %v134_v32  ;;  %v514_v34 = vpop.f32.mrb[1].mxu0 }
 0x177   :  { %v238_v35 = vpop.f32.mrb[0].mxu1 }
 0x178   :  { %v239_v36 = vadd.f32 %v491_v31, %v238_v35  ;;  %v521_v37 = vpop.f32.mrb[1].mxu1  ;;  %v139_v38 = vsel %vm138_vm5, %v135_v33, -inf }
 0x179   :  { %140 = vmax.xlane.f32.xlu0 %v139_v38  ;;  %v341_v39 = vpop.f32.mrb[2].mxu0 }
 0x17a   :  { %v342_v40 = vadd.f32 %v491_v31, %v341_v39  ;;  %v528_v41 = vpop.f32.mrb[3].mxu0  ;;  %v242_v42 = vsel %vm138_vm5, %v239_v36, -inf }
 0x17b   :  { %243 = vmax.xlane.f32.xlu1 %v242_v42  ;;  %v443_v43 = vpop.f32.mrb[2].mxu1 }
 0x17c   :  { %v444_v44 = vadd.f32 %v491_v31, %v443_v43  ;;  %v535_v45 = vpop.f32.mrb[3].mxu1  ;;  %v345_v47 = vsel %vm138_vm5, %v342_v40, -inf }
 0x17e   :  { %v447_v46 = vsel %vm138_vm5, %v444_v44, -inf }
 0x17f   :  { %448 = vmax.xlane.f32.xlu0 %v447_v46  ;;  %346 = vmax.xlane.f32.xlu1 %v345_v47 }
 0x206   :  { %v141_v50 = vpop.xlane.xlu0 %140 }
 0x207   :  { %vm144_vm6 = vcmp.ge.f32.partialorder %v135_v33, %v141_v50 }
 0x208   :  { %v145_v51 = vsel %vm144_vm6, %v672_v49, 10  ;;  %v244_v52 = vpop.xlane.xlu1 %243 }
 0x209   :  { %v146_v53 = vsel %vm138_vm5, %v145_v51, 2147483647  ;;  %vm245_vm7 = vcmp.ge.f32.partialorder %v239_v36, %v244_v52 }
 0x20a   :  { %v246_v54 = vsel %vm245_vm7, %v672_v49, 10  ;;  %v148_v55 = vshra.s32 %v146_v53, 16  ;;  %v147_v6 = vand.u32 65535, %v146_v53 }
 0x20b   :  { %v247_v56 = vsel %vm138_vm5, %v246_v54, 2147483647 }
 0x20c   :  { %v449_v57 = vpop.xlane.xlu0 %448  ;;  %v347_v58 = vpop.xlane.xlu1 %346  ;;  %v150_v59 = vcvt.s32.f32 %v148_v55  ;;  %v249_v60 = vshra.s32 %v247_v56, 16  ;;  %v248_v7 = vand.u32 65535, %v247_v56  ;;  %v149_v9 = vcvt.s32.f32 %v147_v6 }
 0x20d   :  { %vm450_vm8 = vcmp.ge.f32.partialorder %v444_v44, %v449_v57  ;;  %vm348_vm9 = vcmp.ge.f32.partialorder %v342_v40, %v347_v58 }
 0x20e   :  { %v451_v61 = vsel %vm450_vm8, %v672_v49, 10  ;;  %v349_v62 = vsel %vm348_vm9, %v672_v49, 10  ;;  %151 = vmin.xlane.f32.xlu1 %v150_v59  ;;  %v251_v63 = vcvt.s32.f32 %v249_v60  ;;  %v250_v12 = vcvt.s32.f32 %v248_v7 }
 0x20f   :  { %v452_v0 = vsel %vm138_vm5, %v451_v61, 2147483647  ;;  %v350_v1 = vsel %vm138_vm5, %v349_v62, 2147483647 }
 0x210   :  { %252 = vmin.xlane.f32.xlu0 %v251_v63  ;;  %v454_v2 = vshra.s32 %v452_v0, 16  ;;  %v352_v3 = vshra.s32 %v350_v1, 16  ;;  %v453_v13 = vand.u32 65535, %v452_v0  ;;  %v351_v14 = vand.u32 65535, %v350_v1 }
 0x212   :  { %v456_v4 = vcvt.s32.f32 %v454_v2  ;;  %v354_v5 = vcvt.s32.f32 %v352_v3  ;;  %v455_v18 = vcvt.s32.f32 %v453_v13  ;;  %v353_v19 = vcvt.s32.f32 %v351_v14 }
 0x214   :  { %457 = vmin.xlane.f32.xlu0 %v456_v4  ;;  %355 = vmin.xlane.f32.xlu1 %v354_v5 }
 0x29b   :  { %v152_v8 = vpop.xlane.xlu1 %151 }
 0x29c   :  { %vm153_vm10 = vcmp.eq.f32.partialorder %v150_v59, %v152_v8 }
 0x29d   :  { %v253_v10 = vpop.xlane.xlu0 %252  ;;  %v154_v11 = vsel %vm153_vm10, %v149_v9, inf }
 0x29e   :  { %155 = vmin.xlane.f32.xlu1 %v154_v11  ;;  %vm254_vm11 = vcmp.eq.f32.partialorder %v251_v63, %v253_v10 }
 0x29f   :  { %v255_v15 = vsel %vm254_vm11, %v250_v12, inf }
 0x2a0   :  { %256 = vmin.xlane.f32.xlu0 %v255_v15 }
 0x2a1   :  { %v458_v16 = vpop.xlane.xlu0 %457  ;;  %v356_v17 = vpop.xlane.xlu1 %355 }
 0x2a2   :  { %vm459_vm12 = vcmp.eq.f32.partialorder %v456_v4, %v458_v16  ;;  %vm357_vm13 = vcmp.eq.f32.partialorder %v354_v5, %v356_v17 }
 0x2a3   :  { %v460_v20 = vsel %vm459_vm12, %v455_v18, inf  ;;  %v358_v21 = vsel %vm357_vm13, %v353_v19, inf }
 0x2a4   :  { %461 = vmin.xlane.f32.xlu0 %v460_v20  ;;  %359 = vmin.xlane.f32.xlu1 %v358_v21 }
 0x2a5   :  { %563 = shalt.err (!%p560_p4)
}
 0x2a6   :  { %s564_s24 = scalar_lea.hbm %s721_s9, 32 }
 0x2a7   :  { %p565_p5 = scmp.ne.s32.totalorder %s721_s9, %s564_s24  ;;  %p568_p6 = scmp.lt.u32.totalorder %s564_s24, %s721_s9 }
 0x2a9   :  { %p570_p7 = pnand %p568_p6, %p565_p5 }
 0x2ab   :  { %573 = shalt.err (!%p570_p7)
}
 0x2ac   :  { %483 = dma.vmem_to_hbm [thread:$0]  %s481_s4, 32, %s721_s9, [#allocation4]   ;;  %v158_v22 = vcvt.f32.s32 %v152_v8  ;;  %v162_v23 = vshrl.u32 %v142_v48, 7  ;;  %v259_v24 = vcvt.f32.s32 %v253_v10  ;;  %v464_v29 = vcvt.f32.s32 %v458_v16 }
 0x2ad   :  { %v362_v32 = vcvt.f32.s32 %v356_v17  ;;  %vm165_vm14 = vcmask 8192  }
 0x2ae   :  { %v159_v26 = vshll.u32 %v158_v22, 16  ;;  %v163_v27 = vsub.s32 %v672_v49, %v162_v23  ;;  %v260_v31 = vshll.u32 %v259_v24, 16  ;;  %v465_v37 = vshll.u32 %v464_v29, 16 }
 0x2af   :  { %v363_v40 = vshll.u32 %v362_v32, 16 }
 0x32b   :  { %v156_v25 = vpop.xlane.xlu1 %155 }
 0x32c   :  { %v157_v28 = vcvt.f32.s32 %v156_v25 }
 0x32d   :  { %v257_v30 = vpop.xlane.xlu0 %256 }
 0x32e   :  { %v160_v33 = vadd.s32 %v159_v26, %v157_v28  ;;  %v258_v34 = vcvt.f32.s32 %v257_v30 }
 0x330   :  { %v164_v35 = vrot.slane %v160_v33, %v163_v27  ;;  %v261_v36 = vadd.s32 %v260_v31, %v258_v34 }
 0x331   :  { %v462_v38 = vpop.xlane.xlu0 %461  ;;  %v360_v39 = vpop.xlane.xlu1 %359 }
 0x332   :  { %166 = vst.msk [vmem:[%s720_s8] sm:$0x1] %vm165_vm14, %v164_v35  ;;  %v265_v41 = vrot.slane %v261_v36, %v163_v27  ;;  %v463_v42 = vcvt.f32.s32 %v462_v38  ;;  %v361_v43 = vcvt.f32.s32 %v360_v39 }
 0x334   :  { %266 = vst.msk [vmem:[%s720_s8 + $0x1] sm:$0x1] %vm165_vm14, %v265_v41  ;;  %v466_v44 = vadd.s32 %v465_v37, %v463_v42  ;;  %v364_v45 = vadd.s32 %v363_v40, %v361_v43 }
 0x336   :  { %v470_v46 = vrot.slane %v466_v44, %v163_v27  ;;  %v368_v47 = vrot.slane %v364_v45, %v163_v27 }
 0x338   :  { %471 = vst.msk [vmem:[%s720_s8 + $0x3] sm:$0x1] %vm165_vm14, %v470_v46  ;;  %369 = vst.msk [vmem:[%s720_s8 + $0x2] sm:$0x1] %vm165_vm14, %v368_v47 }
 0x339   :  { %574 = dma.done.wait [#allocation4], 32  }
 0x33a   :  { %575 = vsyncadd [#allocation4], 4294967264 }
 0x33b   :  { %489 = vsyncpa [#allocation4], 1 }

</bundles_post_ra>
